<compile_context>
chip_gen: v6e
topology: v6e:2x2x1
jax: 0.10.0
libtpu: 0.0.40
codegen_flags: <defaults>
</compile_context>

<pallas_src>
import numpy as np

import jax
import jax.numpy as jnp
from jax.experimental import pallas as pl
from jax.experimental.pallas import tpu as pltpu


_PARAM_ORDER = ("w1", "b1", "w2", "b2", "w3", "b3", "w4", "b4", "w5", "b5")


def _round_up(x, m):
    return ((x + m - 1) // m) * m


# ----------------------------------------------------------------------------
# The fused kernel: whole QNetworkCNN forward for one batch tile.
# x_ref: (TB, H*W*C) f32 -- batch on sublanes, flattened (h, w, c) on lanes.
# All weights are pre-laid-out so each layer is a single lane-dense matmul.
# ----------------------------------------------------------------------------
def _fused_qnet_kernel(x_ref, w1_ref, b1_ref, w2_ref, b2_ref, w3_ref, b3_ref,
                       w4_ref, b4_ref, w5_ref, b5_ref, o_ref):
    x = x_ref[...].astype(jnp.bfloat16)

    # Conv2d(C,16,k=2) + ReLU as one lowered matmul; output lanes = (p, q, oc1).
    y1 = jnp.dot(x, w1_ref[...], preferred_element_type=jnp.float32)
    y1 = jnp.maximum(y1 + b1_ref[...], 0.0)

    # Conv2d(16,32,k=2) + ReLU as one lowered matmul; output lanes = (r, s, oc2).
    y2 = jnp.dot(y1.astype(jnp.bfloat16), w2_ref[...],
                 preferred_element_type=jnp.float32)
    y2 = jnp.maximum(y2 + b2_ref[...], 0.0)

    # Linear(cnn_out,128) + ReLU.  PyTorch's NCHW flatten order (c, p, q) is
    # folded into w3's K ordering, so this is one K=cnn_out dot (no 36-way loop).
    h = jnp.dot(y2.astype(jnp.bfloat16), w3_ref[...],
                preferred_element_type=jnp.float32)
    h = jnp.maximum(h + b3_ref[...], 0.0)

    # Linear(128,64) + ReLU.
    h = jnp.dot(h.astype(jnp.bfloat16), w4_ref[...],
                preferred_element_type=jnp.float32)
    h = jnp.maximum(h + b4_ref[...], 0.0)

    # Linear(64, action_dim).
    q = jnp.dot(h.astype(jnp.bfloat16), w5_ref[...],
                preferred_element_type=jnp.float32) + b5_ref[...]
    o_ref[...] = q.astype(o_ref.dtype)


# ----------------------------------------------------------------------------
# Wrapper: batch tiling + single pallas_call.
# ----------------------------------------------------------------------------
def qnetwork_cnn_forward(x_nhwc, params, *, block_b=256):
    B, H, W, C = x_nhwc.shape
    A = params["b5"].shape[1]
    K0 = H * W * C
    S1 = (H - 1) * (W - 1) * 16            # conv1 output features (p, q, oc1)
    S2 = (H - 2) * (W - 2) * 32            # conv2 output features (cnn_out)

    # ---- batch tile selection (always a multiple of 8) ----------------------
    tb = max(8, _round_up(min(block_b, B), 8))
    # Ensure >= 2 grid steps for decently sized batches so chips with two
    # TensorCores (v7x) get both engaged via the "parallel" axis; the extra
    # grid-step overhead on single-TC v5e/v6e is negligible at >=64-row tiles.
    if _round_up(B, tb) // tb < 2 and B >= 128:
        tb = max(64, _round_up(pl.cdiv(B, 2), 8))
    Bp = _round_up(B, tb)

    # Lane-dense input: (B, H*W*C).  Reshape of contiguous NHWC is free; pad
    # rows with zeros up to the tile multiple (ignored on output).
    x_flat = x_nhwc.astype(jnp.float32).reshape(B, K0)
    if Bp != B:
        x_flat = jnp.pad(x_flat, ((0, Bp - B), (0, 0)))

    def const_spec(a):
        nd = a.ndim
        return pl.BlockSpec(a.shape, lambda i, nd=nd: (0,) * nd)

    flops = 2 * Bp * (K0 * S1 + S1 * S2 + S2 * 128 + 128 * 64 + 64 * A)
    weight_bytes = sum(int(v.size) * v.dtype.itemsize for v in params.values())
    cost = pl.CostEstimate(
        flops=int(flops), transcendentals=0,
        bytes_accessed=int(Bp * K0 * 4 + weight_bytes + Bp * A * 4))

    fwd = pl.pallas_call(
        _fused_qnet_kernel,
        out_shape=jax.ShapeDtypeStruct((Bp, A), jnp.float32),
        grid=(Bp // tb,),
        in_specs=[pl.BlockSpec((tb, K0), lambda i: (i, 0))]
                 + [const_spec(params[k]) for k in _PARAM_ORDER],
        out_specs=pl.BlockSpec((tb, A), lambda i: (i, 0)),
        compiler_params=pltpu.CompilerParams(
            dimension_semantics=("parallel",),
            vmem_limit_bytes=32 * 1024 * 1024),
        cost_estimate=cost,
    )
    q = fwd(x_flat, *(params[k] for k in _PARAM_ORDER))
    return q[:B]


# ----------------------------------------------------------------------------
# Parameter construction: PyTorch-style init, then folded into kernel layout.
# ----------------------------------------------------------------------------
def _lower_conv2x2(w_pt, h_in, w_in):
    """(oc, ic, 2, 2) conv weight -> (h_in*w_in*ic, OH*OW*oc) block-Toeplitz
    matrix so that  y[b,(p,q,oc)] = sum_k x[b,(h,w,c)] * WL[k, (p,q,oc)]."""
    w = np.asarray(w_pt, dtype=np.float32)
    oc, ic = w.shape[0], w.shape[1]
    oh, ow = h_in - 1, w_in - 1
    wl = np.zeros((h_in, w_in, ic, oh, ow, oc), np.float32)
    for p in range(oh):
        for q in range(ow):
            for kh in range(2):
                for kw in range(2):
                    wl[p + kh, q + kw, :, p, q, :] = w[:, :, kh, kw].T
    return jnp.asarray(wl.reshape(h_in * w_in * ic, oh * ow * oc))


def init_params(key, obs_shape, action_dim):
    H, W, C = obs_shape
    OH1, OW1 = H - 1, W - 1
    OH2, OW2 = H - 2, W - 2
    cnn_out = 32 * OH2 * OW2
    ks = jax.random.split(key, 10)

    def unif(k, shape, fan_in):
        bound = 1.0 / jnp.sqrt(jnp.float32(fan_in))
        return jax.random.uniform(k, shape, jnp.float32, -bound, bound)

    def q16(w):   # snap to the bf16 grid (kept in f32 for the reference model)
        return w.astype(jnp.bfloat16).astype(jnp.float32)

    # PyTorch-layout parameters (reference / source of truth).
    w1_pt = q16(unif(ks[0], (16, C, 2, 2), C * 4))
    b1_pt = unif(ks[1], (16,), C * 4)
    w2_pt = q16(unif(ks[2], (32, 16, 2, 2), 16 * 4))
    b2_pt = unif(ks[3], (32,), 16 * 4)
    w3_pt = q16(unif(ks[4], (128, cnn_out), cnn_out))
    b3_pt = unif(ks[5], (128,), cnn_out)
    w4_pt = q16(unif(ks[6], (64, 128), 128))
    b4_pt = unif(ks[7], (64,), 128)
    w5_pt = q16(unif(ks[8], (action_dim, 64), 64))
    b5_pt = unif(ks[9], (action_dim,), 64)

    ref = dict(w1=w1_pt, b1=b1_pt, w2=w2_pt, b2=b2_pt, w3=w3_pt, b3=b3_pt,
               w4=w4_pt, b4=b4_pt, w5=w5_pt, b5=b5_pt)

    # Kernel layout (all MXU operands bf16, biases f32 row vectors):
    #   conv1/conv2: lowered block-Toeplitz matrices (single matmul per conv)
    #   fc1: K reordered from PyTorch's NCHW flatten (c,p,q) to ours (p,q,c)
    w1_k = _lower_conv2x2(w1_pt, H, W).astype(jnp.bfloat16)          # (HWC, S1)
    b1_k = jnp.tile(b1_pt, OH1 * OW1).reshape(1, OH1 * OW1 * 16)
    w2_k = _lower_conv2x2(w2_pt, OH1, OW1).astype(jnp.bfloat16)      # (S1, S2)
    b2_k = jnp.tile(b2_pt, OH2 * OW2).reshape(1, cnn_out)
    w3_k = jnp.transpose(w3_pt.reshape(128, 32, OH2, OW2),
                         (2, 3, 1, 0)).reshape(cnn_out, 128).astype(jnp.bfloat16)
    b3_k = b3_pt.reshape(1, 128)
    w4_k = w4_pt.T.astype(jnp.bfloat16)
    b4_k = b4_pt.reshape(1, 64)
    w5_k = w5_pt.T.astype(jnp.bfloat16)
    b5_k = b5_pt.reshape(1, action_dim)

    kp = dict(w1=w1_k, b1=b1_k, w2=w2_k, b2=b2_k, w3=w3_k, b3=b3_k,
              w4=w4_k, b4=b4_k, w5=w5_k, b5=b5_k)
    return kp, ref


# ----------------------------------------------------------------------------
# Pure-JAX reference (mirrors QNetworkCNN.forward with PyTorch-layout weights)
# ----------------------------------------------------------------------------
def reference_forward(x_nhwc, pt):
    B = x_nhwc.shape[0]

    def conv2x2_relu(x, w_pt, b_pt):               # x NHWC, w_pt (oc, ic, 2, 2)
        OH, OW = x.shape[1] - 1, x.shape[2] - 1
        cols = [x[:, kh:kh + OH, kw:kw + OW, :] for kh in range(2) for kw in range(2)]
        p = jnp.concatenate(cols, axis=-1).reshape(B * OH * OW, -1)
        wm = jnp.transpose(w_pt, (2, 3, 1, 0)).reshape(-1, w_pt.shape[0])
        return jnp.maximum(p @ wm + b_pt, 0.0).reshape(B, OH, OW, -1)

    y1 = conv2x2_relu(x_nhwc, pt["w1"], pt["b1"])
    y2 = conv2x2_relu(y1, pt["w2"], pt["b2"])
    feat = jnp.transpose(y2, (0, 3, 1, 2)).reshape(B, -1)    # NCHW flatten
    h = jnp.maximum(feat @ pt["w3"].T + pt["b3"], 0.0)
    h = jnp.maximum(h @ pt["w4"].T + pt["b4"], 0.0)
    return h @ pt["w5"].T + pt["b5"]


if __name__ == "__main__":
    obs_shape = (8, 8, 3)        # (H, W, C) -- forward expects NHWC input
    action_dim = 4
    batch = 2

    key = jax.random.PRNGKey(0)
    k_param, k_x = jax.random.split(key)
    params, ref_params = init_params(k_param, obs_shape, action_dim)

    x = jax.random.uniform(k_x, (batch, *obs_shape), jnp.float32)   # NHWC

    q = jax.jit(qnetwork_cnn_forward)(x, params)
    q = jax.block_until_ready(q)
    assert q.shape == (batch, action_dim), q.shape
    assert q.dtype == jnp.float32

    q_ref = reference_forward(x, ref_params)
    assert jnp.allclose(q, q_ref, atol=1e-1, rtol=5e-2), (
        float(jnp.max(jnp.abs(q - q_ref))), q, q_ref)

    print("KERNEL_OK")
</pallas_src>

<mosaic_0001>
module attributes {stable_mosaic.version = 11 : i64} {
  func.func @_fused_qnet_kernel(%arg0: i32, %arg1: memref<8x192xf32, #tpu.memory_space<vmem>>, %arg2: memref<192x784xbf16, #tpu.memory_space<vmem>>, %arg3: memref<1x784xf32, #tpu.memory_space<vmem>>, %arg4: memref<784x1152xbf16, #tpu.memory_space<vmem>>, %arg5: memref<1x1152xf32, #tpu.memory_space<vmem>>, %arg6: memref<1152x128xbf16, #tpu.memory_space<vmem>>, %arg7: memref<1x128xf32, #tpu.memory_space<vmem>>, %arg8: memref<128x64xbf16, #tpu.memory_space<vmem>>, %arg9: memref<1x64xf32, #tpu.memory_space<vmem>>, %arg10: memref<64x4xbf16, #tpu.memory_space<vmem>>, %arg11: memref<1x4xf32, #tpu.memory_space<vmem>>, %arg12: memref<8x4xf32, #tpu.memory_space<vmem>>) attributes {dimension_semantics = [#tpu.dimension_semantics<parallel>], iteration_bounds = array<i64: 1>, scalar_prefetch = 0 : i64, scratch_operands = 0 : i64, tpu.core_type = #tpu.core_type<tc>, window_params = [{transform_indices = @transform_0, window_bounds = array<i64: 8, 192>}, {pipeline_mode = #tpu.pipeline_mode<synchronous>, transform_indices = @transform_1, window_bounds = array<i64: 192, 784>}, {pipeline_mode = #tpu.pipeline_mode<synchronous>, transform_indices = @transform_2, window_bounds = array<i64: 1, 784>}, {pipeline_mode = #tpu.pipeline_mode<synchronous>, transform_indices = @transform_3, window_bounds = array<i64: 784, 1152>}, {pipeline_mode = #tpu.pipeline_mode<synchronous>, transform_indices = @transform_4, window_bounds = array<i64: 1, 1152>}, {pipeline_mode = #tpu.pipeline_mode<synchronous>, transform_indices = @transform_5, window_bounds = array<i64: 1152, 128>}, {pipeline_mode = #tpu.pipeline_mode<synchronous>, transform_indices = @transform_6, window_bounds = array<i64: 1, 128>}, {pipeline_mode = #tpu.pipeline_mode<synchronous>, transform_indices = @transform_7, window_bounds = array<i64: 128, 64>}, {pipeline_mode = #tpu.pipeline_mode<synchronous>, transform_indices = @transform_8, window_bounds = array<i64: 1, 64>}, {pipeline_mode = #tpu.pipeline_mode<synchronous>, transform_indices = @transform_9, window_bounds = array<i64: 64, 4>}, {pipeline_mode = #tpu.pipeline_mode<synchronous>, transform_indices = @transform_10, window_bounds = array<i64: 1, 4>}, {transform_indices = @transform_11, window_bounds = array<i64: 8, 4>}]} {
    %c0 = arith.constant 0 : index
    %c0_0 = arith.constant 0 : index
    %0 = vector.load %arg1[%c0, %c0_0] : memref<8x192xf32, #tpu.memory_space<vmem>>, vector<8x192xf32>
    %1 = arith.truncf %0 : vector<8x192xf32> to vector<8x192xbf16>
    %c0_1 = arith.constant 0 : index
    %c0_2 = arith.constant 0 : index
    %2 = vector.load %arg2[%c0_1, %c0_2] : memref<192x784xbf16, #tpu.memory_space<vmem>>, vector<192x784xbf16>
    %cst = arith.constant dense<0.000000e+00> : vector<8x784xf32>
    %3 = tpu.matmul %1, %2, %cst {dimension_numbers = #tpu.dot_dimension_numbers<[1], [0], [0], [1], [0, 0, 1, 1], [], []>} : vector<8x192xbf16>, vector<192x784xbf16>, vector<8x784xf32> -> vector<8x784xf32>
    %c0_3 = arith.constant 0 : index
    %c0_4 = arith.constant 0 : index
    %4 = vector.load %arg3[%c0_3, %c0_4] : memref<1x784xf32, #tpu.memory_space<vmem>>, vector<1x784xf32>
    %5 = vector.broadcast %4 : vector<1x784xf32> to vector<8x784xf32>
    %6 = arith.addf %3, %5 : vector<8x784xf32>
    %cst_5 = arith.constant 0.000000e+00 : f32
    %7 = vector.broadcast %cst_5 : f32 to vector<8x784xf32>
    %8 = arith.maximumf %6, %7 : vector<8x784xf32>
    %9 = arith.truncf %8 : vector<8x784xf32> to vector<8x784xbf16>
    %c0_6 = arith.constant 0 : index
    %c0_7 = arith.constant 0 : index
    %10 = vector.load %arg4[%c0_6, %c0_7] : memref<784x1152xbf16, #tpu.memory_space<vmem>>, vector<784x1152xbf16>
    %cst_8 = arith.constant dense<0.000000e+00> : vector<8x1152xf32>
    %11 = tpu.matmul %9, %10, %cst_8 {dimension_numbers = #tpu.dot_dimension_numbers<[1], [0], [0], [1], [0, 0, 1, 1], [], []>} : vector<8x784xbf16>, vector<784x1152xbf16>, vector<8x1152xf32> -> vector<8x1152xf32>
    %c0_9 = arith.constant 0 : index
    %c0_10 = arith.constant 0 : index
    %12 = vector.load %arg5[%c0_9, %c0_10] : memref<1x1152xf32, #tpu.memory_space<vmem>>, vector<1x1152xf32>
    %13 = vector.broadcast %12 : vector<1x1152xf32> to vector<8x1152xf32>
    %14 = arith.addf %11, %13 : vector<8x1152xf32>
    %cst_11 = arith.constant 0.000000e+00 : f32
    %15 = vector.broadcast %cst_11 : f32 to vector<8x1152xf32>
    %16 = arith.maximumf %14, %15 : vector<8x1152xf32>
    %17 = arith.truncf %16 : vector<8x1152xf32> to vector<8x1152xbf16>
    %c0_12 = arith.constant 0 : index
    %c0_13 = arith.constant 0 : index
    %18 = vector.load %arg6[%c0_12, %c0_13] : memref<1152x128xbf16, #tpu.memory_space<vmem>>, vector<1152x128xbf16>
    %cst_14 = arith.constant dense<0.000000e+00> : vector<8x128xf32>
    %19 = tpu.matmul %17, %18, %cst_14 {dimension_numbers = #tpu.dot_dimension_numbers<[1], [0], [0], [1], [0, 0, 1, 1], [], []>} : vector<8x1152xbf16>, vector<1152x128xbf16>, vector<8x128xf32> -> vector<8x128xf32>
    %c0_15 = arith.constant 0 : index
    %c0_16 = arith.constant 0 : index
    %20 = vector.load %arg7[%c0_15, %c0_16] : memref<1x128xf32, #tpu.memory_space<vmem>>, vector<1x128xf32>
    %21 = vector.broadcast %20 : vector<1x128xf32> to vector<8x128xf32>
    %22 = arith.addf %19, %21 : vector<8x128xf32>
    %cst_17 = arith.constant 0.000000e+00 : f32
    %23 = vector.broadcast %cst_17 : f32 to vector<8x128xf32>
    %24 = arith.maximumf %22, %23 : vector<8x128xf32>
    %25 = arith.truncf %24 : vector<8x128xf32> to vector<8x128xbf16>
    %c0_18 = arith.constant 0 : index
    %c0_19 = arith.constant 0 : index
    %26 = vector.load %arg8[%c0_18, %c0_19] : memref<128x64xbf16, #tpu.memory_space<vmem>>, vector<128x64xbf16>
    %cst_20 = arith.constant dense<0.000000e+00> : vector<8x64xf32>
    %27 = tpu.matmul %25, %26, %cst_20 {dimension_numbers = #tpu.dot_dimension_numbers<[1], [0], [0], [1], [0, 0, 1, 1], [], []>} : vector<8x128xbf16>, vector<128x64xbf16>, vector<8x64xf32> -> vector<8x64xf32>
    %c0_21 = arith.constant 0 : index
    %c0_22 = arith.constant 0 : index
    %28 = vector.load %arg9[%c0_21, %c0_22] : memref<1x64xf32, #tpu.memory_space<vmem>>, vector<1x64xf32>
    %29 = vector.broadcast %28 : vector<1x64xf32> to vector<8x64xf32>
    %30 = arith.addf %27, %29 : vector<8x64xf32>
    %cst_23 = arith.constant 0.000000e+00 : f32
    %31 = vector.broadcast %cst_23 : f32 to vector<8x64xf32>
    %32 = arith.maximumf %30, %31 : vector<8x64xf32>
    %33 = arith.truncf %32 : vector<8x64xf32> to vector<8x64xbf16>
    %c0_24 = arith.constant 0 : index
    %c0_25 = arith.constant 0 : index
    %34 = vector.load %arg10[%c0_24, %c0_25] : memref<64x4xbf16, #tpu.memory_space<vmem>>, vector<64x4xbf16>
    %cst_26 = arith.constant dense<0.000000e+00> : vector<8x4xf32>
    %35 = tpu.matmul %33, %34, %cst_26 {dimension_numbers = #tpu.dot_dimension_numbers<[1], [0], [0], [1], [0, 0, 1, 1], [], []>} : vector<8x64xbf16>, vector<64x4xbf16>, vector<8x4xf32> -> vector<8x4xf32>
    %c0_27 = arith.constant 0 : index
    %c0_28 = arith.constant 0 : index
    %36 = vector.load %arg11[%c0_27, %c0_28] : memref<1x4xf32, #tpu.memory_space<vmem>>, vector<1x4xf32>
    %37 = vector.broadcast %36 : vector<1x4xf32> to vector<8x4xf32>
    %38 = arith.addf %35, %37 : vector<8x4xf32>
    %c0_29 = arith.constant 0 : index
    %c0_30 = arith.constant 0 : index
    %39 = vector.load %arg12[%c0_29, %c0_30] : memref<8x4xf32, #tpu.memory_space<vmem>>, vector<8x4xf32>
    tpu.vector_store %arg12[%c0_29, %c0_30], %38 {strides = array<i32>} : memref<8x4xf32, #tpu.memory_space<vmem>>, vector<8x4xf32>,
    return
  }
  func.func @transform_0(%arg0: i32) -> (i32, i32) {
    %c0_i32 = arith.constant 0 : i32
    %c0_i32_0 = arith.constant 0 : i32
    return %arg0, %c0_i32 : i32, i32
  }
  func.func @transform_1(%arg0: i32) -> (i32, i32) {
    %c0_i32 = arith.constant 0 : i32
    %c0_i32_0 = arith.constant 0 : i32
    %c0_i32_1 = arith.constant 0 : i32
    return %c0_i32, %c0_i32_0 : i32, i32
  }
  func.func @transform_2(%arg0: i32) -> (i32, i32) {
    %c0_i32 = arith.constant 0 : i32
    %c0_i32_0 = arith.constant 0 : i32
    %c0_i32_1 = arith.constant 0 : i32
    return %c0_i32, %c0_i32_0 : i32, i32
  }
  func.func @transform_3(%arg0: i32) -> (i32, i32) {
    %c0_i32 = arith.constant 0 : i32
    %c0_i32_0 = arith.constant 0 : i32
    %c0_i32_1 = arith.constant 0 : i32
    return %c0_i32, %c0_i32_0 : i32, i32
  }
  func.func @transform_4(%arg0: i32) -> (i32, i32) {
    %c0_i32 = arith.constant 0 : i32
    %c0_i32_0 = arith.constant 0 : i32
    %c0_i32_1 = arith.constant 0 : i32
    return %c0_i32, %c0_i32_0 : i32, i32
  }
  func.func @transform_5(%arg0: i32) -> (i32, i32) {
    %c0_i32 = arith.constant 0 : i32
    %c0_i32_0 = arith.constant 0 : i32
    %c0_i32_1 = arith.constant 0 : i32
    return %c0_i32, %c0_i32_0 : i32, i32
  }
  func.func @transform_6(%arg0: i32) -> (i32, i32) {
    %c0_i32 = arith.constant 0 : i32
    %c0_i32_0 = arith.constant 0 : i32
    %c0_i32_1 = arith.constant 0 : i32
    return %c0_i32, %c0_i32_0 : i32, i32
  }
  func.func @transform_7(%arg0: i32) -> (i32, i32) {
    %c0_i32 = arith.constant 0 : i32
    %c0_i32_0 = arith.constant 0 : i32
    %c0_i32_1 = arith.constant 0 : i32
    return %c0_i32, %c0_i32_0 : i32, i32
  }
  func.func @transform_8(%arg0: i32) -> (i32, i32) {
    %c0_i32 = arith.constant 0 : i32
    %c0_i32_0 = arith.constant 0 : i32
    %c0_i32_1 = arith.constant 0 : i32
    return %c0_i32, %c0_i32_0 : i32, i32
  }
  func.func @transform_9(%arg0: i32) -> (i32, i32) {
    %c0_i32 = arith.constant 0 : i32
    %c0_i32_0 = arith.constant 0 : i32
    %c0_i32_1 = arith.constant 0 : i32
    return %c0_i32, %c0_i32_0 : i32, i32
  }
  func.func @transform_10(%arg0: i32) -> (i32, i32) {
    %c0_i32 = arith.constant 0 : i32
    %c0_i32_0 = arith.constant 0 : i32
    %c0_i32_1 = arith.constant 0 : i32
    return %c0_i32, %c0_i32_0 : i32, i32
  }
  func.func @transform_11(%arg0: i32) -> (i32, i32) {
    %c0_i32 = arith.constant 0 : i32
    %c0_i32_0 = arith.constant 0 : i32
    return %arg0, %c0_i32 : i32, i32
  }
}

</mosaic_0001>

<bundles_post_ra>
// kernel: qnetwork_cnn_forward.1
= control target key start
LH: loop header
LB: loop body
LE: loop exit
PB: predicated region body
PF: predicated region fallthrough
CT: control target
= control target key end

     0   :  { %16 = vsyncpa [#allocation3], 0  ;;  %s7759_s0 = inlined_call_operand.vmem [shape: f32[8,192], index: 0, kind: input, shape index: {}]   ;;  %s7760_s1 = inlined_call_operand.hbm [shape: bf16[192,784], index: 1, kind: input, shape index: {}]   ;;  %s7761_s2 = inlined_call_operand.hbm [shape: f32[1,784], index: 2, kind: input, shape index: {}]   ;;  %s7762_s3 = inlined_call_operand.hbm [shape: bf16[784,1152], index: 3, kind: input, shape index: {}]   ;;  %s7763_s4 = inlined_call_operand.hbm [shape: f32[1,1152], index: 4, kind: input, shape index: {}]   ;;  %s7764_s5 = inlined_call_operand.hbm [shape: bf16[1152,128], index: 5, kind: input, shape index: {}]   ;;  %s7765_s6 = inlined_call_operand.hbm [shape: f32[1,128], index: 6, kind: input, shape index: {}]   ;;  %s7766_s7 = inlined_call_operand.vmem [shape: bf16[128,64], index: 7, kind: input, shape index: {}]   ;;  %s7767_s8 = inlined_call_operand.hbm [shape: f32[1,64], index: 8, kind: input, shape index: {}]   ;;  %s7768_s9 = inlined_call_operand.vmem [shape: bf16[64,4], index: 9, kind: input, shape index: {}]   ;;  %s7769_s10 = inlined_call_operand.hbm [shape: f32[1,4], index: 10, kind: input, shape index: {}]   ;;  %s7770_s11 = inlined_call_operand.vmem [shape: f32[8,4], index: 11, kind: output, shape index: {}]  }
   0x1   :  { %17 = vsyncpa [#allocation5], 0 }
   0x2   :  { %18 = vsyncpa [#allocation8], 0 }
   0x3   :  { %19 = vsyncpa [#allocation11], 0 }
   0x4   :  { %20 = vsyncpa [#allocation14], 0  ;;  %s7399_s17 = smov [#allocation4]   ;;  %s7400_s19 = smov [#allocation7]  }
   0x5   :  { %s41_s18 = sshll.u32 %s7399_s17, 4  ;;  %s63_s20 = sshll.u32 %s7400_s19, 4  ;;  %s42_s18 = int_to_ptr.vmem [resolvable:$true] %s41_s18  ;;  %s64_s20 = int_to_ptr.vmem [resolvable:$true] %s63_s20 }
   0x6   :  { %s7237_s21 = scalar_lea.vmem %s42_s18, 112  ;;  %s7241_s22 = scalar_lea.vmem %s42_s18, 128 }
   0x7   :  { %p7238_p0 = scmp.ne.s32.totalorder %s42_s18, %s7237_s21  ;;  %p7242_p1 = scmp.lt.s32.totalorder %s42_s18, %s42_s18 }
   0x8   :  { %p7243_p2 = scmp.lt.s32.totalorder %s7241_s22, %s7237_s21 }
   0xa   :  { %p7244_p3 = por %p7243_p2, %p7242_p1 }
   0xc   :  { %p7245_p4 = pnand %p7244_p3, %p7238_p0 }
   0xe   :  { %7248 = shalt.err (!%p7245_p4)
}
   0xf   :  { %44 = dma.hbm_to_vmem [thread:$0]  %s7761_s2, 112, %s42_s18, [#allocation5]  }
  0x10   :  { %s7257_s25 = scalar_lea.vmem %s64_s20, 144  ;;  %s7261_s26 = scalar_lea.vmem %s64_s20, 160 }
  0x11   :  { %p7258_p5 = scmp.ne.s32.totalorder %s64_s20, %s7257_s25  ;;  %p7262_p6 = scmp.lt.s32.totalorder %s64_s20, %s64_s20 }
  0x12   :  { %p7263_p7 = scmp.lt.s32.totalorder %s7261_s26, %s7257_s25 }
  0x14   :  { %p7264_p8 = por %p7263_p7, %p7262_p6 }
  0x16   :  { %p7265_p9 = pnand %p7264_p8, %p7258_p5 }
  0x18   :  { %7268 = shalt.err (!%p7265_p9)
}
  0x19   :  { %66 = dma.hbm_to_vmem [thread:$0]  %s7763_s4, 144, %s64_s20, [#allocation8]  }
  0x1a   :  { %s7401_s29 = smov [#allocation10]   ;;  %s7402_s12 = smov [#allocation2]  }
  0x1b   :  { %s85_s30 = sshll.u32 %s7401_s29, 4  ;;  %s28_s13 = sshll.u32 %s7402_s12, 4  ;;  %s86_s30 = int_to_ptr.vmem [resolvable:$true] %s85_s30  ;;  %s29_s13 = int_to_ptr.vmem [resolvable:$true] %s28_s13 }
  0x1c   :  { %s7277_s14 = scalar_lea.vmem %s86_s30, 16  ;;  %s7281_s2 = scalar_lea.vmem %s86_s30, 32 }
  0x1d   :  { %p7278_p10 = scmp.ne.s32.totalorder %s86_s30, %s7277_s14  ;;  %p7282_p11 = scmp.lt.s32.totalorder %s86_s30, %s86_s30 }
  0x1e   :  { %p7283_p12 = scmp.lt.s32.totalorder %s7281_s2, %s7277_s14 }
  0x20   :  { %p7284_p13 = por %p7283_p12, %p7282_p11 }
  0x22   :  { %p7285_p0 = pnand %p7284_p13, %p7278_p10 }
  0x24   :  { %7288 = shalt.err (!%p7285_p0)
}
  0x25   :  { %88 = dma.hbm_to_vmem [thread:$0]  %s7765_s6, 16, %s86_s30, [#allocation11]  }
  0x26   :  { %s7297_s17 = scalar_lea.vmem %s29_s13, 10752  ;;  %p7302_p2 = scmp.lt.s32.totalorder %s29_s13, %s29_s13 }
  0x27   :  { %p7298_p1 = scmp.ne.s32.totalorder %s29_s13, %s7297_s17  ;;  %p7303_p3 = scmp.lt.s32.totalorder %s7297_s17, %s7297_s17 }
  0x29   :  { %p7304_p4 = por %p7303_p3, %p7302_p2 }
  0x2b   :  { %p7305_p5 = pnand %p7304_p4, %p7298_p1 }
  0x2d   :  { %7308 = shalt.err (!%p7305_p5)
}
  0x2e   :  { %s7403_s4 = smov 448   ;;  %s7404_s18 = smov 28  }
  0x2f   :  { %34 = dma.hbm_to_vmem [thread:$0]  %s7760_s1, 10752, %s29_s13, [#allocation3], %s7403_s4, %s7403_s4, %s7404_s18  }
  0x30   :  { %s7405_s21 = smov [#allocation6]  }
  0x31   :  { %s50_s22 = sshll.u32 %s7405_s21, 4  ;;  %s51_s22 = int_to_ptr.vmem [resolvable:$true] %s50_s22 }
  0x32   :  { %s7317_s23 = scalar_lea.vmem %s51_s22, 56448  ;;  %p7322_p7 = scmp.lt.s32.totalorder %s51_s22, %s51_s22 }
  0x33   :  { %p7318_p6 = scmp.ne.s32.totalorder %s51_s22, %s7317_s23  ;;  %p7323_p8 = scmp.lt.s32.totalorder %s7317_s23, %s7317_s23 }
  0x35   :  { %p7324_p9 = por %p7323_p8, %p7322_p7 }
  0x37   :  { %p7325_p10 = pnand %p7324_p9, %p7318_p6 }
  0x39   :  { %7328 = shalt.err (!%p7325_p10)
}
  0x3a   :  { %s7406_s6 = smov 576   ;;  %s7407_s24 = smov 36  }
  0x3b   :  { %56 = dma.hbm_to_vmem [thread:$0]  %s7762_s3, 56448, %s51_s22, [#allocation5], %s7406_s6, %s7406_s6, %s7407_s24  }
  0x3c   :  { %s7408_s27 = smov [#allocation9]  }
  0x3d   :  { %s72_s28 = sshll.u32 %s7408_s27, 4  ;;  %s73_s28 = int_to_ptr.vmem [resolvable:$true] %s72_s28 }
  0x3e   :  { %s7337_s1 = scalar_lea.vmem %s73_s28, 9216  ;;  %p7342_p12 = scmp.lt.s32.totalorder %s73_s28, %s73_s28 }
  0x3f   :  { %p7338_p11 = scmp.ne.s32.totalorder %s73_s28, %s7337_s1  ;;  %p7343_p13 = scmp.lt.s32.totalorder %s7337_s1, %s7337_s1 }
  0x41   :  { %p7344_p0 = por %p7343_p13, %p7342_p12 }
  0x43   :  { %p7345_p1 = pnand %p7344_p0, %p7338_p11 }
  0x45   :  { %7348 = shalt.err (!%p7345_p1)
}
  0x46   :  { %s7409_s29 = smov 64   ;;  %s7410_s30 = smov 4  }
  0x47   :  { %78 = dma.hbm_to_vmem [thread:$0]  %s7764_s5, 9216, %s73_s28, [#allocation8], %s7409_s29, %s7409_s29, %s7410_s30  }
  0x48   :  { %s7411_s14 = smov [#allocation12]   ;;  %s7412_s15 = smov [#allocation13]  }
  0x49   :  { %s97_s2 = sshll.u32 %s7411_s14, 4  ;;  %s109_s3 = sshll.u32 %s7412_s15, 4  ;;  %s98_s2 = int_to_ptr.vmem [resolvable:$true] %s97_s2  ;;  %s110_s3 = int_to_ptr.vmem [resolvable:$true] %s109_s3 }
  0x4a   :  { %s7357_s16 = scalar_lea.vmem %s98_s2, 16  ;;  %s7361_s17 = scalar_lea.vmem %s98_s2, 32 }
  0x4b   :  { %p7358_p2 = scmp.ne.s32.totalorder %s98_s2, %s7357_s16  ;;  %p7362_p3 = scmp.lt.s32.totalorder %s98_s2, %s98_s2 }
  0x4c   :  { %p7363_p4 = scmp.lt.s32.totalorder %s7361_s17, %s7357_s16 }
  0x4e   :  { %p7364_p5 = por %p7363_p4, %p7362_p3 }
  0x50   :  { %p7365_p6 = pnand %p7364_p5, %p7358_p2 }
  0x52   :  { %7368 = shalt.err (!%p7365_p6)
}
  0x53   :  { %100 = dma.hbm_to_vmem [thread:$0]  %s7767_s8, 16, %s98_s2, [#allocation11]  }
  0x54   :  { %s7377_s19 = scalar_lea.vmem %s110_s3, 16  ;;  %s7381_s5 = scalar_lea.vmem %s110_s3, 32 }
  0x55   :  { %p7378_p7 = scmp.ne.s32.totalorder %s110_s3, %s7377_s19  ;;  %p7382_p8 = scmp.lt.s32.totalorder %s110_s3, %s110_s3 }
  0x56   :  { %p7383_p9 = scmp.lt.s32.totalorder %s7381_s5, %s7377_s19 }
  0x58   :  { %p7384_p10 = por %p7383_p9, %p7382_p8 }
  0x5a   :  { %p7385_p11 = pnand %p7384_p10, %p7378_p7 }
  0x5c   :  { %7388 = shalt.err (!%p7385_p11)
}
  0x5d   :  { %112 = dma.hbm_to_vmem [thread:$0]  %s7769_s10, 16, %s110_s3, [#allocation14]  }
  0x5e   :  { %7389 = dma.done.wait [#allocation3], 10752  }
  0x5f   :  { %7390 = vsyncadd [#allocation3], 4294956544 }
  0x60   :  { %7391 = dma.done.wait [#allocation5], 56560  }
  0x61   :  { %7392 = vsyncadd [#allocation5], 4294910736 }
  0x62   :  { %7393 = dma.done.wait [#allocation8], 9360  }
  0x63   :  { %7394 = vsyncadd [#allocation8], 4294957936 }
  0x64   :  { %7395 = dma.done.wait [#allocation11], 32  }
  0x65   :  { %7396 = vsyncadd [#allocation11], 4294967264 }
  0x66   :  { %7397 = dma.done.wait [#allocation14], 16  }
  0x67   :  { %7398 = vsyncadd [#allocation14], 4294967280  ;;  %v6387_v0 = vld [vmem:[#allocation2 + $0x18c] ss:$28 sps:$4 sm:$0xff]   ;;  %v6389_v1 = vld [vmem:[#allocation2 + $0x194] ss:$28 sps:$4 sm:$0xff]  }
  0x68   :  { %711 = vmatprep.subr.bf16.mxu0 %v6387_v0  ;;  %v6391_v2 = vld [vmem:[#allocation2 + $0x188] ss:$28 sps:$4 sm:$0xff]   ;;  %v6392_v3 = vld [vmem:[#allocation2 + $0x190] ss:$28 sps:$4 sm:$0xff]   ;;  %752 = vmatprep.subr.bf16.mxu1 %v6389_v1  ;;  %v6395_v5 = vld [vmem:[#allocation2 + $0x15c] ss:$28 sps:$4 sm:$0xff]  }
  0x69   :  { %v6393_v4 = vld [vmem:[#allocation2 + $0x154] ss:$28 sps:$4 sm:$0xff]   ;;  %712 = vmatpush1.bf16.msra.mxu0 %v6391_v2  ;;  %753 = vmatpush1.bf16.msra.mxu1 %v6392_v3  ;;  %v6399_v8 = vld [vmem:[#allocation2 + $0x11c] ss:$28 sps:$4 sm:$0xff]   ;;  %v6401_v9 = vld [vmem:[#allocation2 + $0x124] ss:$28 sps:$4 sm:$0xff]  }
  0x6a   :  { %v6397_v6 = vld [vmem:[#allocation2 + $0x150] ss:$28 sps:$4 sm:$0xff]   ;;  %713 = vmatprep.subr.bf16.mxu0 %v6393_v4  ;;  %v6398_v7 = vld [vmem:[#allocation2 + $0x158] ss:$28 sps:$4 sm:$0xff]   ;;  %754 = vmatprep.subr.bf16.mxu1 %v6395_v5  ;;  %v6404_v11 = vld [vmem:[#allocation2 + $0x120] ss:$28 sps:$4 sm:$0xff]  }
  0x6b   :  { %v6403_v10 = vld [vmem:[#allocation2 + $0x118] ss:$28 sps:$4 sm:$0xff]   ;;  %v6405_v12 = vld [vmem:[#allocation2 + $0xe4] ss:$28 sps:$4 sm:$0xff]   ;;  %v6407_v13 = vld [vmem:[#allocation2 + $0xec] ss:$28 sps:$4 sm:$0xff]  }
  0x6c   :  { %v6409_v14 = vld [vmem:[#allocation2 + $0xe0] ss:$28 sps:$4 sm:$0xff]   ;;  %v6410_v15 = vld [vmem:[#allocation2 + $0xe8] ss:$28 sps:$4 sm:$0xff]   ;;  %v6413_v17 = vld [vmem:[#allocation2 + $0xb4] ss:$28 sps:$4 sm:$0xff]  }
  0x6d   :  { %714 = vmatpush1.bf16.msra.mxu0 %v6397_v6  ;;  %755 = vmatpush1.bf16.msra.mxu1 %v6398_v7  ;;  %v6411_v16 = vld [vmem:[#allocation2 + $0xac] ss:$28 sps:$4 sm:$0xff]   ;;  %v6417_v20 = vld [vmem:[#allocation2 + $0x74] ss:$28 sps:$4 sm:$0xff]   ;;  %v6419_v21 = vld [vmem:[#allocation2 + $0x7c] ss:$28 sps:$4 sm:$0xff]  }
  0x6e   :  { %715 = vmatprep.subr.bf16.mxu0 %v6399_v8  ;;  %756 = vmatprep.subr.bf16.mxu1 %v6401_v9  ;;  %v6415_v18 = vld [vmem:[#allocation2 + $0xa8] ss:$28 sps:$4 sm:$0xff]   ;;  %v6416_v19 = vld [vmem:[#allocation2 + $0xb0] ss:$28 sps:$4 sm:$0xff]   ;;  %v6422_v23 = vld [vmem:[#allocation2 + $0x78] ss:$28 sps:$4 sm:$0xff]  }
  0x6f   :  { %v6421_v22 = vld [vmem:[#allocation2 + $0x70] ss:$28 sps:$4 sm:$0xff]   ;;  %v6423_v24 = vld [vmem:[#allocation2 + $0x3c] ss:$28 sps:$4 sm:$0xff]   ;;  %v6425_v25 = vld [vmem:[#allocation2 + $0x44] ss:$28 sps:$4 sm:$0xff]  }
  0x70   :  { %v6427_v26 = vld [vmem:[#allocation2 + $0x38] ss:$28 sps:$4 sm:$0xff]   ;;  %v6428_v27 = vld [vmem:[#allocation2 + $0x40] ss:$28 sps:$4 sm:$0xff]   ;;  %v6431_v29 = vld [vmem:[#allocation2 + $0xc] ss:$28 sps:$4 sm:$0xff]  }
  0x71   :  { %716 = vmatpush1.bf16.msra.mxu0 %v6403_v10  ;;  %757 = vmatpush1.bf16.msra.mxu1 %v6404_v11  ;;  %v6429_v28 = vld [vmem:[#allocation2 + $0x4] ss:$28 sps:$4 sm:$0xff]   ;;  %v6435_v32 = vld [vmem:[#allocation2 + $0x26c] ss:$28 sps:$4 sm:$0xff]   ;;  %v6437_v33 = vld [vmem:[#allocation2 + $0x274] ss:$28 sps:$4 sm:$0xff]  }
  0x72   :  { %717 = vmatprep.subr.bf16.mxu0 %v6405_v12  ;;  %758 = vmatprep.subr.bf16.mxu1 %v6407_v13  ;;  %v6433_v30 = vld [vmem:[#allocation2] ss:$28 sps:$4 sm:$0xff]   ;;  %v6434_v31 = vld [vmem:[#allocation2 + $0x8] ss:$28 sps:$4 sm:$0xff]   ;;  %v6440_v35 = vld [vmem:[#allocation2 + $0x270] ss:$28 sps:$4 sm:$0xff]  }
  0x73   :  { %v6439_v34 = vld [vmem:[#allocation2 + $0x268] ss:$28 sps:$4 sm:$0xff]   ;;  %v6441_v36 = vld [vmem:[#allocation2 + $0x234] ss:$28 sps:$4 sm:$0xff]   ;;  %vm707_vm0 = vcmask 523264   ;;  %v7413_v55 = vmov 0  }
  0x74   :  { %v139_v37 = vld [vmem:[%s7759_s0 + $0x8] sm:$0xff]  ;;  %v6443_v38 = vld [vmem:[#allocation2 + $0x23c] ss:$28 sps:$4 sm:$0xff]   ;;  %v6449_v43 = vld [vmem:[#allocation2 + $0x204] ss:$28 sps:$4 sm:$0xff]   ;;  %vm3681_vm1 = vcmask 130048  }
  0x75   :  { %718 = vmatpush1.bf16.msra.mxu0 %v6409_v14  ;;  %759 = vmatpush1.bf16.msra.mxu1 %v6410_v15  ;;  %v141_v39 = vpack.c.bf16 %v139_v37, %v139_v37  ;;  %v6445_v40 = vld [vmem:[#allocation2 + $0x230] ss:$28 sps:$4 sm:$0xff]   ;;  %v6446_v41 = vld [vmem:[#allocation2 + $0x238] ss:$28 sps:$4 sm:$0xff]   ;;  %v6452_v45 = vld [vmem:[#allocation2 + $0x200] ss:$28 sps:$4 sm:$0xff]  }
  0x76   :  { %719 = vmatprep.subr.bf16.mxu0 %v6411_v16  ;;  %760 = vmatprep.subr.bf16.mxu1 %v6413_v17  ;;  %v6447_v42 = vld [vmem:[#allocation2 + $0x1fc] ss:$28 sps:$4 sm:$0xff]   ;;  %v6453_v46 = vld [vmem:[#allocation2 + $0x1c4] ss:$28 sps:$4 sm:$0xff]   ;;  %v6455_v47 = vld [vmem:[#allocation2 + $0x1cc] ss:$28 sps:$4 sm:$0xff]  }
  0x77   :  { %5594 = vmatprep.mubr.msk.bf16.mxu0 %vm707_vm0, %v141_v39  ;;  %5595 = vmatprep.mubr.msk.bf16.mxu1 %vm707_vm0, %v141_v39  ;;  %v6451_v44 = vld [vmem:[#allocation2 + $0x1f8] ss:$28 sps:$4 sm:$0xff]   ;;  %v6457_v48 = vld [vmem:[#allocation2 + $0x1c0] ss:$28 sps:$4 sm:$0xff]   ;;  %v6458_v49 = vld [vmem:[#allocation2 + $0x1c8] ss:$28 sps:$4 sm:$0xff]  }
  0x78   :  { %v138_v50 = vld [vmem:[%s7759_s0] sm:$0xff]  ;;  %v6465_v51 = vld [vmem:[#allocation2 + $0x19c] ss:$28 sps:$4 sm:$0xff]   ;;  %v6473_v59 = vld [vmem:[#allocation2 + $0x12c] ss:$28 sps:$4 sm:$0xff]   ;;  %vm7415_vm2 = vmmov 0  }
  0x79   :  { %720 = vmatpush1.bf16.msra.mxu0 %v6415_v18  ;;  %761 = vmatpush1.bf16.msra.mxu1 %v6416_v19  ;;  %v7508_v52 = vpack.c.bf16 %v138_v50, %v138_v50  ;;  %v6459_v53 = vld [vmem:[#allocation2 + $0x1a0] ss:$28 sps:$4 sm:$0xff]   ;;  %v6463_v54 = vld [vmem:[#allocation2 + $0x198] ss:$28 sps:$4 sm:$0xff]   ;;  %v6460_v57 = vld [vmem:[#allocation2 + $0x168] ss:$28 sps:$4 sm:$0xff]  }
  0x7a   :  { %721 = vmatprep.subr.bf16.mxu0 %v6417_v20  ;;  %762 = vmatprep.subr.bf16.mxu1 %v6419_v21  ;;  %v6469_v56 = vld [vmem:[#allocation2 + $0x164] ss:$28 sps:$4 sm:$0xff]   ;;  %v6461_v60 = vld [vmem:[#allocation2 + $0x130] ss:$28 sps:$4 sm:$0xff]   ;;  %v6462_v63 = vld [vmem:[#allocation2 + $0xf8] ss:$28 sps:$4 sm:$0xff]  }
  0x7b   :  { %v6467_v58 = vld [vmem:[#allocation2 + $0x160] ss:$28 sps:$4 sm:$0xff]   ;;  %v6471_v61 = vld [vmem:[#allocation2 + $0x128] ss:$28 sps:$4 sm:$0xff]   ;;  %v6477_v62 = vld [vmem:[#allocation2 + $0xf4] ss:$28 sps:$4 sm:$0xff]  }
  0x7c   :  { %v6475_v0 = vld [vmem:[#allocation2 + $0xf0] ss:$28 sps:$4 sm:$0xff]   ;;  %v6481_v1 = vld [vmem:[#allocation2 + $0xbc] ss:$28 sps:$4 sm:$0xff]   ;;  %v6485_v4 = vld [vmem:[#allocation2 + $0x84] ss:$28 sps:$4 sm:$0xff]  }
  0x7d   :  { %722 = vmatpush1.bf16.msra.mxu0 %v6421_v22  ;;  %763 = vmatpush1.bf16.msra.mxu1 %v6422_v23  ;;  %v6466_v2 = vld [vmem:[#allocation2 + $0xc0] ss:$28 sps:$4 sm:$0xff]   ;;  %v6479_v3 = vld [vmem:[#allocation2 + $0xb8] ss:$28 sps:$4 sm:$0xff]   ;;  %v6470_v5 = vld [vmem:[#allocation2 + $0x88] ss:$28 sps:$4 sm:$0xff]  }
  0x7e   :  { %723 = vmatprep.subr.bf16.mxu0 %v6423_v24  ;;  %764 = vmatprep.subr.bf16.mxu1 %v6425_v25  ;;  %v6483_v6 = vld [vmem:[#allocation2 + $0x80] ss:$28 sps:$4 sm:$0xff]   ;;  %v6489_v7 = vld [vmem:[#allocation2 + $0x4c] ss:$28 sps:$4 sm:$0xff]   ;;  %v6493_v10 = vld [vmem:[#allocation2 + $0x14] ss:$28 sps:$4 sm:$0xff]  }
  0x7f   :  { %v6474_v8 = vld [vmem:[#allocation2 + $0x50] ss:$28 sps:$4 sm:$0xff]   ;;  %v6487_v9 = vld [vmem:[#allocation2 + $0x48] ss:$28 sps:$4 sm:$0xff]   ;;  %v6478_v11 = vld [vmem:[#allocation2 + $0x18] ss:$28 sps:$4 sm:$0xff]  }
  0x80   :  { %v6491_v12 = vld [vmem:[#allocation2 + $0x10] ss:$28 sps:$4 sm:$0xff]   ;;  %v6497_v13 = vld [vmem:[#allocation2 + $0x27c] ss:$28 sps:$4 sm:$0xff]   ;;  %v6500_v16 = vld [vmem:[#allocation2 + $0x244] ss:$28 sps:$4 sm:$0xff]  }
  0x81   :  { %724 = vmatpush1.bf16.msra.mxu0 %v6427_v26  ;;  %765 = vmatpush1.bf16.msra.mxu1 %v6428_v27  ;;  %v6482_v14 = vld [vmem:[#allocation2 + $0x280] ss:$28 sps:$4 sm:$0xff]   ;;  %v6495_v15 = vld [vmem:[#allocation2 + $0x278] ss:$28 sps:$4 sm:$0xff]   ;;  %v6486_v17 = vld [vmem:[#allocation2 + $0x248] ss:$28 sps:$4 sm:$0xff]  }
  0x82   :  { %725 = vmatprep.subr.bf16.mxu0 %v6429_v28  ;;  %766 = vmatprep.subr.bf16.mxu1 %v6431_v29  ;;  %v6498_v18 = vld [vmem:[#allocation2 + $0x240] ss:$28 sps:$4 sm:$0xff]   ;;  %v6503_v19 = vld [vmem:[#allocation2 + $0x20c] ss:$28 sps:$4 sm:$0xff]   ;;  %v6506_v22 = vld [vmem:[#allocation2 + $0x1d4] ss:$28 sps:$4 sm:$0xff]  }
  0x83   :  { %v6490_v20 = vld [vmem:[#allocation2 + $0x210] ss:$28 sps:$4 sm:$0xff]   ;;  %v6501_v21 = vld [vmem:[#allocation2 + $0x208] ss:$28 sps:$4 sm:$0xff]   ;;  %v6494_v23 = vld [vmem:[#allocation2 + $0x1d8] ss:$28 sps:$4 sm:$0xff]  }
  0x84   :  { %v6504_v24 = vld [vmem:[#allocation2 + $0x1d0] ss:$28 sps:$4 sm:$0xff]   ;;  %v6509_v25 = vld [vmem:[#allocation6 + $0x1fc] ss:$36 sps:$4 sm:$0xff]   ;;  %v6515_v29 = vld [vmem:[#allocation6 + $0x1b4] ss:$36 sps:$4 sm:$0xff]  }
  0x85   :  { %726 = vmatpush1.bf16.msra.mxu0 %v6433_v30  ;;  %767 = vmatpush1.bf16.msra.mxu1 %v6434_v31  ;;  %v6512_v26 = vld [vmem:[#allocation6 + $0x67c] ss:$36 sps:$4 sm:$0xff]   ;;  %v6518_v30 = vld [vmem:[#allocation6 + $0x634] ss:$36 sps:$4 sm:$0xff]   ;;  %v6527_v37 = vld [vmem:[#allocation6 + $0x124] ss:$36 sps:$4 sm:$0xff]  }
  0x86   :  { %735 = vmatprep.subr.bf16.mxu0 %v6435_v32  ;;  %776 = vmatprep.subr.bf16.mxu1 %v6437_v33  ;;  %v6507_v27 = vld [vmem:[#allocation6 + $0x1f8] ss:$36 sps:$4 sm:$0xff]   ;;  %v6513_v31 = vld [vmem:[#allocation6 + $0x1b0] ss:$36 sps:$4 sm:$0xff]   ;;  %vm5499_vm3 = vcmask 31744  }
  0x87   :  { %v6510_v28 = vld [vmem:[#allocation6 + $0x678] ss:$36 sps:$4 sm:$0xff]   ;;  %v6516_v32 = vld [vmem:[#allocation6 + $0x630] ss:$36 sps:$4 sm:$0xff]  }
  0x88   :  { %v6521_v33 = vld [vmem:[#allocation6 + $0x16c] ss:$36 sps:$4 sm:$0xff]  }
  0x89   :  { %736 = vmatpush2.bf16.msra.mxu0 %v6439_v34  ;;  %777 = vmatpush2.bf16.msra.mxu1 %v6440_v35  ;;  %v6524_v34 = vld [vmem:[#allocation6 + $0x5ec] ss:$36 sps:$4 sm:$0xff]  }
  0x8a   :  { %737 = vmatprep.subr.bf16.mxu0 %v6441_v36  ;;  %778 = vmatprep.subr.bf16.mxu1 %v6443_v38  ;;  %v6519_v35 = vld [vmem:[#allocation6 + $0x168] ss:$36 sps:$4 sm:$0xff]  }
  0x8b   :  { %v6522_v36 = vld [vmem:[#allocation6 + $0x5e8] ss:$36 sps:$4 sm:$0xff]  }
  0x8c   :  { %v6530_v38 = vld [vmem:[#allocation6 + $0x5a4] ss:$36 sps:$4 sm:$0xff]   ;;  %v6548_v50 = vld [vmem:[#allocation6 + $0x4cc] ss:$36 sps:$4 sm:$0xff]  }
  0x8d   :  { %738 = vmatpush2.bf16.msra.mxu0 %v6445_v40  ;;  %779 = vmatpush2.bf16.msra.mxu1 %v6446_v41  ;;  %v6528_v40 = vld [vmem:[#allocation6 + $0x5a0] ss:$36 sps:$4 sm:$0xff]  }
  0x8e   :  { %739 = vmatprep.subr.bf16.mxu0 %v6447_v42  ;;  %780 = vmatprep.subr.bf16.mxu1 %v6449_v43  ;;  %v6533_v41 = vld [vmem:[#allocation6 + $0xdc] ss:$36 sps:$4 sm:$0xff]  }
  0x8f   :  { %v6536_v42 = vld [vmem:[#allocation6 + $0x55c] ss:$36 sps:$4 sm:$0xff]  }
  0x90   :  { %v6531_v43 = vld [vmem:[#allocation6 + $0xd8] ss:$36 sps:$4 sm:$0xff]  }
  0x91   :  { %740 = vmatpush2.bf16.msra.mxu0 %v6451_v44  ;;  %781 = vmatpush2.bf16.msra.mxu1 %v6452_v45  ;;  %v6534_v44 = vld [vmem:[#allocation6 + $0x558] ss:$36 sps:$4 sm:$0xff]  }
  0x92   :  { %741 = vmatprep.subr.bf16.mxu0 %v6453_v46  ;;  %782 = vmatprep.subr.bf16.mxu1 %v6455_v47  ;;  %v6539_v45 = vld [vmem:[#allocation6 + $0x94] ss:$36 sps:$4 sm:$0xff]  }
  0x93   :  { %v6542_v46 = vld [vmem:[#allocation6 + $0x514] ss:$36 sps:$4 sm:$0xff]  }
  0x94   :  { %v6537_v47 = vld [vmem:[#allocation6 + $0x90] ss:$36 sps:$4 sm:$0xff]  }
  0x95   :  { %742 = vmatpush2.bf16.msra.mxu0 %v6457_v48  ;;  %783 = vmatpush2.bf16.msra.mxu1 %v6458_v49  ;;  %v6540_v48 = vld [vmem:[#allocation6 + $0x510] ss:$36 sps:$4 sm:$0xff]  }
  0x96   :  { %834 = vmatprep.subr.bf16.mxu1 %v7413_v55  ;;  %793 = vmatprep.subr.bf16.mxu0 %v6465_v51  ;;  %v6545_v49 = vld [vmem:[#allocation6 + $0x4c] ss:$36 sps:$4 sm:$0xff]  }
  0x97   :  { %v6543_v51 = vld [vmem:[#allocation6 + $0x48] ss:$36 sps:$4 sm:$0xff]  }
  0x98   :  { %744 = vmatmul.mubr.bf16.vlgmr.msra.gmra.mxu0 %v7508_v52  ;;  %785 = vmatmul.mubr.bf16.vlgmr.msra.gmra.mxu1 %v7508_v52 }
  0x99   :  { %835 = vmatpush1.bf16.msra.mxu1 %v6459_v53  ;;  %794 = vmatpush1.bf16.msra.mxu0 %v6463_v54  ;;  %v6551_v53 = vld [vmem:[#allocation6 + $0x4] ss:$36 sps:$4 sm:$0xff]  }
  0x9a   :  { %836 = vmatprep.subr.bf16.mxu1 %v7413_v55  ;;  %795 = vmatprep.subr.bf16.mxu0 %v6469_v56  ;;  %v6554_v54 = vld [vmem:[#allocation6 + $0x484] ss:$36 sps:$4 sm:$0xff]  }
  0x9b   :  { %5597 = vmatprep.mubr.msk.bf16.mxu1 %vm707_vm0, %v141_v39  ;;  %5596 = vmatprep.mubr.msk.bf16.mxu0 %vm707_vm0, %v141_v39  ;;  %v6525_v39 = vld [vmem:[#allocation6 + $0x120] ss:$36 sps:$4 sm:$0xff]  }
  0x9c   :  { %v6549_v56 = vld [vmem:[#allocation6] ss:$36 sps:$4 sm:$0xff]  }
  0x9d   :  { %837 = vmatpush1.bf16.msra.mxu1 %v6460_v57  ;;  %796 = vmatpush1.bf16.msra.mxu0 %v6467_v58  ;;  %v6552_v57 = vld [vmem:[#allocation6 + $0x480] ss:$36 sps:$4 sm:$0xff]  }
  0x9e   :  { %838 = vmatprep.subr.bf16.mxu1 %v7413_v55  ;;  %797 = vmatprep.subr.bf16.mxu0 %v6473_v59  ;;  %v6557_v58 = vld [vmem:[#allocation6 + $0x43c] ss:$36 sps:$4 sm:$0xff]  }
  0x9f   :  { %v6560_v59 = vld [vmem:[#allocation6 + $0x8bc] ss:$36 sps:$4 sm:$0xff]  }
  0xa1   :  { %839 = vmatpush1.bf16.msra.mxu1 %v6461_v60  ;;  %798 = vmatpush1.bf16.msra.mxu0 %v6471_v61  ;;  %v6555_v60 = vld [vmem:[#allocation6 + $0x438] ss:$36 sps:$4 sm:$0xff]  }
  0xa2   :  { %840 = vmatprep.subr.bf16.mxu1 %v7413_v55  ;;  %799 = vmatprep.subr.bf16.mxu0 %v6477_v62  ;;  %v6558_v61 = vld [vmem:[#allocation6 + $0x8b8] ss:$36 sps:$4 sm:$0xff]  }
  0xa3   :  { %v6563_v62 = vld [vmem:[#allocation6 + $0x3f4] ss:$36 sps:$4 sm:$0xff]  }
  0xa5   :  { %841 = vmatpush1.bf16.msra.mxu1 %v6462_v63  ;;  %800 = vmatpush1.bf16.msra.mxu0 %v6475_v0  ;;  %v6566_v63 = vld [vmem:[#allocation6 + $0x874] ss:$36 sps:$4 sm:$0xff]  }
  0xa6   :  { %842 = vmatprep.subr.bf16.mxu1 %v7413_v55  ;;  %801 = vmatprep.subr.bf16.mxu0 %v6481_v1  ;;  %v6561_v0 = vld [vmem:[#allocation6 + $0x3f0] ss:$36 sps:$4 sm:$0xff]  }
  0xa7   :  { %v6564_v1 = vld [vmem:[#allocation6 + $0x870] ss:$36 sps:$4 sm:$0xff]  }
  0xa9   :  { %843 = vmatpush1.bf16.msra.mxu1 %v6466_v2  ;;  %802 = vmatpush1.bf16.msra.mxu0 %v6479_v3  ;;  %v6569_v2 = vld [vmem:[#allocation6 + $0x3ac] ss:$36 sps:$4 sm:$0xff]  }
  0xaa   :  { %844 = vmatprep.subr.bf16.mxu1 %v7413_v55  ;;  %803 = vmatprep.subr.bf16.mxu0 %v6485_v4  ;;  %v6572_v3 = vld [vmem:[#allocation6 + $0x82c] ss:$36 sps:$4 sm:$0xff]  }
  0xab   :  { %v6567_v4 = vld [vmem:[#allocation6 + $0x3a8] ss:$36 sps:$4 sm:$0xff]  }
  0xad   :  { %845 = vmatpush1.bf16.msra.mxu1 %v6470_v5  ;;  %804 = vmatpush1.bf16.msra.mxu0 %v6483_v6  ;;  %v6570_v5 = vld [vmem:[#allocation6 + $0x828] ss:$36 sps:$4 sm:$0xff]  }
  0xae   :  { %846 = vmatprep.subr.bf16.mxu1 %v7413_v55  ;;  %805 = vmatprep.subr.bf16.mxu0 %v6489_v7  ;;  %v6575_v6 = vld [vmem:[#allocation6 + $0x364] ss:$36 sps:$4 sm:$0xff]  }
  0xaf   :  { %v6578_v7 = vld [vmem:[#allocation6 + $0x7e4] ss:$36 sps:$4 sm:$0xff]  }
  0xb1   :  { %847 = vmatpush1.bf16.msra.mxu1 %v6474_v8  ;;  %806 = vmatpush1.bf16.msra.mxu0 %v6487_v9  ;;  %v6573_v8 = vld [vmem:[#allocation6 + $0x360] ss:$36 sps:$4 sm:$0xff]  }
  0xb2   :  { %848 = vmatprep.subr.bf16.mxu1 %v7413_v55  ;;  %807 = vmatprep.subr.bf16.mxu0 %v6493_v10  ;;  %v6576_v9 = vld [vmem:[#allocation6 + $0x7e0] ss:$36 sps:$4 sm:$0xff]  }
  0xb3   :  { %v6581_v10 = vld [vmem:[#allocation6 + $0x31c] ss:$36 sps:$4 sm:$0xff]  }
  0xb5   :  { %849 = vmatpush1.bf16.msra.mxu1 %v6478_v11  ;;  %808 = vmatpush1.bf16.msra.mxu0 %v6491_v12  ;;  %v6584_v11 = vld [vmem:[#allocation6 + $0x79c] ss:$36 sps:$4 sm:$0xff]  }
  0xb6   :  { %858 = vmatprep.subr.bf16.mxu1 %v7413_v55  ;;  %817 = vmatprep.subr.bf16.mxu0 %v6497_v13  ;;  %v6579_v12 = vld [vmem:[#allocation6 + $0x318] ss:$36 sps:$4 sm:$0xff]  }
  0xb7   :  { %v6582_v13 = vld [vmem:[#allocation6 + $0x798] ss:$36 sps:$4 sm:$0xff]  }
  0xb9   :  { %859 = vmatpush2.bf16.msra.mxu1 %v6482_v14  ;;  %818 = vmatpush2.bf16.msra.mxu0 %v6495_v15  ;;  %v6587_v14 = vld [vmem:[#allocation6 + $0x2d4] ss:$36 sps:$4 sm:$0xff]  }
  0xba   :  { %860 = vmatprep.subr.bf16.mxu1 %v7413_v55  ;;  %819 = vmatprep.subr.bf16.mxu0 %v6500_v16  ;;  %v6590_v15 = vld [vmem:[#allocation6 + $0x754] ss:$36 sps:$4 sm:$0xff]  }
  0xbb   :  { %v6585_v16 = vld [vmem:[#allocation6 + $0x2d0] ss:$36 sps:$4 sm:$0xff]  }
  0xbd   :  { %861 = vmatpush2.bf16.msra.mxu1 %v6486_v17  ;;  %820 = vmatpush2.bf16.msra.mxu0 %v6498_v18  ;;  %v6588_v17 = vld [vmem:[#allocation6 + $0x750] ss:$36 sps:$4 sm:$0xff]  }
  0xbe   :  { %862 = vmatprep.subr.bf16.mxu1 %v7413_v55  ;;  %821 = vmatprep.subr.bf16.mxu0 %v6503_v19  ;;  %v6593_v18 = vld [vmem:[#allocation6 + $0x28c] ss:$36 sps:$4 sm:$0xff]  }
  0xbf   :  { %v6596_v19 = vld [vmem:[#allocation6 + $0x70c] ss:$36 sps:$4 sm:$0xff]  }
  0xc1   :  { %863 = vmatpush2.bf16.msra.mxu1 %v6490_v20  ;;  %822 = vmatpush2.bf16.msra.mxu0 %v6501_v21  ;;  %v6591_v20 = vld [vmem:[#allocation6 + $0x288] ss:$36 sps:$4 sm:$0xff]  }
  0xc2   :  { %864 = vmatprep.subr.bf16.mxu1 %v7413_v55  ;;  %823 = vmatprep.subr.bf16.mxu0 %v6506_v22  ;;  %v6594_v21 = vld [vmem:[#allocation6 + $0x708] ss:$36 sps:$4 sm:$0xff]  }
  0xc3   :  { %v6599_v22 = vld [vmem:[#allocation6 + $0x244] ss:$36 sps:$4 sm:$0xff]  }
  0xc5   :  { %865 = vmatpush2.bf16.msra.mxu1 %v6494_v23  ;;  %824 = vmatpush2.bf16.msra.mxu0 %v6504_v24  ;;  %v6602_v23 = vld [vmem:[#allocation6 + $0x6c4] ss:$36 sps:$4 sm:$0xff]  }
  0xc6   :  { %3685 = vmatprep.subr.bf16.mxu0 %v6509_v25  ;;  %3726 = vmatprep.subr.bf16.mxu1 %v6512_v26  ;;  %v6597_v24 = vld [vmem:[#allocation6 + $0x240] ss:$36 sps:$4 sm:$0xff]  }
  0xc7   :  { %v6600_v25 = vld [vmem:[#allocation6 + $0x6c0] ss:$36 sps:$4 sm:$0xff]  }
  0xc8   :  { %867 = vmatmul.mubr.bf16.vlgmr.msra.gmra.mxu1 %v7508_v52  ;;  %826 = vmatmul.mubr.bf16.vlgmr.msra.gmra.mxu0 %v7508_v52  ;;  %v6546_v52 = vld [vmem:[#allocation6 + $0x4c8] ss:$36 sps:$4 sm:$0xff]   ;;  %v6605_v26 = vld [vmem:[#allocation6 + $0xafc] ss:$36 sps:$4 sm:$0xff]  }
  0xc9   :  { %3686 = vmatpush1.bf16.msra.mxu0 %v6507_v27  ;;  %3727 = vmatpush1.bf16.msra.mxu1 %v6510_v28  ;;  %v6635_v27 = vld [vmem:[#allocation6 + $0xd84] ss:$36 sps:$4 sm:$0xff]   ;;  %v240_v28 = vlaneseq }
  0xca   :  { %3687 = vmatprep.subr.bf16.mxu0 %v6515_v29  ;;  %3728 = vmatprep.subr.bf16.mxu1 %v6518_v30 }
  0xcb   :  { %v7528_v29 = vshrl.u32 %v240_v28, 7  ;;  %v6639_v28 = vld [vmem:[#allocation6 + $0xc60] ss:$36 sps:$4 sm:$0xff]  }
  0xcd   :  { %3688 = vmatpush1.bf16.msra.mxu0 %v6513_v31  ;;  %3729 = vmatpush1.bf16.msra.mxu1 %v6516_v32  ;;  %v242_v30 = vsub.s32 0, %v7528_v29  ;;  %v250_v31 = vsub.s32 2, %v7528_v29  ;;  %v7532_v32 = vld [vmem:[#allocation4] sm:$0x7f] }
  0xce   :  { %3689 = vmatprep.subr.bf16.mxu0 %v6521_v33  ;;  %3730 = vmatprep.subr.bf16.mxu1 %v6524_v34  ;;  %v246_v33 = vsub.s32 1, %v7528_v29  ;;  %v254_v34 = vsub.s32 3, %v7528_v29 }
  0xd1   :  { %3690 = vmatpush1.bf16.msra.mxu0 %v6519_v35  ;;  %3731 = vmatpush1.bf16.msra.mxu1 %v6522_v36  ;;  %v243_v35 = vrot.slane %v7532_v32, %v242_v30  ;;  %v251_v36 = vrot.slane %v7532_v32, %v250_v31 }
  0xd2   :  { %3691 = vmatprep.subr.bf16.mxu0 %v6527_v37  ;;  %3732 = vmatprep.subr.bf16.mxu1 %v6530_v38  ;;  %v247_v37 = vrot.slane %v7532_v32, %v246_v33  ;;  %v255_v38 = vrot.slane %v7532_v32, %v254_v34 }
  0xd5   :  { %3692 = vmatpush1.bf16.msra.mxu0 %v6525_v39  ;;  %3733 = vmatpush1.bf16.msra.mxu1 %v6528_v40 }
  0xd6   :  { %3693 = vmatprep.subr.bf16.mxu0 %v6533_v41  ;;  %3734 = vmatprep.subr.bf16.mxu1 %v6536_v42 }
  0xd9   :  { %3694 = vmatpush1.bf16.msra.mxu0 %v6531_v43  ;;  %3735 = vmatpush1.bf16.msra.mxu1 %v6534_v44 }
  0xda   :  { %3695 = vmatprep.subr.bf16.mxu0 %v6539_v45  ;;  %3736 = vmatprep.subr.bf16.mxu1 %v6542_v46 }
  0xdd   :  { %3696 = vmatpush1.bf16.msra.mxu0 %v6537_v47  ;;  %3737 = vmatpush1.bf16.msra.mxu1 %v6540_v48 }
  0xde   :  { %3697 = vmatprep.subr.bf16.mxu0 %v6545_v49  ;;  %3738 = vmatprep.subr.bf16.mxu1 %v6548_v50 }
  0xe1   :  { %3698 = vmatpush1.bf16.msra.mxu0 %v6543_v51  ;;  %3739 = vmatpush1.bf16.msra.mxu1 %v6546_v52 }
  0xe2   :  { %3699 = vmatprep.subr.bf16.mxu0 %v6551_v53  ;;  %3740 = vmatprep.subr.bf16.mxu1 %v6554_v54  ;;  %v6603_v53 = vld [vmem:[#allocation6 + $0xaf8] ss:$36 sps:$4 sm:$0xff]  }
  0xe5   :  { %3700 = vmatpush1.bf16.msra.mxu0 %v6549_v56  ;;  %3741 = vmatpush1.bf16.msra.mxu1 %v6552_v57 }
  0xe6   :  { %3701 = vmatprep.subr.bf16.mxu0 %v6557_v58  ;;  %3742 = vmatprep.subr.bf16.mxu1 %v6560_v59  ;;  %v6608_v58 = vld [vmem:[#allocation6 + $0xab4] ss:$36 sps:$4 sm:$0xff]   ;;  %v6633_v59 = vld [vmem:[#allocation6 + $0xd80] ss:$36 sps:$4 sm:$0xff]  }
  0xe9   :  { %3702 = vmatpush2.bf16.msra.mxu0 %v6555_v60  ;;  %3743 = vmatpush2.bf16.msra.mxu1 %v6558_v61 }
  0xea   :  { %3703 = vmatprep.subr.bf16.mxu0 %v6563_v62  ;;  %3744 = vmatprep.subr.bf16.mxu1 %v6566_v63  ;;  %v6644_v63 = vld [vmem:[#allocation6 + $0x204] ss:$36 sps:$4 sm:$0xff]  }
  0xed   :  { %3704 = vmatpush2.bf16.msra.mxu0 %v6561_v0  ;;  %3745 = vmatpush2.bf16.msra.mxu1 %v6564_v1  ;;  %v6606_v0 = vld [vmem:[#allocation6 + $0xab0] ss:$36 sps:$4 sm:$0xff]  }
  0xee   :  { %3705 = vmatprep.subr.bf16.mxu0 %v6569_v2  ;;  %3746 = vmatprep.subr.bf16.mxu1 %v6572_v3  ;;  %v6611_v1 = vld [vmem:[#allocation6 + $0xa6c] ss:$36 sps:$4 sm:$0xff]   ;;  %v6614_v3 = vld [vmem:[#allocation6 + $0xa24] ss:$36 sps:$4 sm:$0xff]  }
  0xef   :  { %v6609_v2 = vld [vmem:[#allocation6 + $0xa68] ss:$36 sps:$4 sm:$0xff]  }
  0xf1   :  { %3706 = vmatpush2.bf16.msra.mxu0 %v6567_v4  ;;  %3747 = vmatpush2.bf16.msra.mxu1 %v6570_v5  ;;  %v6612_v4 = vld [vmem:[#allocation6 + $0xa20] ss:$36 sps:$4 sm:$0xff]  }
  0xf2   :  { %3707 = vmatprep.subr.bf16.mxu0 %v6575_v6  ;;  %3748 = vmatprep.subr.bf16.mxu1 %v6578_v7  ;;  %v6617_v5 = vld [vmem:[#allocation6 + $0x9dc] ss:$36 sps:$4 sm:$0xff]   ;;  %v6620_v7 = vld [vmem:[#allocation6 + $0x994] ss:$36 sps:$4 sm:$0xff]  }
  0xf3   :  { %v6615_v6 = vld [vmem:[#allocation6 + $0x9d8] ss:$36 sps:$4 sm:$0xff]  }
  0xf5   :  { %3708 = vmatpush2.bf16.msra.mxu0 %v6573_v8  ;;  %3749 = vmatpush2.bf16.msra.mxu1 %v6576_v9  ;;  %v6618_v8 = vld [vmem:[#allocation6 + $0x990] ss:$36 sps:$4 sm:$0xff]  }
  0xf6   :  { %3709 = vmatprep.subr.bf16.mxu0 %v6581_v10  ;;  %3750 = vmatprep.subr.bf16.mxu1 %v6584_v11  ;;  %v6623_v9 = vld [vmem:[#allocation6 + $0x94c] ss:$36 sps:$4 sm:$0xff]   ;;  %v6626_v11 = vld [vmem:[#allocation6 + $0x904] ss:$36 sps:$4 sm:$0xff]  }
  0xf7   :  { %v6621_v10 = vld [vmem:[#allocation6 + $0x948] ss:$36 sps:$4 sm:$0xff]  }
  0xf9   :  { %3710 = vmatpush2.bf16.msra.mxu0 %v6579_v12  ;;  %3751 = vmatpush2.bf16.msra.mxu1 %v6582_v13  ;;  %v6624_v12 = vld [vmem:[#allocation6 + $0x900] ss:$36 sps:$4 sm:$0xff]  }
  0xfa   :  { %3711 = vmatprep.subr.bf16.mxu0 %v6587_v14  ;;  %3752 = vmatprep.subr.bf16.mxu1 %v6590_v15  ;;  %v6629_v13 = vld [vmem:[#allocation6 + $0xd3c] ss:$36 sps:$4 sm:$0xff]   ;;  %v6632_v15 = vld [vmem:[#allocation6 + $0xcf4] ss:$36 sps:$4 sm:$0xff]  }
  0xfb   :  { %v6627_v14 = vld [vmem:[#allocation6 + $0xd38] ss:$36 sps:$4 sm:$0xff]  }
  0xfd   :  { %3712 = vmatpush2.bf16.msra.mxu0 %v6585_v16  ;;  %3753 = vmatpush2.bf16.msra.mxu1 %v6588_v17  ;;  %v266_v16 = vsub.s32 6, %v7528_v29  ;;  %v6630_v17 = vld [vmem:[#allocation6 + $0xcf0] ss:$36 sps:$4 sm:$0xff]  }
  0xfe   :  { %3713 = vmatprep.subr.bf16.mxu0 %v6593_v18  ;;  %3754 = vmatprep.subr.bf16.mxu1 %v6596_v19  ;;  %v262_v18 = vsub.s32 5, %v7528_v29  ;;  %v6638_v19 = vld [vmem:[#allocation6 + $0xcac] ss:$36 sps:$4 sm:$0xff]  }
 0x101   :  { %3714 = vmatpush2.bf16.msra.mxu0 %v6591_v20  ;;  %3755 = vmatpush2.bf16.msra.mxu1 %v6594_v21  ;;  %v267_v20 = vrot.slane %v7532_v32, %v266_v16  ;;  %v6636_v21 = vld [vmem:[#allocation6 + $0xca8] ss:$36 sps:$4 sm:$0xff]  }
 0x102   :  { %3715 = vmatprep.subr.bf16.mxu0 %v6599_v22  ;;  %3756 = vmatprep.subr.bf16.mxu1 %v6602_v23  ;;  %v263_v22 = vrot.slane %v7532_v32, %v262_v18 }
 0x105   :  { %3716 = vmatpush2.bf16.msra.mxu0 %v6597_v24  ;;  %3757 = vmatpush2.bf16.msra.mxu1 %v6600_v25  ;;  %v6641_v24 = vld [vmem:[#allocation6 + $0xc64] ss:$36 sps:$4 sm:$0xff]  }
 0x106   :  { %3767 = vmatprep.subr.bf16.mxu0 %v6605_v26  ;;  %3822 = vmatprep.subr.bf16.mxu1 %v6635_v27 }
 0x158   :  { %v745_v39 = vpop.f32.mrf.mxu0  ;;  %v786_v40 = vpop.f32.mrf.mxu1 }
 0x159   :  { %v746_v41 = vadd.f32 %v745_v39, %v243_v35  ;;  %v787_v42 = vadd.f32 %v786_v40, %v251_v36  ;;  %v6647_v40 = vld [vmem:[#allocation6 + $0xc1c] ss:$36 sps:$4 sm:$0xff]  }
 0x15a   :  { %v747_v43 = vpop.f32.mrf.mxu0  ;;  %v788_v44 = vpop.f32.mrf.mxu1 }
 0x15b   :  { %v874_v45 = vmax.f32 %v746_v41, 0.0  ;;  %v748_v46 = vadd.f32 %v747_v43, %v247_v37  ;;  %v789_v47 = vadd.f32 %v788_v44, %v255_v38  ;;  %v876_v48 = vmax.f32 %v787_v42, 0.0  ;;  %v6642_v37 = vld [vmem:[#allocation6 + $0x200] ss:$36 sps:$4 sm:$0xff]   ;;  %v6645_v44 = vld [vmem:[#allocation6 + $0xc18] ss:$36 sps:$4 sm:$0xff]  }
 0x15c   :  { %v790_v49 = vpop.f32.mrf.mxu1  ;;  %v749_v50 = vpop.f32.mrf.mxu0  ;;  %v6650_v41 = vld [vmem:[#allocation6 + $0x1bc] ss:$36 sps:$4 sm:$0xff]  }
 0x15d   :  { %v875_v51 = vmax.f32 %v748_v46, 0.0  ;;  %v877_v52 = vmax.f32 %v789_v47, 0.0  ;;  %v7548_v54 = vpack.c.bf16 %v874_v45, %v874_v45  ;;  %v7554_v62 = vpack.c.bf16 %v876_v48, %v876_v48  ;;  %v6648_v49 = vld [vmem:[#allocation6 + $0x1b8] ss:$36 sps:$4 sm:$0xff]  }
 0x15e   :  { %v791_v56 = vpop.f32.mrf.mxu1  ;;  %v750_v57 = vpop.f32.mrf.mxu0  ;;  %v258_v47 = vsub.s32 4, %v7528_v29 }
 0x15f   :  { %v7550_v60 = vpack.c.bf16 %v875_v51, %v875_v51  ;;  %v7552_v61 = vpack.c.bf16 %v877_v52, %v877_v52  ;;  %v6653_v51 = vld [vmem:[#allocation6 + $0xbd4] ss:$36 sps:$4 sm:$0xff]  }
 0x160   :  { %v6656_v52 = vld [vmem:[#allocation6 + $0x174] ss:$36 sps:$4 sm:$0xff]   ;;  %v259_v56 = vrot.slane %v7532_v32, %v258_v47 }
 0x161   :  { %3717 = vmatprep.mubr.bf16.mxu0 %v7550_v60  ;;  %3758 = vmatprep.mubr.bf16.mxu1 %v7552_v61  ;;  %v6654_v57 = vld [vmem:[#allocation6 + $0x170] ss:$36 sps:$4 sm:$0xff]  }
 0x162   :  { %3718 = vmatmul.mubr.bf16.vlgmr.msra.gmra.mxu0 %v7548_v54  ;;  %3759 = vmatmul.mubr.bf16.vlgmr.msra.gmra.mxu1 %v7554_v62 }
 0x163   :  { %3768 = vmatpush1.bf16.msra.mxu0 %v6603_v53  ;;  %3823 = vmatpush1.bf16.msra.mxu1 %v6633_v59  ;;  %v6651_v53 = vld [vmem:[#allocation6 + $0xbd0] ss:$36 sps:$4 sm:$0xff]  }
 0x164   :  { %3769 = vmatprep.subr.bf16.mxu0 %v6608_v58  ;;  %3840 = vmatprep.mubr.bf16.mxu1 %v7413_v55  ;;  %v6659_v58 = vld [vmem:[#allocation6 + $0xb8c] ss:$36 sps:$4 sm:$0xff]  }
 0x165   :  { %3849 = vmatprep.subr.bf16.mxu1 %v6644_v63  ;;  %v6662_v59 = vld [vmem:[#allocation6 + $0x12c] ss:$36 sps:$4 sm:$0xff]  }
 0x167   :  { %3770 = vmatpush1.bf16.msra.mxu0 %v6606_v0  ;;  %v6657_v0 = vld [vmem:[#allocation6 + $0xb88] ss:$36 sps:$4 sm:$0xff]  }
 0x168   :  { %3771 = vmatprep.subr.bf16.mxu0 %v6611_v1  ;;  %v6660_v1 = vld [vmem:[#allocation6 + $0x128] ss:$36 sps:$4 sm:$0xff]  }
 0x16b   :  { %3772 = vmatpush1.bf16.msra.mxu0 %v6609_v2  ;;  %v6665_v2 = vld [vmem:[#allocation6 + $0xb44] ss:$36 sps:$4 sm:$0xff]  }
 0x16c   :  { %3773 = vmatprep.subr.bf16.mxu0 %v6614_v3  ;;  %v6668_v3 = vld [vmem:[#allocation6 + $0xe4] ss:$36 sps:$4 sm:$0xff]  }
 0x16f   :  { %3774 = vmatpush1.bf16.msra.mxu0 %v6612_v4  ;;  %v6663_v4 = vld [vmem:[#allocation6 + $0xb40] ss:$36 sps:$4 sm:$0xff]  }
 0x170   :  { %3775 = vmatprep.subr.bf16.mxu0 %v6617_v5  ;;  %v6666_v5 = vld [vmem:[#allocation6 + $0xe0] ss:$36 sps:$4 sm:$0xff]  }
 0x173   :  { %3776 = vmatpush1.bf16.msra.mxu0 %v6615_v6  ;;  %v6671_v6 = vld [vmem:[#allocation6 + $0x684] ss:$36 sps:$4 sm:$0xff]  }
 0x174   :  { %3777 = vmatprep.subr.bf16.mxu0 %v6620_v7  ;;  %v6674_v7 = vld [vmem:[#allocation6 + $0x9c] ss:$36 sps:$4 sm:$0xff]  }
 0x177   :  { %3778 = vmatpush1.bf16.msra.mxu0 %v6618_v8 }
 0x178   :  { %3779 = vmatprep.subr.bf16.mxu0 %v6623_v9  ;;  %v6669_v9 = vld [vmem:[#allocation6 + $0x680] ss:$36 sps:$4 sm:$0xff]  }
 0x17b   :  { %3780 = vmatpush1.bf16.msra.mxu0 %v6621_v10  ;;  %v6672_v10 = vld [vmem:[#allocation6 + $0x98] ss:$36 sps:$4 sm:$0xff]  }
 0x17c   :  { %3781 = vmatprep.subr.bf16.mxu0 %v6626_v11  ;;  %v6677_v11 = vld [vmem:[#allocation6 + $0x63c] ss:$36 sps:$4 sm:$0xff]  }
 0x17f   :  { %3782 = vmatpush1.bf16.msra.mxu0 %v6624_v12  ;;  %v6680_v12 = vld [vmem:[#allocation6 + $0x54] ss:$36 sps:$4 sm:$0xff]  }
 0x180   :  { %3783 = vmatprep.subr.bf16.mxu0 %v6629_v13  ;;  %v6675_v13 = vld [vmem:[#allocation6 + $0x638] ss:$36 sps:$4 sm:$0xff]  }
 0x183   :  { %3784 = vmatpush2.bf16.msra.mxu0 %v6627_v14  ;;  %v6678_v14 = vld [vmem:[#allocation6 + $0x50] ss:$36 sps:$4 sm:$0xff]  }
 0x184   :  { %3785 = vmatprep.subr.bf16.mxu0 %v6632_v15  ;;  %v6683_v15 = vld [vmem:[#allocation6 + $0x5f4] ss:$36 sps:$4 sm:$0xff]  }
 0x187   :  { %3786 = vmatpush2.bf16.msra.mxu0 %v6630_v17  ;;  %v6686_v17 = vld [vmem:[#allocation6 + $0xc] ss:$36 sps:$4 sm:$0xff]  }
 0x188   :  { %v868_v23 = vpop.f32.mrf.mxu1  ;;  %3787 = vmatprep.subr.bf16.mxu0 %v6638_v19  ;;  %v827_v25 = vpop.f32.mrf.mxu0  ;;  %v6681_v19 = vld [vmem:[#allocation6 + $0x5f0] ss:$36 sps:$4 sm:$0xff]  }
 0x189   :  { %v869_v26 = vadd.f32 %v868_v23, %v267_v20  ;;  %v828_v63 = vadd.f32 %v827_v25, %v259_v56  ;;  %v6684_v20 = vld [vmem:[#allocation6 + $0x8] ss:$36 sps:$4 sm:$0xff]   ;;  %v6725_v56 = vld [vmem:[#allocation6 + $0x87c] ss:$36 sps:$4 sm:$0xff]  }
 0x18a   :  { %v870_v27 = vpop.f32.mrf.mxu1  ;;  %v829_v35 = vpop.f32.mrf.mxu0  ;;  %v6687_v23 = vld [vmem:[#allocation6 + $0x5a8] ss:$36 sps:$4 sm:$0xff]  }
 0x18b   :  { %v880_v36 = vmax.f32 %v869_v26, 0.0  ;;  %3788 = vmatpush2.bf16.msra.mxu0 %v6636_v21  ;;  %v830_v38 = vadd.f32 %v829_v35, %v263_v22  ;;  %v878_v32 = vmax.f32 %v828_v63, 0.0  ;;  %v6689_v21 = vld [vmem:[#allocation6 + $0x5ac] ss:$36 sps:$4 sm:$0xff]   ;;  %v6692_v22 = vld [vmem:[#allocation6 + $0x444] ss:$36 sps:$4 sm:$0xff]  }
 0x18c   :  { %v871_v39 = vpop.f32.mrf.mxu1  ;;  %3789 = vmatprep.subr.bf16.mxu0 %v6641_v24  ;;  %v831_v42 = vpop.f32.mrf.mxu0  ;;  %v6690_v24 = vld [vmem:[#allocation6 + $0x440] ss:$36 sps:$4 sm:$0xff]   ;;  %v6731_v63 = vld [vmem:[#allocation6 + $0x834] ss:$36 sps:$4 sm:$0xff]  }
 0x18d   :  { %v7569_v43 = vpack.c.bf16 %v880_v36, %v880_v36  ;;  %v879_v45 = vmax.f32 %v830_v38, 0.0  ;;  %v7581_v8 = vpack.c.bf16 %v878_v32, %v878_v32  ;;  %v6695_v25 = vld [vmem:[#allocation6 + $0x564] ss:$36 sps:$4 sm:$0xff]   ;;  %v6698_v26 = vld [vmem:[#allocation6 + $0x3fc] ss:$36 sps:$4 sm:$0xff]  }
 0x18e   :  { %v872_v46 = vpop.f32.mrf.mxu1  ;;  %v832_v48 = vpop.f32.mrf.mxu0  ;;  %v6693_v27 = vld [vmem:[#allocation6 + $0x560] ss:$36 sps:$4 sm:$0xff]   ;;  %v6704_v36 = vld [vmem:[#allocation6 + $0x3b4] ss:$36 sps:$4 sm:$0xff]   ;;  %v6708_v42 = vld [vmem:[#allocation6 + $0x368] ss:$36 sps:$4 sm:$0xff]  }
 0x18f   :  { %3790 = vmatpush2.bf16.msra.mxu0 %v6639_v28  ;;  %6040 = vmatmul.mubr.msk.bf16.vlgmr.msra.gmra.mxu1 %vm3681_vm1, %v7569_v43  ;;  %v7574_v50 = vpack.c.bf16 %v879_v45, %v879_v45  ;;  %v6696_v28 = vld [vmem:[#allocation6 + $0x3f8] ss:$36 sps:$4 sm:$0xff]   ;;  %v6702_v38 = vld [vmem:[#allocation6 + $0x3b0] ss:$36 sps:$4 sm:$0xff]   ;;  %v6716_v45 = vld [vmem:[#allocation6 + $0x324] ss:$36 sps:$4 sm:$0xff]  }
 0x190   :  { %3850 = vmatpush1.bf16.msra.mxu1 %v6642_v37  ;;  %3881 = vmatprep.mubr.bf16.mxu1 %v7550_v60  ;;  %v6701_v35 = vld [vmem:[#allocation6 + $0x51c] ss:$36 sps:$4 sm:$0xff]   ;;  %v6707_v39 = vld [vmem:[#allocation6 + $0x4d4] ss:$36 sps:$4 sm:$0xff]   ;;  %v6711_v46 = vld [vmem:[#allocation6 + $0x488] ss:$36 sps:$4 sm:$0xff]  }
 0x191   :  { %3791 = vmatprep.subr.bf16.mxu0 %v6647_v40  ;;  %3851 = vmatprep.subr.bf16.mxu1 %v6650_v41  ;;  %v6699_v37 = vld [vmem:[#allocation6 + $0x518] ss:$36 sps:$4 sm:$0xff]   ;;  %v6710_v40 = vld [vmem:[#allocation6 + $0x36c] ss:$36 sps:$4 sm:$0xff]   ;;  %v6714_v48 = vld [vmem:[#allocation6 + $0x320] ss:$36 sps:$4 sm:$0xff]  }
 0x192   :  { %3799 = vmatprep.mubr.bf16.mxu0 %v7574_v50  ;;  %v6705_v41 = vld [vmem:[#allocation6 + $0x4d0] ss:$36 sps:$4 sm:$0xff]   ;;  %v6735_v32 = vld [vmem:[#allocation6 + $0x7e8] ss:$36 sps:$4 sm:$0xff]  }
 0x193   :  { %3792 = vmatpush2.bf16.msra.mxu0 %v6645_v44  ;;  %v6713_v44 = vld [vmem:[#allocation6 + $0x48c] ss:$36 sps:$4 sm:$0xff]  }
 0x194   :  { %3852 = vmatpush1.bf16.msra.mxu1 %v6648_v49  ;;  %3793 = vmatprep.subr.bf16.mxu0 %v6653_v51  ;;  %v6719_v49 = vld [vmem:[#allocation6 + $0x8c4] ss:$36 sps:$4 sm:$0xff]   ;;  %v6722_v51 = vld [vmem:[#allocation6 + $0x2dc] ss:$36 sps:$4 sm:$0xff]  }
 0x195   :  { %3853 = vmatprep.subr.bf16.mxu1 %v6656_v52  ;;  %v6717_v52 = vld [vmem:[#allocation6 + $0x8c0] ss:$36 sps:$4 sm:$0xff]  }
 0x197   :  { %3794 = vmatpush2.bf16.msra.mxu0 %v6651_v53  ;;  %v6720_v53 = vld [vmem:[#allocation6 + $0x2d8] ss:$36 sps:$4 sm:$0xff]  }
 0x198   :  { %3854 = vmatpush1.bf16.msra.mxu1 %v6654_v57  ;;  %3795 = vmatprep.subr.bf16.mxu0 %v6659_v58  ;;  %v6728_v57 = vld [vmem:[#allocation6 + $0x294] ss:$36 sps:$4 sm:$0xff]  }
 0x199   :  { %3855 = vmatprep.subr.bf16.mxu1 %v6662_v59  ;;  %v6723_v58 = vld [vmem:[#allocation6 + $0x878] ss:$36 sps:$4 sm:$0xff]   ;;  %v6726_v59 = vld [vmem:[#allocation6 + $0x290] ss:$36 sps:$4 sm:$0xff]  }
 0x19b   :  { %3796 = vmatpush2.bf16.msra.mxu0 %v6657_v0  ;;  %v6734_v0 = vld [vmem:[#allocation6 + $0x24c] ss:$36 sps:$4 sm:$0xff]  }
 0x19c   :  { %3856 = vmatpush1.bf16.msra.mxu1 %v6660_v1  ;;  %3797 = vmatprep.subr.bf16.mxu0 %v6665_v2  ;;  %v6729_v1 = vld [vmem:[#allocation6 + $0x830] ss:$36 sps:$4 sm:$0xff]   ;;  %v6732_v2 = vld [vmem:[#allocation6 + $0x248] ss:$36 sps:$4 sm:$0xff]  }
 0x19d   :  { %3857 = vmatprep.subr.bf16.mxu1 %v6668_v3  ;;  %v6737_v3 = vld [vmem:[#allocation6 + $0x7ec] ss:$36 sps:$4 sm:$0xff]  }
 0x19f   :  { %3798 = vmatpush2.bf16.msra.mxu0 %v6663_v4  ;;  %v6740_v4 = vld [vmem:[#allocation6 + $0xb04] ss:$36 sps:$4 sm:$0xff]  }
 0x1a0   :  { %3858 = vmatpush1.bf16.msra.mxu1 %v6666_v5  ;;  %3890 = vmatprep.subr.bf16.mxu0 %v6671_v6  ;;  %v6738_v5 = vld [vmem:[#allocation6 + $0xb00] ss:$36 sps:$4 sm:$0xff]  }
 0x1a1   :  { %3859 = vmatprep.subr.bf16.mxu1 %v6674_v7  ;;  %v6743_v6 = vld [vmem:[#allocation6 + $0x7a4] ss:$36 sps:$4 sm:$0xff]   ;;  %v6746_v7 = vld [vmem:[#allocation6 + $0xabc] ss:$36 sps:$4 sm:$0xff]  }
 0x1a2   :  { %3800 = vmatmul.mubr.bf16.vlgmr.msra.gmra.mxu0 %v7581_v8 }
 0x1a3   :  { %3891 = vmatpush1.bf16.msra.mxu0 %v6669_v9  ;;  %3922 = vmatprep.mubr.bf16.mxu0 %v7552_v61  ;;  %v6741_v9 = vld [vmem:[#allocation6 + $0x7a0] ss:$36 sps:$4 sm:$0xff]  }
 0x1a4   :  { %3860 = vmatpush1.bf16.msra.mxu1 %v6672_v10  ;;  %3892 = vmatprep.subr.bf16.mxu0 %v6677_v11  ;;  %v6744_v10 = vld [vmem:[#allocation6 + $0xab8] ss:$36 sps:$4 sm:$0xff]  }
 0x1a5   :  { %3861 = vmatprep.subr.bf16.mxu1 %v6680_v12  ;;  %v6749_v11 = vld [vmem:[#allocation6 + $0x75c] ss:$36 sps:$4 sm:$0xff]   ;;  %v6752_v12 = vld [vmem:[#allocation6 + $0xa74] ss:$36 sps:$4 sm:$0xff]  }
 0x1a7   :  { %3893 = vmatpush1.bf16.msra.mxu0 %v6675_v13  ;;  %v6747_v13 = vld [vmem:[#allocation6 + $0x758] ss:$36 sps:$4 sm:$0xff]  }
 0x1a8   :  { %3862 = vmatpush1.bf16.msra.mxu1 %v6678_v14  ;;  %3894 = vmatprep.subr.bf16.mxu0 %v6683_v15  ;;  %v6750_v14 = vld [vmem:[#allocation6 + $0xa70] ss:$36 sps:$4 sm:$0xff]  }
 0x1a9   :  { %3863 = vmatprep.subr.bf16.mxu1 %v6686_v17  ;;  %v6755_v15 = vld [vmem:[#allocation6 + $0x714] ss:$36 sps:$4 sm:$0xff]   ;;  %v6758_v17 = vld [vmem:[#allocation6 + $0xa2c] ss:$36 sps:$4 sm:$0xff]  }
 0x1ab   :  { %3895 = vmatpush1.bf16.msra.mxu0 %v6681_v19  ;;  %v6753_v19 = vld [vmem:[#allocation6 + $0x710] ss:$36 sps:$4 sm:$0xff]  }
 0x1ac   :  { %3864 = vmatpush1.bf16.msra.mxu1 %v6684_v20  ;;  %3896 = vmatprep.subr.bf16.mxu0 %v6689_v21  ;;  %v6756_v20 = vld [vmem:[#allocation6 + $0xa28] ss:$36 sps:$4 sm:$0xff]  }
 0x1ad   :  { %3865 = vmatprep.subr.bf16.mxu1 %v6692_v22  ;;  %v6761_v21 = vld [vmem:[#allocation6 + $0x6cc] ss:$36 sps:$4 sm:$0xff]   ;;  %v6764_v22 = vld [vmem:[#allocation6 + $0x9e4] ss:$36 sps:$4 sm:$0xff]  }
 0x1af   :  { %3897 = vmatpush1.bf16.msra.mxu0 %v6687_v23  ;;  %v6759_v23 = vld [vmem:[#allocation6 + $0x6c8] ss:$36 sps:$4 sm:$0xff]  }
 0x1b0   :  { %3866 = vmatpush2.bf16.msra.mxu1 %v6690_v24  ;;  %3898 = vmatprep.subr.bf16.mxu0 %v6695_v25  ;;  %v6762_v24 = vld [vmem:[#allocation6 + $0x9e0] ss:$36 sps:$4 sm:$0xff]   ;;  %v6770_v25 = vld [vmem:[#allocation6 + $0xd8c] ss:$36 sps:$4 sm:$0xff]  }
 0x1b1   :  { %3867 = vmatprep.subr.bf16.mxu1 %v6698_v26  ;;  %v6767_v26 = vld [vmem:[#allocation6 + $0x99c] ss:$36 sps:$4 sm:$0xff]  }
 0x1b3   :  { %3899 = vmatpush1.bf16.msra.mxu0 %v6693_v27  ;;  %v6768_v27 = vld [vmem:[#allocation6 + $0xd88] ss:$36 sps:$4 sm:$0xff]  }
 0x1b4   :  { %3868 = vmatpush2.bf16.msra.mxu1 %v6696_v28  ;;  %3900 = vmatprep.subr.bf16.mxu0 %v6701_v35  ;;  %v6765_v28 = vld [vmem:[#allocation6 + $0x998] ss:$36 sps:$4 sm:$0xff]   ;;  %v6776_v35 = vld [vmem:[#allocation6 + $0x20c] ss:$36 sps:$4 sm:$0xff]  }
 0x1b5   :  { %3869 = vmatprep.subr.bf16.mxu1 %v6704_v36  ;;  %v6773_v36 = vld [vmem:[#allocation6 + $0x954] ss:$36 sps:$4 sm:$0xff]  }
 0x1b7   :  { %3901 = vmatpush1.bf16.msra.mxu0 %v6699_v37  ;;  %v6771_v37 = vld [vmem:[#allocation6 + $0x950] ss:$36 sps:$4 sm:$0xff]  }
 0x1b8   :  { %3870 = vmatpush2.bf16.msra.mxu1 %v6702_v38  ;;  %3902 = vmatprep.subr.bf16.mxu0 %v6707_v39  ;;  %v6779_v38 = vld [vmem:[#allocation6 + $0x90c] ss:$36 sps:$4 sm:$0xff]  }
 0x1b9   :  { %3871 = vmatprep.subr.bf16.mxu1 %v6710_v40  ;;  %v6774_v39 = vld [vmem:[#allocation6 + $0x208] ss:$36 sps:$4 sm:$0xff]  }
 0x1ba   :  { %v6777_v40 = vld [vmem:[#allocation6 + $0x908] ss:$36 sps:$4 sm:$0xff]  }
 0x1bb   :  { %3903 = vmatpush1.bf16.msra.mxu0 %v6705_v41  ;;  %v6782_v41 = vld [vmem:[#allocation6 + $0x1c4] ss:$36 sps:$4 sm:$0xff]  }
 0x1bc   :  { %3872 = vmatpush2.bf16.msra.mxu1 %v6708_v42  ;;  %3904 = vmatprep.subr.bf16.mxu0 %v6713_v44  ;;  %v6785_v42 = vld [vmem:[#allocation6 + $0xd44] ss:$36 sps:$4 sm:$0xff]  }
 0x1bd   :  { %3873 = vmatprep.subr.bf16.mxu1 %v6716_v45  ;;  %v6780_v44 = vld [vmem:[#allocation6 + $0x1c0] ss:$36 sps:$4 sm:$0xff]  }
 0x1be   :  { %v6783_v45 = vld [vmem:[#allocation6 + $0xd40] ss:$36 sps:$4 sm:$0xff]  }
 0x1bf   :  { %3905 = vmatpush1.bf16.msra.mxu0 %v6711_v46  ;;  %v6788_v46 = vld [vmem:[#allocation6 + $0x17c] ss:$36 sps:$4 sm:$0xff]  }
 0x1c0   :  { %3874 = vmatpush2.bf16.msra.mxu1 %v6714_v48  ;;  %3906 = vmatprep.subr.bf16.mxu0 %v6719_v49  ;;  %v6791_v48 = vld [vmem:[#allocation6 + $0xcfc] ss:$36 sps:$4 sm:$0xff]  }
 0x1c1   :  { %3875 = vmatprep.subr.bf16.mxu1 %v6722_v51  ;;  %v6786_v49 = vld [vmem:[#allocation6 + $0x178] ss:$36 sps:$4 sm:$0xff]  }
 0x1c2   :  { %v6789_v51 = vld [vmem:[#allocation6 + $0xcf8] ss:$36 sps:$4 sm:$0xff]  }
 0x1c3   :  { %3907 = vmatpush2.bf16.msra.mxu0 %v6717_v52  ;;  %v6794_v52 = vld [vmem:[#allocation6 + $0x134] ss:$36 sps:$4 sm:$0xff]  }
 0x1c4   :  { %3876 = vmatpush2.bf16.msra.mxu1 %v6720_v53  ;;  %3908 = vmatprep.subr.bf16.mxu0 %v6725_v56  ;;  %v6797_v53 = vld [vmem:[#allocation6 + $0xcb4] ss:$36 sps:$4 sm:$0xff]  }
 0x1c5   :  { %3877 = vmatprep.subr.bf16.mxu1 %v6728_v57  ;;  %v6792_v56 = vld [vmem:[#allocation6 + $0x130] ss:$36 sps:$4 sm:$0xff]  }
 0x1c6   :  { %v6795_v57 = vld [vmem:[#allocation6 + $0xcb0] ss:$36 sps:$4 sm:$0xff]  }
 0x1c7   :  { %3909 = vmatpush2.bf16.msra.mxu0 %v6723_v58  ;;  %v6800_v58 = vld [vmem:[#allocation6 + $0xec] ss:$36 sps:$4 sm:$0xff]  }
 0x1c8   :  { %3878 = vmatpush2.bf16.msra.mxu1 %v6726_v59  ;;  %3910 = vmatprep.subr.bf16.mxu0 %v6731_v63  ;;  %v6803_v59 = vld [vmem:[#allocation6 + $0xc6c] ss:$36 sps:$4 sm:$0xff]  }
 0x1c9   :  { %3879 = vmatprep.subr.bf16.mxu1 %v6734_v0  ;;  %v6798_v63 = vld [vmem:[#allocation6 + $0xe8] ss:$36 sps:$4 sm:$0xff]  }
 0x1ca   :  { %v6801_v0 = vld [vmem:[#allocation6 + $0xc68] ss:$36 sps:$4 sm:$0xff]  }
 0x1cb   :  { %3911 = vmatpush2.bf16.msra.mxu0 %v6729_v1  ;;  %v6806_v1 = vld [vmem:[#allocation6 + $0xa4] ss:$36 sps:$4 sm:$0xff]  }
 0x1cc   :  { %3880 = vmatpush2.bf16.msra.mxu1 %v6732_v2  ;;  %3912 = vmatprep.subr.bf16.mxu0 %v6737_v3  ;;  %v6809_v2 = vld [vmem:[#allocation6 + $0xc24] ss:$36 sps:$4 sm:$0xff]  }
 0x1cd   :  { %3931 = vmatprep.subr.bf16.mxu1 %v6740_v4  ;;  %v6804_v3 = vld [vmem:[#allocation6 + $0xa0] ss:$36 sps:$4 sm:$0xff]  }
 0x1ce   :  { %v6807_v4 = vld [vmem:[#allocation6 + $0xc20] ss:$36 sps:$4 sm:$0xff]  }
 0x1cf   :  { %3882 = vmatmul.mubr.bf16.vlgmr.msra.gmra.mxu1 %v7548_v54  ;;  %3913 = vmatpush2.bf16.msra.mxu0 %v6735_v32  ;;  %v6812_v32 = vld [vmem:[#allocation6 + $0x5c] ss:$36 sps:$4 sm:$0xff]  }
 0x1d0   :  { %3932 = vmatpush1.bf16.msra.mxu1 %v6738_v5  ;;  %3963 = vmatprep.mubr.bf16.mxu1 %v7574_v50  ;;  %v6815_v5 = vld [vmem:[#allocation6 + $0xbdc] ss:$36 sps:$4 sm:$0xff]  }
 0x1d1   :  { %3914 = vmatprep.subr.bf16.mxu0 %v6743_v6  ;;  %3933 = vmatprep.subr.bf16.mxu1 %v6746_v7  ;;  %v6810_v6 = vld [vmem:[#allocation6 + $0x58] ss:$36 sps:$4 sm:$0xff]  }
 0x1d2   :  { %v6813_v7 = vld [vmem:[#allocation6 + $0xbd8] ss:$36 sps:$4 sm:$0xff]  }
 0x1d3   :  { %3915 = vmatpush2.bf16.msra.mxu0 %v6741_v9  ;;  %v6818_v9 = vld [vmem:[#allocation6 + $0x14] ss:$36 sps:$4 sm:$0xff]  }
 0x1d4   :  { %3934 = vmatpush1.bf16.msra.mxu1 %v6744_v10  ;;  %3916 = vmatprep.subr.bf16.mxu0 %v6749_v11  ;;  %v6821_v10 = vld [vmem:[#allocation6 + $0xb94] ss:$36 sps:$4 sm:$0xff]  }
 0x1d5   :  { %3935 = vmatprep.subr.bf16.mxu1 %v6752_v12  ;;  %v6816_v11 = vld [vmem:[#allocation6 + $0x10] ss:$36 sps:$4 sm:$0xff]  }
 0x1d6   :  { %v6819_v12 = vld [vmem:[#allocation6 + $0xb90] ss:$36 sps:$4 sm:$0xff]  }
 0x1d7   :  { %3917 = vmatpush2.bf16.msra.mxu0 %v6747_v13  ;;  %v6824_v13 = vld [vmem:[#allocation6 + $0x44c] ss:$36 sps:$4 sm:$0xff]  }
 0x1d8   :  { %3936 = vmatpush1.bf16.msra.mxu1 %v6750_v14  ;;  %3918 = vmatprep.subr.bf16.mxu0 %v6755_v15  ;;  %v6827_v14 = vld [vmem:[#allocation6 + $0xb4c] ss:$36 sps:$4 sm:$0xff]  }
 0x1d9   :  { %3937 = vmatprep.subr.bf16.mxu1 %v6758_v17  ;;  %v6822_v15 = vld [vmem:[#allocation6 + $0x448] ss:$36 sps:$4 sm:$0xff]  }
 0x1da   :  { %v6825_v17 = vld [vmem:[#allocation6 + $0xb48] ss:$36 sps:$4 sm:$0xff]  }
 0x1db   :  { %3919 = vmatpush2.bf16.msra.mxu0 %v6753_v19  ;;  %v6830_v19 = vld [vmem:[#allocation6 + $0x404] ss:$36 sps:$4 sm:$0xff]  }
 0x1dc   :  { %3938 = vmatpush1.bf16.msra.mxu1 %v6756_v20  ;;  %3920 = vmatprep.subr.bf16.mxu0 %v6761_v21  ;;  %v6833_v20 = vld [vmem:[#allocation6 + $0x68c] ss:$36 sps:$4 sm:$0xff]   ;;  %v6828_v21 = vld [vmem:[#allocation6 + $0x400] ss:$36 sps:$4 sm:$0xff]  }
 0x1dd   :  { %3939 = vmatprep.subr.bf16.mxu1 %v6764_v22  ;;  %v6831_v22 = vld [vmem:[#allocation6 + $0x688] ss:$36 sps:$4 sm:$0xff]  }
 0x1df   :  { %3921 = vmatpush2.bf16.msra.mxu0 %v6759_v23  ;;  %v6836_v23 = vld [vmem:[#allocation6 + $0x3bc] ss:$36 sps:$4 sm:$0xff]  }
 0x1e0   :  { %3940 = vmatpush1.bf16.msra.mxu1 %v6762_v24  ;;  %3986 = vmatprep.subr.bf16.mxu0 %v6770_v25  ;;  %v6839_v24 = vld [vmem:[#allocation6 + $0x644] ss:$36 sps:$4 sm:$0xff]   ;;  %v6834_v25 = vld [vmem:[#allocation6 + $0x3b8] ss:$36 sps:$4 sm:$0xff]  }
 0x1e1   :  { %3941 = vmatprep.subr.bf16.mxu1 %v6767_v26  ;;  %v6837_v26 = vld [vmem:[#allocation6 + $0x640] ss:$36 sps:$4 sm:$0xff]  }
 0x1e2   :  { %3923 = vmatmul.mubr.bf16.vlgmr.msra.gmra.mxu0 %v7554_v62 }
 0x1e3   :  { %3987 = vmatpush1.bf16.msra.mxu0 %v6768_v27  ;;  %4004 = vmatprep.mubr.bf16.mxu0 %v7413_v55  ;;  %v6842_v27 = vld [vmem:[#allocation6 + $0x374] ss:$36 sps:$4 sm:$0xff]  }
 0x1e4   :  { %3942 = vmatpush1.bf16.msra.mxu1 %v6765_v28  ;;  %4013 = vmatprep.subr.bf16.mxu0 %v6776_v35  ;;  %v6845_v28 = vld [vmem:[#allocation6 + $0x5fc] ss:$36 sps:$4 sm:$0xff]   ;;  %v6840_v35 = vld [vmem:[#allocation6 + $0x370] ss:$36 sps:$4 sm:$0xff]  }
 0x1e5   :  { %3943 = vmatprep.subr.bf16.mxu1 %v6773_v36  ;;  %v6843_v36 = vld [vmem:[#allocation6 + $0x5f8] ss:$36 sps:$4 sm:$0xff]  }
 0x1e8   :  { %3944 = vmatpush1.bf16.msra.mxu1 %v6771_v37  ;;  %v6848_v37 = vld [vmem:[#allocation6 + $0x32c] ss:$36 sps:$4 sm:$0xff]  }
 0x1e9   :  { %3945 = vmatprep.subr.bf16.mxu1 %v6779_v38  ;;  %v6851_v38 = vld [vmem:[#allocation6 + $0x5b4] ss:$36 sps:$4 sm:$0xff]  }
 0x1ea   :  { %6041 = vmatmul.mubr.msk.bf16.vlgmr.msra.gmra.mxu0 %vm3681_vm1, %v7569_v43 }
 0x1eb   :  { %4014 = vmatpush1.bf16.msra.mxu0 %v6774_v39  ;;  %4045 = vmatprep.mubr.bf16.mxu0 %v7550_v60  ;;  %v6846_v39 = vld [vmem:[#allocation6 + $0x328] ss:$36 sps:$4 sm:$0xff]  }
 0x1ec   :  { %3946 = vmatpush1.bf16.msra.mxu1 %v6777_v40  ;;  %4015 = vmatprep.subr.bf16.mxu0 %v6782_v41  ;;  %v6849_v40 = vld [vmem:[#allocation6 + $0x5b0] ss:$36 sps:$4 sm:$0xff]   ;;  %v6854_v41 = vld [vmem:[#allocation6 + $0x2e4] ss:$36 sps:$4 sm:$0xff]  }
 0x1ed   :  { %3947 = vmatprep.subr.bf16.mxu1 %v6785_v42  ;;  %v6857_v42 = vld [vmem:[#allocation6 + $0x56c] ss:$36 sps:$4 sm:$0xff]  }
 0x1ef   :  { %4016 = vmatpush1.bf16.msra.mxu0 %v6780_v44  ;;  %v6852_v44 = vld [vmem:[#allocation6 + $0x2e0] ss:$36 sps:$4 sm:$0xff]  }
 0x1f0   :  { %3948 = vmatpush2.bf16.msra.mxu1 %v6783_v45  ;;  %4017 = vmatprep.subr.bf16.mxu0 %v6788_v46  ;;  %v6855_v45 = vld [vmem:[#allocation6 + $0x568] ss:$36 sps:$4 sm:$0xff]   ;;  %v6860_v46 = vld [vmem:[#allocation6 + $0x29c] ss:$36 sps:$4 sm:$0xff]  }
 0x1f1   :  { %3949 = vmatprep.subr.bf16.mxu1 %v6791_v48  ;;  %v7594_v48 = vld [vmem:[#allocation7] sm:$0xff] }
 0x1f3   :  { %4018 = vmatpush1.bf16.msra.mxu0 %v6786_v49  ;;  %v6863_v49 = vld [vmem:[#allocation6 + $0x524] ss:$36 sps:$4 sm:$0xff]  }
 0x1f4   :  { %3950 = vmatpush2.bf16.msra.mxu1 %v6789_v51  ;;  %4019 = vmatprep.subr.bf16.mxu0 %v6794_v52  ;;  %v6858_v51 = vld [vmem:[#allocation6 + $0x298] ss:$36 sps:$4 sm:$0xff]   ;;  %v1385_v52 = vrot.slane %v7594_v48, %v242_v30 }
 0x1f5   :  { %3951 = vmatprep.subr.bf16.mxu1 %v6797_v53  ;;  %v6861_v53 = vld [vmem:[#allocation6 + $0x520] ss:$36 sps:$4 sm:$0xff]   ;;  %v6867_v30 = vld [vmem:[#allocation6 + $0x4d8] ss:$36 sps:$4 sm:$0xff]  }
 0x1f7   :  { %4020 = vmatpush1.bf16.msra.mxu0 %v6792_v56  ;;  %v6866_v56 = vld [vmem:[#allocation6 + $0x254] ss:$36 sps:$4 sm:$0xff]  }
 0x1f8   :  { %3952 = vmatpush2.bf16.msra.mxu1 %v6795_v57  ;;  %4021 = vmatprep.subr.bf16.mxu0 %v6800_v58  ;;  %v1389_v57 = vrot.slane %v7594_v48, %v246_v33  ;;  %v6869_v58 = vld [vmem:[#allocation6 + $0x4dc] ss:$36 sps:$4 sm:$0xff]  }
 0x1f9   :  { %3953 = vmatprep.subr.bf16.mxu1 %v6803_v59 }
 0x1fb   :  { %4022 = vmatpush1.bf16.msra.mxu0 %v6798_v63 }
 0x1fc   :  { %3954 = vmatpush2.bf16.msra.mxu1 %v6801_v0  ;;  %4023 = vmatprep.subr.bf16.mxu0 %v6806_v1  ;;  %v6864_v1 = vld [vmem:[#allocation6 + $0x250] ss:$36 sps:$4 sm:$0xff]  }
 0x1fd   :  { %3955 = vmatprep.subr.bf16.mxu1 %v6809_v2 }
 0x1ff   :  { %4024 = vmatpush1.bf16.msra.mxu0 %v6804_v3 }
 0x200   :  { %3956 = vmatpush2.bf16.msra.mxu1 %v6807_v4  ;;  %4025 = vmatprep.subr.bf16.mxu0 %v6812_v32  ;;  %v6872_v4 = vld [vmem:[#allocation6 + $0xb0c] ss:$36 sps:$4 sm:$0xff]  }
 0x201   :  { %3957 = vmatprep.subr.bf16.mxu1 %v6815_v5 }
 0x203   :  { %4026 = vmatpush1.bf16.msra.mxu0 %v6810_v6  ;;  %v6875_v6 = vld [vmem:[#allocation6 + $0x494] ss:$36 sps:$4 sm:$0xff]  }
 0x204   :  { %3958 = vmatpush2.bf16.msra.mxu1 %v6813_v7  ;;  %4027 = vmatprep.subr.bf16.mxu0 %v6818_v9 }
 0x205   :  { %3959 = vmatprep.subr.bf16.mxu1 %v6821_v10  ;;  %v6870_v10 = vld [vmem:[#allocation6 + $0xb08] ss:$36 sps:$4 sm:$0xff]  }
 0x207   :  { %4028 = vmatpush1.bf16.msra.mxu0 %v6816_v11 }
 0x208   :  { %3960 = vmatpush2.bf16.msra.mxu1 %v6819_v12  ;;  %4029 = vmatprep.subr.bf16.mxu0 %v6824_v13  ;;  %v6873_v13 = vld [vmem:[#allocation6 + $0x490] ss:$36 sps:$4 sm:$0xff]  }
 0x209   :  { %3961 = vmatprep.subr.bf16.mxu1 %v6827_v14  ;;  %v6878_v14 = vld [vmem:[#allocation6 + $0xac4] ss:$36 sps:$4 sm:$0xff]  }
 0x20b   :  { %4030 = vmatpush2.bf16.msra.mxu0 %v6822_v15  ;;  %v6881_v15 = vld [vmem:[#allocation6 + $0x8cc] ss:$36 sps:$4 sm:$0xff]  }
 0x20c   :  { %3962 = vmatpush2.bf16.msra.mxu1 %v6825_v17  ;;  %4031 = vmatprep.subr.bf16.mxu0 %v6830_v19  ;;  %v6876_v17 = vld [vmem:[#allocation6 + $0xac0] ss:$36 sps:$4 sm:$0xff]   ;;  %v6879_v19 = vld [vmem:[#allocation6 + $0x8c8] ss:$36 sps:$4 sm:$0xff]  }
 0x20d   :  { %4054 = vmatprep.subr.bf16.mxu1 %v6833_v20  ;;  %v6884_v20 = vld [vmem:[#allocation6 + $0xa7c] ss:$36 sps:$4 sm:$0xff]  }
 0x20f   :  { %4032 = vmatpush2.bf16.msra.mxu0 %v6828_v21  ;;  %3964 = vmatmul.mubr.bf16.vlgmr.msra.gmra.mxu1 %v7581_v8  ;;  %v6887_v21 = vld [vmem:[#allocation6 + $0x884] ss:$36 sps:$4 sm:$0xff]  }
 0x210   :  { %4055 = vmatpush1.bf16.msra.mxu1 %v6831_v22  ;;  %4086 = vmatprep.mubr.bf16.mxu1 %v7552_v61  ;;  %v6882_v22 = vld [vmem:[#allocation6 + $0xa78] ss:$36 sps:$4 sm:$0xff]  }
 0x211   :  { %4033 = vmatprep.subr.bf16.mxu0 %v6836_v23  ;;  %4056 = vmatprep.subr.bf16.mxu1 %v6839_v24  ;;  %v6885_v23 = vld [vmem:[#allocation6 + $0x880] ss:$36 sps:$4 sm:$0xff]   ;;  %v6890_v24 = vld [vmem:[#allocation6 + $0xa34] ss:$36 sps:$4 sm:$0xff]  }
 0x213   :  { %4034 = vmatpush2.bf16.msra.mxu0 %v6834_v25  ;;  %v6893_v25 = vld [vmem:[#allocation6 + $0x83c] ss:$36 sps:$4 sm:$0xff]  }
 0x214   :  { %4057 = vmatpush1.bf16.msra.mxu1 %v6837_v26  ;;  %4035 = vmatprep.subr.bf16.mxu0 %v6842_v27  ;;  %v6888_v26 = vld [vmem:[#allocation6 + $0xa30] ss:$36 sps:$4 sm:$0xff]   ;;  %v6891_v27 = vld [vmem:[#allocation6 + $0x838] ss:$36 sps:$4 sm:$0xff]  }
 0x215   :  { %4058 = vmatprep.subr.bf16.mxu1 %v6845_v28  ;;  %v6896_v28 = vld [vmem:[#allocation6 + $0x9ec] ss:$36 sps:$4 sm:$0xff]  }
 0x217   :  { %4036 = vmatpush2.bf16.msra.mxu0 %v6840_v35  ;;  %v6899_v35 = vld [vmem:[#allocation6 + $0x7f4] ss:$36 sps:$4 sm:$0xff]  }
 0x218   :  { %4059 = vmatpush1.bf16.msra.mxu1 %v6843_v36  ;;  %4037 = vmatprep.subr.bf16.mxu0 %v6848_v37  ;;  %v6894_v36 = vld [vmem:[#allocation6 + $0x9e8] ss:$36 sps:$4 sm:$0xff]   ;;  %v6897_v37 = vld [vmem:[#allocation6 + $0x7f0] ss:$36 sps:$4 sm:$0xff]  }
 0x219   :  { %4060 = vmatprep.subr.bf16.mxu1 %v6851_v38  ;;  %v6902_v38 = vld [vmem:[#allocation6 + $0x9a4] ss:$36 sps:$4 sm:$0xff]  }
 0x21b   :  { %4038 = vmatpush2.bf16.msra.mxu0 %v6846_v39  ;;  %v6905_v39 = vld [vmem:[#allocation6 + $0x7ac] ss:$36 sps:$4 sm:$0xff]  }
 0x21c   :  { %4061 = vmatpush1.bf16.msra.mxu1 %v6849_v40  ;;  %4039 = vmatprep.subr.bf16.mxu0 %v6854_v41  ;;  %v6900_v40 = vld [vmem:[#allocation6 + $0x9a0] ss:$36 sps:$4 sm:$0xff]   ;;  %v6903_v41 = vld [vmem:[#allocation6 + $0x7a8] ss:$36 sps:$4 sm:$0xff]  }
 0x21d   :  { %4062 = vmatprep.subr.bf16.mxu1 %v6857_v42  ;;  %v6908_v42 = vld [vmem:[#allocation6 + $0x95c] ss:$36 sps:$4 sm:$0xff]  }
 0x21f   :  { %4040 = vmatpush2.bf16.msra.mxu0 %v6852_v44  ;;  %v6911_v44 = vld [vmem:[#allocation6 + $0x764] ss:$36 sps:$4 sm:$0xff]  }
 0x220   :  { %4063 = vmatpush1.bf16.msra.mxu1 %v6855_v45  ;;  %4041 = vmatprep.subr.bf16.mxu0 %v6860_v46  ;;  %v6906_v45 = vld [vmem:[#allocation6 + $0x958] ss:$36 sps:$4 sm:$0xff]   ;;  %v6909_v46 = vld [vmem:[#allocation6 + $0x760] ss:$36 sps:$4 sm:$0xff]  }
 0x221   :  { %4064 = vmatprep.subr.bf16.mxu1 %v6863_v49  ;;  %v6914_v49 = vld [vmem:[#allocation6 + $0x914] ss:$36 sps:$4 sm:$0xff]  }
 0x222   :  { %v3719_v59 = vpop.f32.mrf.mxu0  ;;  %v3760_v63 = vpop.f32.mrf.mxu1 }
 0x223   :  { %4042 = vmatpush2.bf16.msra.mxu0 %v6858_v51  ;;  %v3720_v0 = vadd.f32 %v3719_v59, %v1385_v52  ;;  %v6917_v51 = vld [vmem:[#allocation6 + $0x71c] ss:$36 sps:$4 sm:$0xff]   ;;  %v6912_v52 = vld [vmem:[#allocation6 + $0x910] ss:$36 sps:$4 sm:$0xff]  }
 0x224   :  { %4065 = vmatpush1.bf16.msra.mxu1 %v6861_v53  ;;  %v3721_v2 = vpop.f32.mrf.mxu0  ;;  %v3762_v3 = vpop.f32.mrf.mxu1  ;;  %4043 = vmatprep.subr.bf16.mxu0 %v6866_v56  ;;  %v6915_v53 = vld [vmem:[#allocation6 + $0x718] ss:$36 sps:$4 sm:$0xff]   ;;  %v6920_v56 = vld [vmem:[#allocation6 + $0xd4c] ss:$36 sps:$4 sm:$0xff]  }
 0x225   :  { %v7602_v32 = vadd.f32 %v3760_v63, %v3720_v0  ;;  %v3722_v5 = vadd.f32 %v3721_v2, %v1389_v57  ;;  %4066 = vmatprep.subr.bf16.mxu1 %v6869_v58  ;;  %v6923_v57 = vld [vmem:[#allocation6 + $0x6d4] ss:$36 sps:$4 sm:$0xff]   ;;  %v6918_v58 = vld [vmem:[#allocation6 + $0xd48] ss:$36 sps:$4 sm:$0xff]  }
 0x226   :  { %v3723_v7 = vpop.f32.mrf.mxu0  ;;  %v3764_v9 = vpop.f32.mrf.mxu1  ;;  %v6921_v59 = vld [vmem:[#allocation6 + $0x6d0] ss:$36 sps:$4 sm:$0xff]   ;;  %v6926_v63 = vld [vmem:[#allocation6 + $0xd04] ss:$36 sps:$4 sm:$0xff]  }
 0x227   :  { %v7604_v33 = vadd.f32 %v3762_v3, %v3722_v5  ;;  %4044 = vmatpush2.bf16.msra.mxu0 %v6864_v1  ;;  %v6929_v0 = vld [vmem:[#allocation6 + $0xd94] ss:$36 sps:$4 sm:$0xff]   ;;  %v6924_v1 = vld [vmem:[#allocation6 + $0xd00] ss:$36 sps:$4 sm:$0xff]  }
 0x228   :  { %4067 = vmatpush1.bf16.msra.mxu1 %v6867_v30  ;;  %v3724_v11 = vpop.f32.mrf.mxu0  ;;  %v3765_v12 = vpop.f32.mrf.mxu1  ;;  %4095 = vmatprep.subr.bf16.mxu0 %v6872_v4  ;;  %v6927_v2 = vld [vmem:[#allocation6 + $0xd90] ss:$36 sps:$4 sm:$0xff]   ;;  %v6932_v3 = vld [vmem:[#allocation6 + $0xcbc] ss:$36 sps:$4 sm:$0xff]  }
 0x229   :  { %4068 = vmatprep.subr.bf16.mxu1 %v6875_v6  ;;  %v6938_v30 = vld [vmem:[#allocation6 + $0x214] ss:$36 sps:$4 sm:$0xff]  }
 0x22a   :  { %4046 = vmatmul.mubr.bf16.vlgmr.msra.gmra.mxu0 %v7548_v54  ;;  %v6930_v5 = vld [vmem:[#allocation6 + $0xcb8] ss:$36 sps:$4 sm:$0xff]   ;;  %v6936_v11 = vld [vmem:[#allocation6 + $0x210] ss:$36 sps:$4 sm:$0xff]  }
 0x22b   :  { %4096 = vmatpush1.bf16.msra.mxu0 %v6870_v10  ;;  %4127 = vmatprep.mubr.bf16.mxu0 %v7574_v50  ;;  %v6935_v6 = vld [vmem:[#allocation6 + $0xc74] ss:$36 sps:$4 sm:$0xff]  }
 0x22c   :  { %4069 = vmatpush1.bf16.msra.mxu1 %v6873_v13  ;;  %4097 = vmatprep.subr.bf16.mxu0 %v6878_v14  ;;  %v6933_v10 = vld [vmem:[#allocation6 + $0xc70] ss:$36 sps:$4 sm:$0xff]  }
 0x22d   :  { %4070 = vmatprep.subr.bf16.mxu1 %v6881_v15  ;;  %v6941_v13 = vld [vmem:[#allocation6 + $0xc2c] ss:$36 sps:$4 sm:$0xff]  }
 0x22e   :  { %v6944_v14 = vld [vmem:[#allocation6 + $0x1cc] ss:$36 sps:$4 sm:$0xff]  }
 0x22f   :  { %4098 = vmatpush1.bf16.msra.mxu0 %v6876_v17  ;;  %v6939_v15 = vld [vmem:[#allocation6 + $0xc28] ss:$36 sps:$4 sm:$0xff]  }
 0x230   :  { %4071 = vmatpush2.bf16.msra.mxu1 %v6879_v19  ;;  %4099 = vmatprep.subr.bf16.mxu0 %v6884_v20  ;;  %v6942_v17 = vld [vmem:[#allocation6 + $0x1c8] ss:$36 sps:$4 sm:$0xff]  }
 0x231   :  { %4072 = vmatprep.subr.bf16.mxu1 %v6887_v21  ;;  %v6947_v19 = vld [vmem:[#allocation6 + $0xbe4] ss:$36 sps:$4 sm:$0xff]  }
 0x232   :  { %v6950_v20 = vld [vmem:[#allocation6 + $0x184] ss:$36 sps:$4 sm:$0xff]  }
 0x233   :  { %4100 = vmatpush1.bf16.msra.mxu0 %v6882_v22  ;;  %v6945_v21 = vld [vmem:[#allocation6 + $0xbe0] ss:$36 sps:$4 sm:$0xff]  }
 0x234   :  { %4073 = vmatpush2.bf16.msra.mxu1 %v6885_v23  ;;  %4101 = vmatprep.subr.bf16.mxu0 %v6890_v24  ;;  %v6948_v22 = vld [vmem:[#allocation6 + $0x180] ss:$36 sps:$4 sm:$0xff]  }
 0x235   :  { %4074 = vmatprep.subr.bf16.mxu1 %v6893_v25  ;;  %v6953_v23 = vld [vmem:[#allocation6 + $0xb9c] ss:$36 sps:$4 sm:$0xff]  }
 0x236   :  { %v6956_v24 = vld [vmem:[#allocation6 + $0x13c] ss:$36 sps:$4 sm:$0xff]  }
 0x237   :  { %4102 = vmatpush1.bf16.msra.mxu0 %v6888_v26  ;;  %v6951_v25 = vld [vmem:[#allocation6 + $0xb98] ss:$36 sps:$4 sm:$0xff]  }
 0x238   :  { %4075 = vmatpush2.bf16.msra.mxu1 %v6891_v27  ;;  %4103 = vmatprep.subr.bf16.mxu0 %v6896_v28  ;;  %v6954_v26 = vld [vmem:[#allocation6 + $0x138] ss:$36 sps:$4 sm:$0xff]  }
 0x239   :  { %4076 = vmatprep.subr.bf16.mxu1 %v6899_v35  ;;  %v6959_v27 = vld [vmem:[#allocation6 + $0xb54] ss:$36 sps:$4 sm:$0xff]  }
 0x23a   :  { %v6962_v28 = vld [vmem:[#allocation6 + $0xf4] ss:$36 sps:$4 sm:$0xff]  }
 0x23b   :  { %4104 = vmatpush1.bf16.msra.mxu0 %v6894_v36 }
 0x23c   :  { %4077 = vmatpush2.bf16.msra.mxu1 %v6897_v37  ;;  %4105 = vmatprep.subr.bf16.mxu0 %v6902_v38  ;;  %v6957_v37 = vld [vmem:[#allocation6 + $0xb50] ss:$36 sps:$4 sm:$0xff]  }
 0x23d   :  { %4078 = vmatprep.subr.bf16.mxu1 %v6905_v39  ;;  %v6960_v39 = vld [vmem:[#allocation6 + $0xf0] ss:$36 sps:$4 sm:$0xff]  }
 0x23f   :  { %4106 = vmatpush1.bf16.msra.mxu0 %v6900_v40  ;;  %v6965_v40 = vld [vmem:[#allocation6 + $0x694] ss:$36 sps:$4 sm:$0xff]  }
 0x240   :  { %4079 = vmatpush2.bf16.msra.mxu1 %v6903_v41  ;;  %4107 = vmatprep.subr.bf16.mxu0 %v6908_v42 }
 0x241   :  { %4080 = vmatprep.subr.bf16.mxu1 %v6911_v44  ;;  %v6968_v44 = vld [vmem:[#allocation6 + $0xac] ss:$36 sps:$4 sm:$0xff]  }
 0x243   :  { %4108 = vmatpush1.bf16.msra.mxu0 %v6906_v45 }
 0x244   :  { %4081 = vmatpush2.bf16.msra.mxu1 %v6909_v46  ;;  %4109 = vmatprep.subr.bf16.mxu0 %v6914_v49  ;;  %v6963_v49 = vld [vmem:[#allocation6 + $0x690] ss:$36 sps:$4 sm:$0xff]  }
 0x245   :  { %4082 = vmatprep.subr.bf16.mxu1 %v6917_v51  ;;  %v6966_v51 = vld [vmem:[#allocation6 + $0xa8] ss:$36 sps:$4 sm:$0xff]  }
 0x247   :  { %4110 = vmatpush1.bf16.msra.mxu0 %v6912_v52  ;;  %v6971_v52 = vld [vmem:[#allocation6 + $0x64c] ss:$36 sps:$4 sm:$0xff]  }
 0x248   :  { %4083 = vmatpush2.bf16.msra.mxu1 %v6915_v53  ;;  %4111 = vmatprep.subr.bf16.mxu0 %v6920_v56  ;;  %v6974_v53 = vld [vmem:[#allocation6 + $0x64] ss:$36 sps:$4 sm:$0xff]  }
 0x249   :  { %4084 = vmatprep.subr.bf16.mxu1 %v6923_v57  ;;  %v6972_v56 = vld [vmem:[#allocation6 + $0x60] ss:$36 sps:$4 sm:$0xff]  }
 0x24a   :  { %v6977_v57 = vld [vmem:[#allocation6 + $0x604] ss:$36 sps:$4 sm:$0xff]  }
 0x24b   :  { %4112 = vmatpush2.bf16.msra.mxu0 %v6918_v58  ;;  %v6980_v58 = vld [vmem:[#allocation6 + $0x1c] ss:$36 sps:$4 sm:$0xff]  }
 0x24c   :  { %4085 = vmatpush2.bf16.msra.mxu1 %v6921_v59  ;;  %4113 = vmatprep.subr.bf16.mxu0 %v6926_v63  ;;  %v6975_v59 = vld [vmem:[#allocation6 + $0x600] ss:$36 sps:$4 sm:$0xff]   ;;  %v6978_v63 = vld [vmem:[#allocation6 + $0x18] ss:$36 sps:$4 sm:$0xff]  }
 0x24d   :  { %4150 = vmatprep.subr.bf16.mxu1 %v6929_v0  ;;  %v6983_v0 = vld [vmem:[#allocation6 + $0x5bc] ss:$36 sps:$4 sm:$0xff]  }
 0x24f   :  { %4114 = vmatpush2.bf16.msra.mxu0 %v6924_v1  ;;  %4087 = vmatmul.mubr.bf16.vlgmr.msra.gmra.mxu1 %v7554_v62  ;;  %v3842_v4 = vpop.f32.mrf.mxu1  ;;  %v6986_v1 = vld [vmem:[#allocation6 + $0x454] ss:$36 sps:$4 sm:$0xff]  }
 0x250   :  { %4151 = vmatpush1.bf16.msra.mxu1 %v6927_v2  ;;  %4115 = vmatprep.subr.bf16.mxu0 %v6932_v3  ;;  %v6981_v2 = vld [vmem:[#allocation6 + $0x5b8] ss:$36 sps:$4 sm:$0xff]   ;;  %v6984_v3 = vld [vmem:[#allocation6 + $0x450] ss:$36 sps:$4 sm:$0xff]  }
 0x251   :  { %v3844_v7 = vpop.f32.mrf.mxu1  ;;  %4168 = vmatprep.mubr.bf16.mxu1 %v7413_v55  ;;  %4177 = vmatprep.subr.bf16.mxu1 %v6938_v30  ;;  %v6989_v30 = vld [vmem:[#allocation6 + $0x574] ss:$36 sps:$4 sm:$0xff]  }
 0x253   :  { %4116 = vmatpush2.bf16.msra.mxu0 %v6930_v5  ;;  %v3846_v9 = vpop.f32.mrf.mxu1  ;;  %v6987_v5 = vld [vmem:[#allocation6 + $0x570] ss:$36 sps:$4 sm:$0xff]  }
 0x254   :  { %4117 = vmatprep.subr.bf16.mxu0 %v6935_v6  ;;  %v6990_v6 = vld [vmem:[#allocation6 + $0x408] ss:$36 sps:$4 sm:$0xff]  }
 0x255   :  { %v3847_v12 = vpop.f32.mrf.mxu1  ;;  %v6998_v9 = vld [vmem:[#allocation6 + $0x3c4] ss:$36 sps:$4 sm:$0xff]  }
 0x256   :  { %v7001_v12 = vld [vmem:[#allocation6 + $0x4e4] ss:$36 sps:$4 sm:$0xff]  }
 0x257   :  { %4118 = vmatpush2.bf16.msra.mxu0 %v6933_v10  ;;  %6042 = vmatmul.mubr.msk.bf16.vlgmr.msra.gmra.mxu1 %vm3681_vm1, %v7569_v43  ;;  %v6993_v10 = vld [vmem:[#allocation6 + $0x528] ss:$36 sps:$4 sm:$0xff]  }
 0x258   :  { %4178 = vmatpush1.bf16.msra.mxu1 %v6936_v11  ;;  %4209 = vmatprep.mubr.bf16.mxu1 %v7550_v60  ;;  %v6996_v11 = vld [vmem:[#allocation6 + $0x3c0] ss:$36 sps:$4 sm:$0xff]  }
 0x259   :  { %4119 = vmatprep.subr.bf16.mxu0 %v6941_v13  ;;  %4179 = vmatprep.subr.bf16.mxu1 %v6944_v14  ;;  %v7004_v13 = vld [vmem:[#allocation6 + $0x37c] ss:$36 sps:$4 sm:$0xff]  }
 0x25a   :  { %v6999_v14 = vld [vmem:[#allocation6 + $0x4e0] ss:$36 sps:$4 sm:$0xff]  }
 0x25b   :  { %4120 = vmatpush2.bf16.msra.mxu0 %v6939_v15  ;;  %v7002_v15 = vld [vmem:[#allocation6 + $0x378] ss:$36 sps:$4 sm:$0xff]  }
 0x25c   :  { %4180 = vmatpush1.bf16.msra.mxu1 %v6942_v17  ;;  %4121 = vmatprep.subr.bf16.mxu0 %v6947_v19  ;;  %v7007_v17 = vld [vmem:[#allocation6 + $0x49c] ss:$36 sps:$4 sm:$0xff]   ;;  %v7010_v19 = vld [vmem:[#allocation6 + $0x334] ss:$36 sps:$4 sm:$0xff]  }
 0x25d   :  { %4181 = vmatprep.subr.bf16.mxu1 %v6950_v20  ;;  %v7005_v20 = vld [vmem:[#allocation6 + $0x498] ss:$36 sps:$4 sm:$0xff]  }
 0x25f   :  { %4122 = vmatpush2.bf16.msra.mxu0 %v6945_v21  ;;  %v7008_v21 = vld [vmem:[#allocation6 + $0x330] ss:$36 sps:$4 sm:$0xff]  }
 0x260   :  { %4182 = vmatpush1.bf16.msra.mxu1 %v6948_v22  ;;  %4123 = vmatprep.subr.bf16.mxu0 %v6953_v23  ;;  %v7013_v22 = vld [vmem:[#allocation6 + $0x8d4] ss:$36 sps:$4 sm:$0xff]   ;;  %v7016_v23 = vld [vmem:[#allocation6 + $0x2ec] ss:$36 sps:$4 sm:$0xff]  }
 0x261   :  { %4183 = vmatprep.subr.bf16.mxu1 %v6956_v24  ;;  %v7011_v24 = vld [vmem:[#allocation6 + $0x8d0] ss:$36 sps:$4 sm:$0xff]  }
 0x262   :  { %v3801_v35 = vpop.f32.mrf.mxu0 }
 0x263   :  { %v3802_v36 = vadd.f32 %v3801_v35, %v7602_v32  ;;  %4124 = vmatpush2.bf16.msra.mxu0 %v6951_v25  ;;  %v7014_v25 = vld [vmem:[#allocation6 + $0x2e8] ss:$36 sps:$4 sm:$0xff]   ;;  %v7020_v35 = vld [vmem:[#allocation6 + $0x2a0] ss:$36 sps:$4 sm:$0xff]  }
 0x264   :  { %4184 = vmatpush1.bf16.msra.mxu1 %v6954_v26  ;;  %v3803_v38 = vpop.f32.mrf.mxu0  ;;  %4125 = vmatprep.subr.bf16.mxu0 %v6959_v27  ;;  %v7019_v26 = vld [vmem:[#allocation6 + $0x88c] ss:$36 sps:$4 sm:$0xff]   ;;  %v7022_v27 = vld [vmem:[#allocation6 + $0x2a4] ss:$36 sps:$4 sm:$0xff]  }
 0x265   :  { %v7614_v41 = vadd.f32 %v3842_v4, %v3802_v36  ;;  %v3804_v42 = vadd.f32 %v3803_v38, %v7604_v33  ;;  %4185 = vmatprep.subr.bf16.mxu1 %v6962_v28  ;;  %v6969_v33 = vld [vmem:[#allocation6 + $0x648] ss:$36 sps:$4 sm:$0xff]  }
 0x266   :  { %v3805_v45 = vpop.f32.mrf.mxu0  ;;  %v6992_v4 = vld [vmem:[#allocation6 + $0x40c] ss:$36 sps:$4 sm:$0xff]   ;;  %v7025_v36 = vld [vmem:[#allocation6 + $0x844] ss:$36 sps:$4 sm:$0xff]  }
 0x267   :  { %v7617_v46 = vadd.f32 %v3844_v7, %v3804_v42  ;;  %4126 = vmatpush2.bf16.msra.mxu0 %v6957_v37  ;;  %v6995_v7 = vld [vmem:[#allocation6 + $0x52c] ss:$36 sps:$4 sm:$0xff]   ;;  %v7028_v37 = vld [vmem:[#allocation6 + $0x25c] ss:$36 sps:$4 sm:$0xff]   ;;  %v7034_v45 = vld [vmem:[#allocation6 + $0xb14] ss:$36 sps:$4 sm:$0xff]  }
 0x268   :  { %4186 = vmatpush1.bf16.msra.mxu1 %v6960_v39  ;;  %v3806_v32 = vpop.f32.mrf.mxu0  ;;  %4218 = vmatprep.subr.bf16.mxu0 %v6965_v40  ;;  %v7017_v28 = vld [vmem:[#allocation6 + $0x888] ss:$36 sps:$4 sm:$0xff]   ;;  %v7023_v39 = vld [vmem:[#allocation6 + $0x840] ss:$36 sps:$4 sm:$0xff]   ;;  %v7026_v40 = vld [vmem:[#allocation6 + $0x258] ss:$36 sps:$4 sm:$0xff]  }
 0x269   :  { %4187 = vmatprep.subr.bf16.mxu1 %v6968_v44  ;;  %v7031_v42 = vld [vmem:[#allocation6 + $0x7fc] ss:$36 sps:$4 sm:$0xff]  }
 0x26a   :  { %4128 = vmatmul.mubr.bf16.vlgmr.msra.gmra.mxu0 %v7581_v8  ;;  %v7029_v32 = vld [vmem:[#allocation6 + $0x7f8] ss:$36 sps:$4 sm:$0xff]  }
 0x26b   :  { %4219 = vmatpush1.bf16.msra.mxu0 %v6963_v49  ;;  %4250 = vmatprep.mubr.bf16.mxu0 %v7552_v61 }
 0x26c   :  { %4188 = vmatpush1.bf16.msra.mxu1 %v6966_v51  ;;  %4220 = vmatprep.subr.bf16.mxu0 %v6971_v52  ;;  %v7032_v51 = vld [vmem:[#allocation6 + $0xb10] ss:$36 sps:$4 sm:$0xff]  }
 0x26d   :  { %4189 = vmatprep.subr.bf16.mxu1 %v6974_v53  ;;  %v7037_v53 = vld [vmem:[#allocation6 + $0x7b4] ss:$36 sps:$4 sm:$0xff]  }
 0x26f   :  { %4221 = vmatpush1.bf16.msra.mxu0 %v6969_v33  ;;  %v7040_v33 = vld [vmem:[#allocation6 + $0xacc] ss:$36 sps:$4 sm:$0xff]  }
 0x270   :  { %4190 = vmatpush1.bf16.msra.mxu1 %v6972_v56  ;;  %4222 = vmatprep.subr.bf16.mxu0 %v6977_v57  ;;  %v7035_v56 = vld [vmem:[#allocation6 + $0x7b0] ss:$36 sps:$4 sm:$0xff]   ;;  %v7038_v57 = vld [vmem:[#allocation6 + $0xac8] ss:$36 sps:$4 sm:$0xff]  }
 0x271   :  { %4191 = vmatprep.subr.bf16.mxu1 %v6980_v58  ;;  %v7043_v58 = vld [vmem:[#allocation6 + $0x76c] ss:$36 sps:$4 sm:$0xff]  }
 0x273   :  { %4223 = vmatpush1.bf16.msra.mxu0 %v6975_v59  ;;  %v7046_v59 = vld [vmem:[#allocation6 + $0xa84] ss:$36 sps:$4 sm:$0xff]  }
 0x274   :  { %4192 = vmatpush1.bf16.msra.mxu1 %v6978_v63  ;;  %4224 = vmatprep.subr.bf16.mxu0 %v6983_v0  ;;  %v7041_v63 = vld [vmem:[#allocation6 + $0x768] ss:$36 sps:$4 sm:$0xff]   ;;  %v7044_v0 = vld [vmem:[#allocation6 + $0xa80] ss:$36 sps:$4 sm:$0xff]  }
 0x275   :  { %4193 = vmatprep.subr.bf16.mxu1 %v6986_v1  ;;  %v7049_v1 = vld [vmem:[#allocation6 + $0x724] ss:$36 sps:$4 sm:$0xff]  }
 0x277   :  { %4225 = vmatpush1.bf16.msra.mxu0 %v6981_v2  ;;  %v1393_v2 = vrot.slane %v7594_v48, %v250_v31  ;;  %v7053_v31 = vld [vmem:[#allocation6 + $0x6d8] ss:$36 sps:$4 sm:$0xff]  }
 0x278   :  { %4194 = vmatpush2.bf16.msra.mxu1 %v6984_v3  ;;  %4226 = vmatprep.subr.bf16.mxu0 %v6989_v30  ;;  %v7052_v3 = vld [vmem:[#allocation6 + $0xa3c] ss:$36 sps:$4 sm:$0xff]   ;;  %v1397_v30 = vrot.slane %v7594_v48, %v254_v34 }
 0x279   :  { %4195 = vmatprep.subr.bf16.mxu1 %v6992_v4  ;;  %v7047_v4 = vld [vmem:[#allocation6 + $0x720] ss:$36 sps:$4 sm:$0xff]  }
 0x27a   :  { %v7064_v34 = vld [vmem:[#allocation6 + $0xd9c] ss:$36 sps:$4 sm:$0xff]  }
 0x27b   :  { %4227 = vmatpush1.bf16.msra.mxu0 %v6987_v5  ;;  %v7050_v5 = vld [vmem:[#allocation6 + $0xa38] ss:$36 sps:$4 sm:$0xff]  }
 0x27c   :  { %4196 = vmatpush2.bf16.msra.mxu1 %v6990_v6  ;;  %4228 = vmatprep.subr.bf16.mxu0 %v6995_v7  ;;  %v7055_v6 = vld [vmem:[#allocation6 + $0x6dc] ss:$36 sps:$4 sm:$0xff]  }
 0x27d   :  { %4197 = vmatprep.subr.bf16.mxu1 %v6998_v9  ;;  %v7058_v9 = vld [vmem:[#allocation6 + $0x9f4] ss:$36 sps:$4 sm:$0xff]  }
 0x27f   :  { %4229 = vmatpush1.bf16.msra.mxu0 %v6993_v10 }
 0x280   :  { %4198 = vmatpush2.bf16.msra.mxu1 %v6996_v11  ;;  %4230 = vmatprep.subr.bf16.mxu0 %v7001_v12 }
 0x281   :  { %4199 = vmatprep.subr.bf16.mxu1 %v7004_v13 }
 0x283   :  { %4231 = vmatpush1.bf16.msra.mxu0 %v6999_v14  ;;  %v7056_v14 = vld [vmem:[#allocation6 + $0x9f0] ss:$36 sps:$4 sm:$0xff]  }
 0x284   :  { %4200 = vmatpush2.bf16.msra.mxu1 %v7002_v15  ;;  %4232 = vmatprep.subr.bf16.mxu0 %v7007_v17  ;;  %v7061_v15 = vld [vmem:[#allocation6 + $0x9ac] ss:$36 sps:$4 sm:$0xff]  }
 0x285   :  { %4201 = vmatprep.subr.bf16.mxu1 %v7010_v19  ;;  %v7062_v19 = vld [vmem:[#allocation6 + $0xd98] ss:$36 sps:$4 sm:$0xff]  }
 0x287   :  { %4233 = vmatpush1.bf16.msra.mxu0 %v7005_v20 }
 0x288   :  { %4202 = vmatpush2.bf16.msra.mxu1 %v7008_v21  ;;  %4234 = vmatprep.subr.bf16.mxu0 %v7013_v22  ;;  %v7059_v21 = vld [vmem:[#allocation6 + $0x9a8] ss:$36 sps:$4 sm:$0xff]   ;;  %v7068_v22 = vld [vmem:[#allocation6 + $0x458] ss:$36 sps:$4 sm:$0xff]  }
 0x289   :  { %4203 = vmatprep.subr.bf16.mxu1 %v7016_v23  ;;  %v7067_v23 = vld [vmem:[#allocation6 + $0x964] ss:$36 sps:$4 sm:$0xff]  }
 0x28b   :  { %4235 = vmatpush2.bf16.msra.mxu0 %v7011_v24 }
 0x28c   :  { %4204 = vmatpush2.bf16.msra.mxu1 %v7014_v25  ;;  %4236 = vmatprep.subr.bf16.mxu0 %v7019_v26  ;;  %v7065_v26 = vld [vmem:[#allocation6 + $0x960] ss:$36 sps:$4 sm:$0xff]  }
 0x28d   :  { %4205 = vmatprep.subr.bf16.mxu1 %v7022_v27  ;;  %v7072_v27 = vld [vmem:[#allocation6 + $0x91c] ss:$36 sps:$4 sm:$0xff]  }
 0x28f   :  { %4237 = vmatpush2.bf16.msra.mxu0 %v7017_v28  ;;  %v3883_v38 = vpop.f32.mrf.mxu1 }
 0x290   :  { %4206 = vmatpush2.bf16.msra.mxu1 %v7020_v35  ;;  %4238 = vmatprep.subr.bf16.mxu0 %v7025_v36  ;;  %v3884_v7 = vadd.f32 %v3883_v38, %v1393_v2  ;;  %v7069_v35 = vld [vmem:[#allocation6 + $0x218] ss:$36 sps:$4 sm:$0xff]   ;;  %v7073_v38 = vld [vmem:[#allocation6 + $0x410] ss:$36 sps:$4 sm:$0xff]  }
 0x291   :  { %v3885_v44 = vpop.f32.mrf.mxu1  ;;  %4207 = vmatprep.subr.bf16.mxu1 %v7028_v37  ;;  %v7070_v37 = vld [vmem:[#allocation6 + $0x918] ss:$36 sps:$4 sm:$0xff]   ;;  %v7102_v2 = vld [vmem:[#allocation6 + $0xbec] ss:$36 sps:$4 sm:$0xff]  }
 0x292   :  { %v3886_v11 = vadd.f32 %v3885_v44, %v1397_v30  ;;  %v7082_v44 = vld [vmem:[#allocation6 + $0xd0c] ss:$36 sps:$4 sm:$0xff]  }
 0x293   :  { %4239 = vmatpush2.bf16.msra.mxu0 %v7023_v39  ;;  %v3887_v49 = vpop.f32.mrf.mxu1  ;;  %v7077_v39 = vld [vmem:[#allocation6 + $0xd54] ss:$36 sps:$4 sm:$0xff]   ;;  %v7100_v30 = vld [vmem:[#allocation6 + $0xbe8] ss:$36 sps:$4 sm:$0xff]  }
 0x294   :  { %4208 = vmatpush2.bf16.msra.mxu1 %v7026_v40  ;;  %4240 = vmatprep.subr.bf16.mxu0 %v7031_v42  ;;  %v7075_v40 = vld [vmem:[#allocation6 + $0xd50] ss:$36 sps:$4 sm:$0xff]   ;;  %v7078_v42 = vld [vmem:[#allocation6 + $0x3c8] ss:$36 sps:$4 sm:$0xff]  }
 0x295   :  { %v3888_v52 = vpop.f32.mrf.mxu1  ;;  %4259 = vmatprep.subr.bf16.mxu1 %v7034_v45  ;;  %v7079_v45 = vld [vmem:[#allocation6 + $0x188] ss:$36 sps:$4 sm:$0xff]  }
 0x296   :  { %v7080_v49 = vld [vmem:[#allocation6 + $0xd08] ss:$36 sps:$4 sm:$0xff]   ;;  %v7084_v52 = vld [vmem:[#allocation6 + $0x140] ss:$36 sps:$4 sm:$0xff]  }
 0x297   :  { %4210 = vmatmul.mubr.bf16.vlgmr.msra.gmra.mxu1 %v7548_v54  ;;  %4241 = vmatpush2.bf16.msra.mxu0 %v7029_v32  ;;  %v7083_v32 = vld [vmem:[#allocation6 + $0x380] ss:$36 sps:$4 sm:$0xff]  }
 0x298   :  { %4260 = vmatpush1.bf16.msra.mxu1 %v7032_v51  ;;  %4291 = vmatprep.mubr.bf16.mxu1 %v7574_v50  ;;  %v7087_v51 = vld [vmem:[#allocation6 + $0xcc4] ss:$36 sps:$4 sm:$0xff]  }
 0x299   :  { %4242 = vmatprep.subr.bf16.mxu0 %v7037_v53  ;;  %4261 = vmatprep.subr.bf16.mxu1 %v7040_v33  ;;  %v7088_v53 = vld [vmem:[#allocation6 + $0x338] ss:$36 sps:$4 sm:$0xff]  }
 0x29a   :  { %v7092_v33 = vld [vmem:[#allocation6 + $0xc7c] ss:$36 sps:$4 sm:$0xff]  }
 0x29b   :  { %4243 = vmatpush2.bf16.msra.mxu0 %v7035_v56  ;;  %v7089_v56 = vld [vmem:[#allocation6 + $0xf8] ss:$36 sps:$4 sm:$0xff]  }
 0x29c   :  { %4262 = vmatpush1.bf16.msra.mxu1 %v7038_v57  ;;  %4244 = vmatprep.subr.bf16.mxu0 %v7043_v58  ;;  %v7090_v57 = vld [vmem:[#allocation6 + $0xc78] ss:$36 sps:$4 sm:$0xff]   ;;  %v7093_v58 = vld [vmem:[#allocation6 + $0x2f0] ss:$36 sps:$4 sm:$0xff]  }
 0x29d   :  { %4263 = vmatprep.subr.bf16.mxu1 %v7046_v59  ;;  %v7097_v59 = vld [vmem:[#allocation6 + $0xc34] ss:$36 sps:$4 sm:$0xff]  }
 0x29f   :  { %4245 = vmatpush2.bf16.msra.mxu0 %v7041_v63  ;;  %v7094_v63 = vld [vmem:[#allocation6 + $0xb0] ss:$36 sps:$4 sm:$0xff]  }
 0x2a0   :  { %4264 = vmatpush1.bf16.msra.mxu1 %v7044_v0  ;;  %4246 = vmatprep.subr.bf16.mxu0 %v7049_v1  ;;  %v7095_v0 = vld [vmem:[#allocation6 + $0xc30] ss:$36 sps:$4 sm:$0xff]   ;;  %v7098_v1 = vld [vmem:[#allocation6 + $0x2a8] ss:$36 sps:$4 sm:$0xff]  }
 0x2a1   :  { %4265 = vmatprep.subr.bf16.mxu1 %v7052_v3  ;;  %v7099_v3 = vld [vmem:[#allocation6 + $0x68] ss:$36 sps:$4 sm:$0xff]  }
 0x2a2   :  { %v3924_v10 = vpop.f32.mrf.mxu0 }
 0x2a3   :  { %v7629_v12 = vadd.f32 %v3924_v10, %v3884_v7  ;;  %4247 = vmatpush2.bf16.msra.mxu0 %v7047_v4  ;;  %v7103_v4 = vld [vmem:[#allocation6 + $0x260] ss:$36 sps:$4 sm:$0xff]  }
 0x2a4   :  { %4266 = vmatpush1.bf16.msra.mxu1 %v7050_v5  ;;  %v3926_v13 = vpop.f32.mrf.mxu0  ;;  %4248 = vmatprep.subr.bf16.mxu0 %v7055_v6  ;;  %v7107_v5 = vld [vmem:[#allocation6 + $0xba4] ss:$36 sps:$4 sm:$0xff]   ;;  %v7112_v10 = vld [vmem:[#allocation6 + $0xb5c] ss:$36 sps:$4 sm:$0xff]  }
 0x2a5   :  { %v7631_v48 = vadd.f32 %v3926_v13, %v3886_v11  ;;  %4267 = vmatprep.subr.bf16.mxu1 %v7058_v9  ;;  %v7104_v6 = vld [vmem:[#allocation6 + $0x20] ss:$36 sps:$4 sm:$0xff]   ;;  %v7108_v9 = vld [vmem:[#allocation6 + $0xd58] ss:$36 sps:$4 sm:$0xff]  }
 0x2a6   :  { %v3928_v17 = vpop.f32.mrf.mxu0  ;;  %v7105_v7 = vld [vmem:[#allocation6 + $0xba0] ss:$36 sps:$4 sm:$0xff]  }
 0x2a7   :  { %4249 = vmatpush2.bf16.msra.mxu0 %v7053_v31  ;;  %v7109_v31 = vld [vmem:[#allocation6 + $0xb18] ss:$36 sps:$4 sm:$0xff]  }
 0x2a8   :  { %4268 = vmatpush1.bf16.msra.mxu1 %v7056_v14  ;;  %v3929_v20 = vpop.f32.mrf.mxu0  ;;  %4314 = vmatprep.subr.bf16.mxu0 %v7064_v34  ;;  %v7110_v14 = vld [vmem:[#allocation6 + $0xb58] ss:$36 sps:$4 sm:$0xff]   ;;  %v7113_v34 = vld [vmem:[#allocation6 + $0xd10] ss:$36 sps:$4 sm:$0xff]  }
 0x2a9   :  { %4269 = vmatprep.subr.bf16.mxu1 %v7061_v15  ;;  %v7115_v17 = vld [vmem:[#allocation6 + $0x8d8] ss:$36 sps:$4 sm:$0xff]  }
 0x2aa   :  { %4251 = vmatmul.mubr.bf16.vlgmr.msra.gmra.mxu0 %v7554_v62  ;;  %v7634_v24 = vpop.f32.mrf.mxu0 }
 0x2ab   :  { %4315 = vmatpush1.bf16.msra.mxu0 %v7062_v19  ;;  %4332 = vmatprep.mubr.bf16.mxu0 %v7413_v55  ;;  %v7074_v55 = vld [vmem:[#allocation6 + $0x1d0] ss:$36 sps:$4 sm:$0xff]  }
 0x2ac   :  { %4270 = vmatpush1.bf16.msra.mxu1 %v7059_v21  ;;  %v7637_v25 = vpop.f32.mrf.mxu0  ;;  %6133 = vmatprep.subr.bf16.mxu0 %v7068_v22  ;;  %v7114_v22 = vld [vmem:[#allocation6 + $0xad0] ss:$36 sps:$4 sm:$0xff]  }
 0x2ad   :  { %4271 = vmatprep.subr.bf16.mxu1 %v7067_v23  ;;  %v7116_v23 = vld [vmem:[#allocation6 + $0x698] ss:$36 sps:$4 sm:$0xff]  }
 0x2ae   :  { %v4010_v28 = vpop.f32.mrf.mxu0 }
 0x2af   :  { %v7122_v28 = vld [vmem:[#allocation6 + $0xa40] ss:$36 sps:$4 sm:$0xff]  }
 0x2b0   :  { %4272 = vmatpush1.bf16.msra.mxu1 %v7065_v26  ;;  %v4011_v36 = vpop.f32.mrf.mxu0 }
 0x2b1   :  { %4273 = vmatprep.subr.bf16.mxu1 %v7072_v27  ;;  %v7117_v27 = vld [vmem:[#allocation6 + $0xcc8] ss:$36 sps:$4 sm:$0xff]   ;;  %v7125_v36 = vld [vmem:[#allocation6 + $0xc38] ss:$36 sps:$4 sm:$0xff]  }
 0x2b2   :  { %6043 = vmatmul.mubr.msk.bf16.vlgmr.msra.gmra.mxu0 %vm3681_vm1, %v7569_v43 }
 0x2b3   :  { %6134 = vmatpush3.bf16.msra.mxu0 %v7069_v35  ;;  %4373 = vmatprep.mubr.bf16.mxu0 %v7550_v60  ;;  %v7085_v60 = vld [vmem:[#allocation6 + $0xcc0] ss:$36 sps:$4 sm:$0xff]   ;;  %v7124_v35 = vld [vmem:[#allocation6 + $0x608] ss:$36 sps:$4 sm:$0xff]  }
 0x2b4   :  { %4274 = vmatpush1.bf16.msra.mxu1 %v7070_v37  ;;  %6135 = vmatprep.subr.bf16.mxu0 %v7073_v38  ;;  %v7127_v37 = vld [vmem:[#allocation6 + $0x800] ss:$36 sps:$4 sm:$0xff]   ;;  %v7126_v38 = vld [vmem:[#allocation6 + $0x9f8] ss:$36 sps:$4 sm:$0xff]  }
 0x2b5   :  { %4275 = vmatprep.subr.bf16.mxu1 %v7077_v39  ;;  %v7128_v39 = vld [vmem:[#allocation6 + $0x5c0] ss:$36 sps:$4 sm:$0xff]  }
 0x2b7   :  { %6136 = vmatpush3.bf16.msra.mxu0 %v7074_v55  ;;  %v7129_v55 = vld [vmem:[#allocation6 + $0xbf0] ss:$36 sps:$4 sm:$0xff]  }
 0x2b8   :  { %4276 = vmatpush2.bf16.msra.mxu1 %v7075_v40  ;;  %6137 = vmatprep.subr.bf16.mxu0 %v7078_v42  ;;  %v7130_v40 = vld [vmem:[#allocation6 + $0x9b0] ss:$36 sps:$4 sm:$0xff]   ;;  %v7132_v42 = vld [vmem:[#allocation6 + $0x578] ss:$36 sps:$4 sm:$0xff]  }
 0x2b9   :  { %4277 = vmatprep.subr.bf16.mxu1 %v7082_v44  ;;  %v7133_v44 = vld [vmem:[#allocation6 + $0xba8] ss:$36 sps:$4 sm:$0xff]  }
 0x2bb   :  { %6138 = vmatpush3.bf16.msra.mxu0 %v7079_v45  ;;  %v7135_v45 = vld [vmem:[#allocation6 + $0x770] ss:$36 sps:$4 sm:$0xff]  }
 0x2bc   :  { %4278 = vmatpush2.bf16.msra.mxu1 %v7080_v49  ;;  %6139 = vmatprep.subr.bf16.mxu0 %v7083_v32  ;;  %v7134_v49 = vld [vmem:[#allocation6 + $0x968] ss:$36 sps:$4 sm:$0xff]   ;;  %v7136_v32 = vld [vmem:[#allocation6 + $0x530] ss:$36 sps:$4 sm:$0xff]  }
 0x2bd   :  { %4279 = vmatprep.subr.bf16.mxu1 %v7087_v51  ;;  %v7137_v51 = vld [vmem:[#allocation6 + $0xb60] ss:$36 sps:$4 sm:$0xff]  }
 0x2bf   :  { %6140 = vmatpush3.bf16.msra.mxu0 %v7084_v52  ;;  %v7139_v52 = vld [vmem:[#allocation6 + $0x728] ss:$36 sps:$4 sm:$0xff]  }
 0x2c0   :  { %4280 = vmatpush2.bf16.msra.mxu1 %v7085_v60  ;;  %6141 = vmatprep.subr.bf16.mxu0 %v7088_v53  ;;  %v7138_v53 = vld [vmem:[#allocation6 + $0x920] ss:$36 sps:$4 sm:$0xff]  }
 0x2c1   :  { %4281 = vmatprep.subr.bf16.mxu1 %v7092_v33 }
 0x2c3   :  { %6142 = vmatpush3.bf16.msra.mxu0 %v7089_v56  ;;  %v7140_v56 = vld [vmem:[#allocation6 + $0x4e8] ss:$36 sps:$4 sm:$0xff]  }
 0x2c4   :  { %4282 = vmatpush2.bf16.msra.mxu1 %v7090_v57  ;;  %6143 = vmatprep.subr.bf16.mxu0 %v7093_v58  ;;  %v7141_v57 = vld [vmem:[#allocation9 + $0xf8] sm:$0xff]  }
 0x2c5   :  { %4283 = vmatprep.subr.bf16.mxu1 %v7097_v59  ;;  %v7143_v59 = vld [vmem:[#allocation6 + $0x6e0] ss:$36 sps:$4 sm:$0xff]  }
 0x2c7   :  { %6144 = vmatpush3.bf16.msra.mxu0 %v7094_v63 }
 0x2c8   :  { %4284 = vmatpush2.bf16.msra.mxu1 %v7095_v0  ;;  %6145 = vmatprep.subr.bf16.mxu0 %v7098_v1  ;;  %v7142_v0 = vld [vmem:[#allocation9 + $0xb8] sm:$0xff]  }
 0x2c9   :  { %4285 = vmatprep.subr.bf16.mxu1 %v7102_v2  ;;  %v7144_v2 = vld [vmem:[#allocation6 + $0x4a0] ss:$36 sps:$4 sm:$0xff]  }
 0x2cb   :  { %6146 = vmatpush3.bf16.msra.mxu0 %v7099_v3  ;;  %v7145_v3 = vld [vmem:[#allocation9 + $0xf0] sm:$0xff]  }
 0x2cc   :  { %4286 = vmatpush2.bf16.msra.mxu1 %v7100_v30  ;;  %6147 = vmatprep.subr.bf16.mxu0 %v7103_v4  ;;  %v7146_v4 = vld [vmem:[#allocation9 + $0xb0] sm:$0xff]  }
 0x2cd   :  { %4287 = vmatprep.subr.bf16.mxu1 %v7107_v5  ;;  %v7147_v5 = vld [vmem:[#allocation6 + $0xda0] ss:$36 sps:$4 sm:$0xff]  }
 0x2cf   :  { %6148 = vmatpush3.bf16.msra.mxu0 %v7104_v6  ;;  %v3965_v11 = vpop.f32.mrf.mxu1  ;;  %v7148_v6 = vld [vmem:[#allocation9 + $0xe8] sm:$0xff]  }
 0x2d0   :  { %v3966_v13 = vadd.f32 %v3965_v11, %v7629_v12  ;;  %4288 = vmatpush2.bf16.msra.mxu1 %v7105_v7  ;;  %6177 = vmatprep.subr.bf16.mxu0 %v7108_v9  ;;  %v7414_v7 = vmov 0.0   ;;  %v7151_v9 = vld [vmem:[#allocation9 + $0x78] sm:$0xff]   ;;  %v7150_v11 = vld [vmem:[#allocation9 + $0xe0] sm:$0xff]  }
 0x2d1   :  { %v3967_v15 = vpop.f32.mrf.mxu1  ;;  %4289 = vmatprep.subr.bf16.mxu1 %v7112_v10  ;;  %v7149_v10 = vld [vmem:[#allocation9 + $0xa8] sm:$0xff]  }
 0x2d2   :  { %v7644_v19 = vadd.f32 %v7634_v24, %v3966_v13  ;;  %4374 = vmatmul.mubr.bf16.vlgmr.msra.gmra.mxu0 %v7548_v54  ;;  %v3968_v20 = vadd.f32 %v3967_v15, %v7631_v48  ;;  %v7119_v24 = vld [vmem:[#allocation6 + $0x890] ss:$36 sps:$4 sm:$0xff]   ;;  %v7118_v54 = vld [vmem:[#allocation6 + $0xa88] ss:$36 sps:$4 sm:$0xff]   ;;  %v7121_v48 = vld [vmem:[#allocation6 + $0xc80] ss:$36 sps:$4 sm:$0xff]  }
 0x2d3   :  { %6178 = vmatpush3.bf16.msra.mxu0 %v7109_v31  ;;  %4453 = vmatprep.mubr.bf16.mxu0 %v7574_v50  ;;  %v3969_v21 = vpop.f32.mrf.mxu1  ;;  %v7120_v50 = vld [vmem:[#allocation6 + $0x650] ss:$36 sps:$4 sm:$0xff]  }
 0x2d4   :  { %v7650_v12 = vadd.f32 %v7637_v25, %v3968_v20  ;;  %4290 = vmatpush2.bf16.msra.mxu1 %v7110_v14  ;;  %6179 = vmatprep.subr.bf16.mxu0 %v7113_v34  ;;  %v7123_v25 = vld [vmem:[#allocation6 + $0x848] ss:$36 sps:$4 sm:$0xff]   ;;  %v7152_v31 = vld [vmem:[#allocation9 + $0xa0] sm:$0xff]   ;;  %v7159_v21 = vld [vmem:[#allocation9 + $0x68] sm:$0xff]  }
 0x2d5   :  { %v3970_v26 = vpop.f32.mrf.mxu1  ;;  %6155 = vmatprep.subr.bf16.mxu1 %v7115_v17  ;;  %v7153_v13 = vld [vmem:[#allocation9 + $0x38] sm:$0xff]   ;;  %v7155_v34 = vld [vmem:[#allocation9 + $0x70] sm:$0xff]  }
 0x2d6   :  { %v4504_v58 = vmax.f32 %v7650_v12, 0.0  ;;  %v7154_v14 = vld [vmem:[#allocation9 + $0xd8] sm:$0xff]   ;;  %v7157_v17 = vld [vmem:[#allocation9 + $0x30] sm:$0xff]   ;;  %v7162_v12 = vld [vmem:[#allocation9 + $0xc8] sm:$0xff]  }
 0x2d7   :  { %6180 = vmatpush3.bf16.msra.mxu0 %v7114_v22  ;;  %4292 = vmatmul.mubr.bf16.vlgmr.msra.gmra.mxu1 %v7581_v8  ;;  %v7158_v20 = vld [vmem:[#allocation9 + $0xd0] sm:$0xff]   ;;  %v7161_v22 = vld [vmem:[#allocation9 + $0x28] sm:$0xff]  }
 0x2d8   :  { %6156 = vmatpush3.bf16.msra.mxu1 %v7116_v23  ;;  %4413 = vmatprep.mubr.bf16.mxu1 %v7552_v61  ;;  %v7131_v61 = vld [vmem:[#allocation6 + $0x7b8] ss:$36 sps:$4 sm:$0xff]   ;;  %v4513_v30 = vpack.c.bf16 %v4504_v58, %v4504_v58  ;;  %v7176_v58 = vld [vmem:[#allocation9 + $0x178] sm:$0xff]  }
 0x2d9   :  { %6181 = vmatprep.subr.bf16.mxu0 %v7117_v27  ;;  %6157 = vmatprep.subr.bf16.mxu1 %v7119_v24  ;;  %v7163_v23 = vld [vmem:[#allocation9 + $0x60] sm:$0xff]   ;;  %v7164_v26 = vld [vmem:[#allocation9 + $0x88] sm:$0xff]   ;;  %v7167_v24 = vld [vmem:[#allocation9 + $0x58] sm:$0xff]  }
 0x2da   :  { %v7166_v27 = vld [vmem:[#allocation9 + $0xc0] sm:$0xff]  }
 0x2db   :  { %6182 = vmatpush3.bf16.msra.mxu0 %v7118_v54  ;;  %v7168_v54 = vld [vmem:[#allocation9 + $0x80] sm:$0xff]  }
 0x2dc   :  { %6158 = vmatpush3.bf16.msra.mxu1 %v7120_v50  ;;  %6183 = vmatprep.subr.bf16.mxu0 %v7121_v48  ;;  %v4503_v50 = vmax.f32 %v7644_v19, 0.0  ;;  %v7169_v48 = vld [vmem:[#allocation9 + $0x18] sm:$0xff]  }
 0x2dd   :  { %6159 = vmatprep.subr.bf16.mxu1 %v7123_v25  ;;  %v7192_v25 = vld [vmem:[#allocation9 + $0x1f8] sm:$0xff]  }
 0x2df   :  { %6184 = vmatpush3.bf16.msra.mxu0 %v7122_v28  ;;  %v7170_v28 = vld [vmem:[#allocation9 + $0x50] sm:$0xff]  }
 0x2e0   :  { %6160 = vmatpush3.bf16.msra.mxu1 %v7124_v35  ;;  %6185 = vmatprep.subr.bf16.mxu0 %v7125_v36  ;;  %v7193_v36 = vld [vmem:[#allocation9 + $0x1b8] sm:$0xff]  }
 0x2e1   :  { %6161 = vmatprep.subr.bf16.mxu1 %v7127_v37  ;;  %v4512_v37 = vpack.c.bf16 %v4503_v50, %v4503_v50 }
 0x2e3   :  { %6186 = vmatpush3.bf16.msra.mxu0 %v7126_v38  ;;  %v7171_v38 = vld [vmem:[#allocation9 + $0x10] sm:$0xff]  }
 0x2e4   :  { %6162 = vmatpush3.bf16.msra.mxu1 %v7128_v39  ;;  %6187 = vmatprep.subr.bf16.mxu0 %v7129_v55  ;;  %v7194_v39 = vld [vmem:[#allocation9 + $0x1f0] sm:$0xff]  }
 0x2e5   :  { %6163 = vmatprep.subr.bf16.mxu1 %v7131_v61  ;;  %v7172_v61 = vld [vmem:[#allocation9 + $0x48] sm:$0xff]  }
 0x2e7   :  { %6188 = vmatpush3.bf16.msra.mxu0 %v7130_v40  ;;  %v7195_v40 = vld [vmem:[#allocation9 + $0x1b0] sm:$0xff]  }
 0x2e8   :  { %6164 = vmatpush3.bf16.msra.mxu1 %v7132_v42  ;;  %6189 = vmatprep.subr.bf16.mxu0 %v7133_v44  ;;  %v7173_v42 = vld [vmem:[#allocation9 + $0x8] sm:$0xff]  }
 0x2e9   :  { %6165 = vmatprep.subr.bf16.mxu1 %v7135_v45  ;;  %v7196_v44 = vld [vmem:[#allocation9 + $0x1e8] sm:$0xff]  }
 0x2ea   :  { %v7654_v60 = vpop.f32.mrf.mxu0 }
 0x2eb   :  { %6190 = vmatpush3.bf16.msra.mxu0 %v7134_v49  ;;  %v7174_v49 = vld [vmem:[#allocation9 + $0x40] sm:$0xff]  }
 0x2ec   :  { %v7656_v33 = vpop.f32.mrf.mxu0  ;;  %6166 = vmatpush3.bf16.msra.mxu1 %v7136_v32  ;;  %6191 = vmatprep.subr.bf16.mxu0 %v7137_v51  ;;  %v7197_v51 = vld [vmem:[#allocation9 + $0x1a8] sm:$0xff]  }
 0x2ed   :  { %6167 = vmatprep.subr.bf16.mxu1 %v7139_v52  ;;  %v7175_v52 = vld [vmem:[#allocation9] sm:$0xff]  }
 0x2ee   :  { %v4051_v63 = vpop.f32.mrf.mxu0 }
 0x2ef   :  { %6192 = vmatpush3.bf16.msra.mxu0 %v7138_v53  ;;  %v7198_v53 = vld [vmem:[#allocation9 + $0x1e0] sm:$0xff]  }
 0x2f0   :  { %v4052_v1 = vpop.f32.mrf.mxu0  ;;  %6168 = vmatpush3.bf16.msra.mxu1 %v7140_v56  ;;  %6223 = vmatprep.subr.bf16.mxu0 %v7141_v57  ;;  %v4501_v56 = vmax.f32 %v7614_v41, 0.0  ;;  %v7199_v63 = vld [vmem:[#allocation9 + $0x1a0] sm:$0xff]   ;;  %v7202_v41 = vld [vmem:[#allocation9 + $0x1d0] sm:$0xff]  }
 0x2f1   :  { %6169 = vmatprep.subr.bf16.mxu1 %v7143_v59  ;;  %v7200_v1 = vld [vmem:[#allocation9 + $0x1d8] sm:$0xff]  }
 0x2f2   :  { %4454 = vmatmul.mubr.bf16.vlgmr.msra.gmra.mxu0 %v7581_v8  ;;  %v4502_v8 = vmax.f32 %v7617_v46, 0.0  ;;  %v7160_v46 = vld [vmem:[#allocation9 + $0x90] sm:$0xff]  }
 0x2f3   :  { %6224 = vmatpush3.bf16.msra.mxu0 %v7142_v0  ;;  %5174 = vmatprep.mubr.bf16.mxu0 %v4513_v30  ;;  %v7177_v0 = vld [vmem:[#allocation9 + $0x138] sm:$0xff]   ;;  %v7178_v30 = vld [vmem:[#allocation9 + $0x170] sm:$0xff]  }
 0x2f4   :  { %6170 = vmatpush3.bf16.msra.mxu1 %v7144_v2  ;;  %6225 = vmatprep.subr.bf16.mxu0 %v7145_v3  ;;  %v4511_v15 = vpack.c.bf16 %v4502_v8, %v4502_v8  ;;  %v4510_v2 = vpack.c.bf16 %v4501_v56, %v4501_v56  ;;  %v7675_v8 = vld [vmem:[#allocation7] sm:$0xff] }
 0x2f5   :  { %6312 = vmatprep.subr.bf16.mxu1 %v7414_v7 }
 0x2f7   :  { %6226 = vmatpush3.bf16.msra.mxu0 %v7146_v4  ;;  %4414 = vmatmul.mubr.bf16.vlgmr.msra.gmra.mxu1 %v7554_v62  ;;  %v7156_v62 = vld [vmem:[#allocation9 + $0x98] sm:$0xff]  }
 0x2f8   :  { %6313 = vmatpush3.bf16.msra.mxu1 %v7147_v5  ;;  %6227 = vmatprep.subr.bf16.mxu0 %v7148_v6  ;;  %v7201_v4 = vld [vmem:[#allocation9 + $0x198] sm:$0xff]   ;;  %v7179_v5 = vld [vmem:[#allocation9 + $0x130] sm:$0xff]   ;;  %v7180_v6 = vld [vmem:[#allocation9 + $0x168] sm:$0xff]  }
 0x2f9   :  { %6314 = vmatprep.mubr.msk.bf16.mxu1 %vm7415_vm2, %v7414_v7  ;;  %6201 = vmatprep.subr.bf16.mxu1 %v7151_v9  ;;  %v7203_v9 = vld [vmem:[#allocation9 + $0x190] sm:$0xff]  }
 0x2fb   :  { %6228 = vmatpush3.bf16.msra.mxu0 %v7149_v10  ;;  %v7181_v10 = vld [vmem:[#allocation9 + $0x128] sm:$0xff]  }
 0x2fc   :  { %6229 = vmatprep.subr.bf16.mxu0 %v7150_v11  ;;  %v7204_v11 = vld [vmem:[#allocation9 + $0x1c8] sm:$0xff]  }
 0x2ff   :  { %6230 = vmatpush3.bf16.msra.mxu0 %v7152_v31  ;;  %6315 = vmatmul.mubr.msk.bf16.vlgmr.msra.gmra.mxu1 %vm3681_vm1, %v7569_v43  ;;  %v7165_v43 = vld [vmem:[#allocation9 + $0x20] sm:$0xff]   ;;  %v1405_v31 = vrot.slane %v7675_v8, %v262_v18 }
 0x300   :  { %6202 = vmatpush3.bf16.msra.mxu1 %v7153_v13  ;;  %5134 = vmatprep.mubr.bf16.mxu1 %v4511_v15  ;;  %v7182_v13 = vld [vmem:[#allocation9 + $0x160] sm:$0xff]  }
 0x301   :  { %6231 = vmatprep.subr.bf16.mxu0 %v7154_v14  ;;  %6203 = vmatprep.subr.bf16.mxu1 %v7155_v34  ;;  %v7205_v14 = vld [vmem:[#allocation9 + $0x188] sm:$0xff]   ;;  %v7183_v34 = vld [vmem:[#allocation9 + $0x120] sm:$0xff]  }
 0x302   :  { %v7206_v15 = vld [vmem:[#allocation9 + $0x1c0] sm:$0xff]  }
 0x303   :  { %6232 = vmatpush3.bf16.msra.mxu0 %v7156_v62  ;;  %v1401_v62 = vrot.slane %v7675_v8, %v258_v47  ;;  %v7207_v18 = vld [vmem:[#allocation9 + $0x180] sm:$0xff]  }
 0x304   :  { %6204 = vmatpush3.bf16.msra.mxu1 %v7157_v17  ;;  %6233 = vmatprep.subr.bf16.mxu0 %v7158_v20  ;;  %v4050_v17 = vadd.f32 %v7656_v33, %v1405_v31  ;;  %v7184_v20 = vld [vmem:[#allocation9 + $0x158] sm:$0xff]  }
 0x305   :  { %6205 = vmatprep.subr.bf16.mxu1 %v7159_v21 }
 0x307   :  { %6234 = vmatpush3.bf16.msra.mxu0 %v7160_v46 }
 0x308   :  { %6206 = vmatpush3.bf16.msra.mxu1 %v7161_v22  ;;  %6235 = vmatprep.subr.bf16.mxu0 %v7162_v12  ;;  %v7185_v12 = vld [vmem:[#allocation9 + $0x118] sm:$0xff]  }
 0x309   :  { %6207 = vmatprep.subr.bf16.mxu1 %v7163_v23  ;;  %v4048_v23 = vadd.f32 %v7654_v60, %v1401_v62  ;;  %v7189_v60 = vld [vmem:[#allocation9 + $0x108] sm:$0xff]  }
 0x30b   :  { %6236 = vmatpush3.bf16.msra.mxu0 %v7164_v26 }
 0x30c   :  { %6208 = vmatpush3.bf16.msra.mxu1 %v7165_v43  ;;  %6237 = vmatprep.subr.bf16.mxu0 %v7166_v27  ;;  %v7186_v43 = vld [vmem:[#allocation9 + $0x150] sm:$0xff]  }
 0x30d   :  { %6209 = vmatprep.subr.bf16.mxu1 %v7167_v24 }
 0x30f   :  { %6238 = vmatpush3.bf16.msra.mxu0 %v7168_v54  ;;  %v7668_v35 = vpop.f32.mrf.mxu1  ;;  %v7187_v54 = vld [vmem:[#allocation9 + $0x110] sm:$0xff]  }
 0x310   :  { %6210 = vmatpush3.bf16.msra.mxu1 %v7169_v48  ;;  %6267 = vmatprep.subr.bf16.mxu0 %v7192_v25  ;;  %v4089_v47 = vadd.f32 %v7668_v35, %v4048_v23  ;;  %v7188_v25 = vld [vmem:[#allocation9 + $0x148] sm:$0xff]   ;;  %v7191_v35 = vld [vmem:[#allocation9 + $0x100] sm:$0xff]  }
 0x311   :  { %v7670_v55 = vpop.f32.mrf.mxu1  ;;  %6211 = vmatprep.subr.bf16.mxu1 %v7170_v28 }
 0x312   :  { %5175 = vmatmul.mubr.bf16.vlgmr.msra.gmra.mxu0 %v4512_v37  ;;  %v4091_v46 = vadd.f32 %v7670_v55, %v4050_v17  ;;  %v7190_v37 = vld [vmem:[#allocation9 + $0x140] sm:$0xff]  }
 0x313   :  { %v4092_v19 = vpop.f32.mrf.mxu1  ;;  %6268 = vmatpush3.bf16.msra.mxu0 %v7193_v36 }
 0x314   :  { %6212 = vmatpush3.bf16.msra.mxu1 %v7171_v38  ;;  %6269 = vmatprep.subr.bf16.mxu0 %v7194_v39  ;;  %v7208_v39 = vld [vmem:[#allocation9 + $0x238] sm:$0xff]   ;;  %v7210_v19 = vld [vmem:[#allocation9 + $0x228] sm:$0xff]  }
 0x315   :  { %v4093_v45 = vpop.f32.mrf.mxu1  ;;  %6213 = vmatprep.subr.bf16.mxu1 %v7172_v61  ;;  %v7209_v61 = vld [vmem:[#allocation9 + $0x230] sm:$0xff]  }
 0x316   :  { %v7214_v45 = vld [vmem:[#allocation9 + $0x208] sm:$0xff]  }
 0x317   :  { %v7672_v32 = vpop.f32.mrf.mxu1  ;;  %6270 = vmatpush3.bf16.msra.mxu0 %v7195_v40  ;;  %v7211_v40 = vld [vmem:[#allocation9 + $0x220] sm:$0xff]  }
 0x318   :  { %6214 = vmatpush3.bf16.msra.mxu1 %v7173_v42  ;;  %6271 = vmatprep.subr.bf16.mxu0 %v7196_v44  ;;  %v7212_v42 = vld [vmem:[#allocation9 + $0x218] sm:$0xff]   ;;  %v7213_v44 = vld [vmem:[#allocation9 + $0x210] sm:$0xff]  }
 0x319   :  { %v4172_v57 = vpop.f32.mrf.mxu1  ;;  %6215 = vmatprep.subr.bf16.mxu1 %v7174_v49 }
 0x31b   :  { %v4174_v59 = vpop.f32.mrf.mxu1  ;;  %6272 = vmatpush3.bf16.msra.mxu0 %v7197_v51 }
 0x31c   :  { %6216 = vmatpush3.bf16.msra.mxu1 %v7175_v52  ;;  %6273 = vmatprep.subr.bf16.mxu0 %v7198_v53 }
 0x31d   :  { %v4175_v3 = vpop.f32.mrf.mxu1  ;;  %6245 = vmatprep.subr.bf16.mxu1 %v7176_v58 }
 0x31e   :  { %v1412_v3 = vsub.s32 7, %v7528_v29 }
 0x31f   :  { %5135 = vmatmul.mubr.bf16.vlgmr.msra.gmra.mxu1 %v4510_v2  ;;  %6274 = vmatpush3.bf16.msra.mxu0 %v7199_v63 }
 0x320   :  { %6246 = vmatpush3.bf16.msra.mxu1 %v7177_v0  ;;  %6275 = vmatprep.subr.bf16.mxu0 %v7200_v1 }
 0x321   :  { %6247 = vmatprep.subr.bf16.mxu1 %v7178_v30  ;;  %v1409_v30 = vrot.slane %v7675_v8, %v266_v16 }
 0x323   :  { %6276 = vmatpush3.bf16.msra.mxu0 %v7201_v4  ;;  %v1413_v4 = vrot.slane %v7675_v8, %v1412_v3  ;;  %v7221_v3 = vld [vmem:[%s7766_s7 + $0x10] sm:$0xff]  }
 0x324   :  { %6248 = vmatpush3.bf16.msra.mxu1 %v7179_v5  ;;  %6277 = vmatprep.subr.bf16.mxu0 %v7202_v41 }
 0x325   :  { %6249 = vmatprep.subr.bf16.mxu1 %v7180_v6 }
 0x327   :  { %6278 = vmatpush3.bf16.msra.mxu0 %v7203_v9 }
 0x328   :  { %6250 = vmatpush3.bf16.msra.mxu1 %v7181_v10  ;;  %6279 = vmatprep.subr.bf16.mxu0 %v7204_v11 }
 0x329   :  { %6251 = vmatprep.subr.bf16.mxu1 %v7182_v13 }
 0x32a   :  { %v4129_v21 = vpop.f32.mrf.mxu0 }
 0x32b   :  { %6280 = vmatpush3.bf16.msra.mxu0 %v7205_v14  ;;  %v4130_v50 = vadd.f32 %v4129_v21, %v4089_v47 }
 0x32c   :  { %6252 = vmatpush3.bf16.msra.mxu1 %v7183_v34  ;;  %v4131_v22 = vpop.f32.mrf.mxu0  ;;  %6281 = vmatprep.subr.bf16.mxu0 %v7206_v15 }
 0x32d   :  { %v4132_v26 = vadd.f32 %v4131_v22, %v4091_v46  ;;  %6253 = vmatprep.subr.bf16.mxu1 %v7184_v20  ;;  %v4171_v36 = vadd.f32 %v7672_v32, %v4130_v50  ;;  %v7215_v32 = vld [vmem:[#allocation9 + $0x200] sm:$0xff]  }
 0x32e   :  { %v4133_v27 = vpop.f32.mrf.mxu0 }
 0x32f   :  { %v4173_v33 = vadd.f32 %v4172_v57, %v4132_v26  ;;  %6282 = vmatpush3.bf16.msra.mxu0 %v7207_v18  ;;  %v4505_v38 = vmax.f32 %v4171_v36, 0.0 }
 0x330   :  { %6254 = vmatpush3.bf16.msra.mxu1 %v7185_v12  ;;  %v4134_v24 = vpop.f32.mrf.mxu0  ;;  %6338 = vmatprep.subr.bf16.mxu0 %v7414_v7 }
 0x331   :  { %v4506_v48 = vmax.f32 %v4173_v33, 0.0  ;;  %6255 = vmatprep.subr.bf16.mxu1 %v7186_v43  ;;  %v4514_v55 = vpack.c.bf16 %v4505_v38, %v4505_v38  ;;  %v5598_v43 = vld [vmem:[#allocation7 + $0x8] ss:$0 sm:$0xff] }
 0x333   :  { %v4515_v28 = vpack.c.bf16 %v4506_v48, %v4506_v48 }
 0x334   :  { %6256 = vmatpush3.bf16.msra.mxu1 %v7187_v54 }
 0x335   :  { %5214 = vmatprep.mubr.bf16.mxu1 %v4515_v28  ;;  %6257 = vmatprep.subr.bf16.mxu1 %v7188_v25 }
 0x338   :  { %6258 = vmatpush3.bf16.msra.mxu1 %v7189_v60 }
 0x339   :  { %6259 = vmatprep.subr.bf16.mxu1 %v7190_v37 }
 0x33c   :  { %6260 = vmatpush3.bf16.msra.mxu1 %v7191_v35 }
 0x33d   :  { %6318 = vmatprep.subr.bf16.mxu1 %v7414_v7 }
 0x33f   :  { %5215 = vmatmul.mubr.bf16.vlgmr.msra.gmra.mxu1 %v4514_v55 }
 0x340   :  { %6319 = vmatpush3.bf16.msra.mxu1 %v7208_v39  ;;  %6334 = vmatprep.mubr.msk.bf16.mxu1 %vm7415_vm2, %v7414_v7 }
 0x341   :  { %6320 = vmatprep.subr.bf16.mxu1 %v7414_v7 }
 0x344   :  { %6321 = vmatpush3.bf16.msra.mxu1 %v7209_v61 }
 0x345   :  { %6322 = vmatprep.subr.bf16.mxu1 %v7414_v7 }
 0x348   :  { %6323 = vmatpush3.bf16.msra.mxu1 %v7210_v19 }
 0x349   :  { %6324 = vmatprep.subr.bf16.mxu1 %v7414_v7 }
 0x34c   :  { %6325 = vmatpush3.bf16.msra.mxu1 %v7211_v40 }
 0x34d   :  { %6326 = vmatprep.subr.bf16.mxu1 %v7414_v7 }
 0x350   :  { %6327 = vmatpush3.bf16.msra.mxu1 %v7212_v42 }
 0x351   :  { %6328 = vmatprep.subr.bf16.mxu1 %v7414_v7 }
 0x354   :  { %6329 = vmatpush3.bf16.msra.mxu1 %v7213_v44 }
 0x355   :  { %6330 = vmatprep.subr.bf16.mxu1 %v7414_v7 }
 0x357   :  { %v4211_v49 = vpop.f32.mrf.mxu1 }
 0x358   :  { %6331 = vmatpush3.bf16.msra.mxu1 %v7214_v45  ;;  %v4212_v41 = vadd.f32 %v4211_v49, %v1409_v30 }
 0x359   :  { %v4213_v51 = vpop.f32.mrf.mxu1  ;;  %6332 = vmatprep.subr.bf16.mxu1 %v7414_v7 }
 0x35a   :  { %v4214_v9 = vadd.f32 %v4213_v51, %v1413_v4 }
 0x35b   :  { %v4215_v52 = vpop.f32.mrf.mxu1 }
 0x35c   :  { %6333 = vmatpush3.bf16.msra.mxu1 %v7215_v32  ;;  %v6045_v32 = vld [vmem:[#allocation10] ss:$0 sm:$0xff] }
 0x35d   :  { %v4216_v53 = vpop.f32.mrf.mxu1  ;;  %6358 = vmatprep.subr.bf16.mxu1 %v7414_v7 }
 0x36a   :  { %v4252_v56 = vpop.f32.mrf.mxu0 }
 0x36b   :  { %v4253_v10 = vadd.f32 %v4252_v56, %v4212_v41 }
 0x36c   :  { %v4254_v57 = vpop.f32.mrf.mxu0 }
 0x36d   :  { %v4255_v13 = vadd.f32 %v4254_v57, %v4214_v9 }
 0x36e   :  { %v4256_v58 = vpop.f32.mrf.mxu0 }
 0x370   :  { %v4257_v59 = vpop.f32.mrf.mxu0 }
 0x371   :  { %v7216_v59 = vld [vmem:[%s7766_s7 + $0x38] sm:$0xff]  }
 0x372   :  { %v4334_v63 = vpop.f32.mrf.mxu0 }
 0x374   :  { %v4336_v0 = vpop.f32.mrf.mxu0 }
 0x376   :  { %v4338_v1 = vpop.f32.mrf.mxu0 }
 0x377   :  { %v7219_v1 = vld [vmem:[%s7766_s7 + $0x20] sm:$0xff]  }
 0x378   :  { %v4339_v2 = vpop.f32.mrf.mxu0 }
 0x379   :  { %v7220_v2 = vld [vmem:[%s7766_s7 + $0x18] sm:$0xff]  }
 0x392   :  { %v6149_v5 = vpop.f32.mrf.mxu0 }
 0x394   :  { %v6150_v6 = vpop.f32.mrf.mxu0 }
 0x395   :  { %v6151_v23 = vadd.f32 %v6150_v6, %v6149_v5 }
 0x396   :  { %v6152_v11 = vpop.f32.mrf.mxu0 }
 0x397   :  { %v4293_v31 = vpop.f32.mrf.mxu1  ;;  %v4376_v24 = vadd.f32 %v6151_v23, %v5598_v43  ;;  %v7223_v11 = vld [vmem:[%s7766_s7] sm:$0xff]  }
 0x398   :  { %v4294_v14 = vadd.f32 %v4293_v31, %v4253_v10  ;;  %v6153_v34 = vpop.f32.mrf.mxu0  ;;  %v7222_v10 = vld [vmem:[%s7766_s7 + $0x8] sm:$0xff]   ;;  %v7224_v31 = vld [vmem:[%s7768_s9 + $0x18] sm:$0xff]   ;;  %v7227_v23 = vld [vmem:[%s7768_s9] sm:$0xff]  }
 0x399   :  { %v4295_v15 = vpop.f32.mrf.mxu1 }
 0x39a   :  { %v4335_v62 = vadd.f32 %v4334_v63, %v4294_v14  ;;  %v4296_v17 = vadd.f32 %v4295_v15, %v4255_v13  ;;  %v7217_v63 = vld [vmem:[%s7766_s7 + $0x30] sm:$0xff]  }
 0x39b   :  { %v4297_v20 = vpop.f32.mrf.mxu1  ;;  %v7225_v13 = vld [vmem:[%s7768_s9 + $0x10] sm:$0xff]  }
 0x39c   :  { %v4337_v21 = vadd.f32 %v4336_v0, %v4296_v17  ;;  %v4507_v29 = vmax.f32 %v4335_v62, 0.0  ;;  %v7218_v0 = vld [vmem:[%s7766_s7 + $0x28] sm:$0xff]  }
 0x39d   :  { %v4298_v46 = vpop.f32.mrf.mxu1 }
 0x39e   :  { %v4508_v16 = vmax.f32 %v4337_v21, 0.0  ;;  %v4516_v8 = vpack.c.bf16 %v4507_v29, %v4507_v29 }
 0x3a0   :  { %v4517_v18 = vpack.c.bf16 %v4508_v16, %v4508_v16 }
 0x3a2   :  { %5254 = vmatprep.mubr.bf16.mxu0 %v4517_v18 }
 0x3a3   :  { %5255 = vmatmul.mubr.bf16.vlgmr.msra.gmra.mxu0 %v4516_v8 }
 0x3a4   :  { %6354 = vmatprep.mubr.msk.bf16.mxu0 %vm7415_vm2, %v7414_v7  ;;  %6339 = vmatpush3.bf16.msra.mxu0 %v7216_v59 }
 0x3a5   :  { %6340 = vmatprep.subr.bf16.mxu0 %v7414_v7 }
 0x3a8   :  { %6341 = vmatpush3.bf16.msra.mxu0 %v7217_v63 }
 0x3a9   :  { %6342 = vmatprep.subr.bf16.mxu0 %v7414_v7 }
 0x3ac   :  { %6343 = vmatpush3.bf16.msra.mxu0 %v7218_v0 }
 0x3ad   :  { %6344 = vmatprep.subr.bf16.mxu0 %v7414_v7 }
 0x3b0   :  { %6345 = vmatpush3.bf16.msra.mxu0 %v7219_v1 }
 0x3b1   :  { %6346 = vmatprep.subr.bf16.mxu0 %v7414_v7 }
 0x3b2   :  { %v6193_v22 = vpop.f32.mrf.mxu0 }
 0x3b4   :  { %v6194_v12 = vpop.f32.mrf.mxu0  ;;  %6347 = vmatpush3.bf16.msra.mxu0 %v7220_v2 }
 0x3b5   :  { %v6195_v48 = vadd.f32 %v6194_v12, %v6193_v22  ;;  %6348 = vmatprep.subr.bf16.mxu0 %v7414_v7  ;;  %v7226_v12 = vld [vmem:[%s7768_s9 + $0x8] sm:$0xff]  }
 0x3b6   :  { %v6196_v26 = vpop.f32.mrf.mxu0 }
 0x3b7   :  { %v6171_v27 = vpop.f32.mrf.mxu1  ;;  %v6118_v26 = vld [vmem:[#allocation12] ss:$0 sm:$0xff] }
 0x3b8   :  { %v6197_v47 = vpop.f32.mrf.mxu0  ;;  %6349 = vmatpush3.bf16.msra.mxu0 %v7221_v3 }
 0x3b9   :  { %v6172_v33 = vpop.f32.mrf.mxu1  ;;  %6350 = vmatprep.subr.bf16.mxu0 %v7414_v7 }
 0x3ba   :  { %v6173_v54 = vadd.f32 %v6172_v33, %v6171_v27 }
 0x3bb   :  { %v6174_v50 = vpop.f32.mrf.mxu1 }
 0x3bc   :  { %v4416_v25 = vadd.f32 %v6173_v54, %v4376_v24  ;;  %6351 = vmatpush3.bf16.msra.mxu0 %v7222_v10 }
 0x3bd   :  { %v6175_v28 = vpop.f32.mrf.mxu1  ;;  %6352 = vmatprep.subr.bf16.mxu0 %v7414_v7 }
 0x3be   :  { %v4456_v60 = vadd.f32 %v6195_v48, %v4416_v25  ;;  %v6127_v48 = vld [vmem:[#allocation13] ss:$0 sm:$0xff] }
 0x3bf   :  { %v4495_v36 = vpop.f32.mrf.mxu1 }
 0x3c0   :  { %v4496_v37 = vadd.f32 %v4495_v36, %v4456_v60  ;;  %6353 = vmatpush3.bf16.msra.mxu0 %v7223_v11 }
 0x3c1   :  { %v6316_v35 = vpop.f32.mrf.mxu1 }
 0x3c2   :  { %v4509_v38 = vmax.f32 %v4496_v37, 0.0 }
 0x3c3   :  { %v4498_v39 = vpop.f32.mrf.mxu1 }
 0x3c4   :  { %v4518_v55 = vpack.c.bf16 %v4509_v38, %v4509_v38 }
 0x3c5   :  { %v6317_v61 = vpop.f32.mrf.mxu1 }
 0x3c6   :  { %6335 = vmatmul.mubr.bf16.vlgmr.msra.gmra.mxu1 %v4518_v55 }
 0x3c7   :  { %6366 = vmatprep.mubr.msk.bf16.mxu1 %vm7415_vm2, %v7414_v7  ;;  %6359 = vmatpush3.bf16.msra.mxu1 %v7224_v31 }
 0x3c8   :  { %6360 = vmatprep.subr.bf16.mxu1 %v7414_v7 }
 0x3cb   :  { %6361 = vmatpush3.bf16.msra.mxu1 %v7225_v13 }
 0x3cc   :  { %6362 = vmatprep.subr.bf16.mxu1 %v7414_v7 }
 0x3cf   :  { %6363 = vmatpush3.bf16.msra.mxu1 %v7226_v12 }
 0x3d0   :  { %6364 = vmatprep.subr.bf16.mxu1 %v7414_v7 }
 0x3d2   :  { %v6239_v19 = vpop.f32.mrf.mxu0 }
 0x3d3   :  { %6365 = vmatpush3.bf16.msra.mxu1 %v7227_v23 }
 0x3d4   :  { %v6240_v40 = vpop.f32.mrf.mxu0 }
 0x3d5   :  { %v6241_v42 = vadd.f32 %v6240_v40, %v6239_v19 }
 0x3d6   :  { %v6242_v44 = vpop.f32.mrf.mxu0 }
 0x3d8   :  { %v6243_v45 = vpop.f32.mrf.mxu0 }
 0x3df   :  { %v6217_v49 = vpop.f32.mrf.mxu1 }
 0x3e1   :  { %v6218_v51 = vpop.f32.mrf.mxu1 }
 0x3e2   :  { %v6219_v52 = vadd.f32 %v6218_v51, %v6217_v49 }
 0x3e3   :  { %v6220_v53 = vpop.f32.mrf.mxu1 }
 0x3e4   :  { %v5137_v56 = vadd.f32 %v6219_v52, %v6045_v32 }
 0x3e5   :  { %v6221_v57 = vpop.f32.mrf.mxu1 }
 0x3e6   :  { %v5177_v58 = vadd.f32 %v6241_v42, %v5137_v56 }
 0x3ff   :  { %v6261_v30 = vpop.f32.mrf.mxu1 }
 0x401   :  { %v6262_v4 = vpop.f32.mrf.mxu1 }
 0x402   :  { %v6263_v5 = vadd.f32 %v6262_v4, %v6261_v30 }
 0x403   :  { %v6264_v41 = vpop.f32.mrf.mxu1 }
 0x404   :  { %v5217_v6 = vadd.f32 %v6263_v5, %v5177_v58 }
 0x405   :  { %v6265_v9 = vpop.f32.mrf.mxu1 }
 0x463   :  { %v6283_v14 = vpop.f32.mrf.mxu0 }
 0x465   :  { %v6284_v34 = vpop.f32.mrf.mxu0 }
 0x466   :  { %v6285_v17 = vadd.f32 %v6284_v34, %v6283_v14 }
 0x467   :  { %v6286_v15 = vpop.f32.mrf.mxu0 }
 0x468   :  { %v5257_v20 = vadd.f32 %v6285_v17, %v5217_v6 }
 0x469   :  { %v6287_v62 = vpop.f32.mrf.mxu0 }
 0x486   :  { %v5296_v21 = vpop.f32.mrf.mxu1 }
 0x487   :  { %v5297_v29 = vadd.f32 %v5296_v21, %v5257_v20 }
 0x488   :  { %v6336_v46 = vpop.f32.mrf.mxu1 }
 0x489   :  { %v5302_v16 = vmax.f32 %v5297_v29, 0.0 }
 0x48a   :  { %v5299_v18 = vpop.f32.mrf.mxu1 }
 0x48b   :  { %v5303_v8 = vpack.c.bf16 %v5302_v16, %v5302_v16 }
 0x48c   :  { %v6337_v22 = vpop.f32.mrf.mxu1 }
 0x48d   :  { %6355 = vmatmul.mubr.bf16.vlgmr.msra.gmra.mxu0 %v5303_v8 }
 0x54d   :  { %v5409_v43 = vpop.f32.mrf.mxu0 }
 0x54e   :  { %v5410_v27 = vadd.f32 %v6118_v26, %v5409_v43 }
 0x54f   :  { %v6356_v47 = vpop.f32.mrf.mxu0 }
 0x550   :  { %v5415_v33 = vmax.f32 %v5410_v27, 0.0 }
 0x551   :  { %v5412_v24 = vpop.f32.mrf.mxu0 }
 0x552   :  { %v5416_v54 = vpack.c.bf16 %v5415_v33, %v5415_v33 }
 0x553   :  { %v6357_v50 = vpop.f32.mrf.mxu0 }
 0x554   :  { %6367 = vmatmul.mubr.msk.bf16.vlgmr.msra.gmra.mxu1 %vm707_vm0, %v5416_v54 }
 0x614   :  { %v5493_v25 = vpop.f32.mrf.mxu1 }
 0x615   :  { %v5494_v28 = vadd.f32 %v6127_v48, %v5493_v25 }
 0x616   :  { %v6368_v7 = vpop.f32.mrf.mxu1 }
 0x617   :  { %5500 = vst.msk [vmem:[%s7770_s11] sm:$0xff] %vm5499_vm3, %v5494_v28 }
 0x618   :  { %v5496_v60 = vpop.f32.mrf.mxu1 }
 0x61a   :  { %v6369_v36 = vpop.f32.mrf.mxu1 }
 0x61b   :  { %5505 = vsyncpa [#allocation3], 1 }
 0x61c   :  { %5506 = vsyncpa [#allocation5], 1 }
 0x61d   :  { %5507 = vsyncpa [#allocation8], 1 }
 0x61e   :  { %5508 = vsyncpa [#allocation11], 1 }
 0x61f   :  { %5509 = vsyncpa [#allocation14], 1 }

</bundles_post_ra>
